<compile_context>
chip_gen: v5e
topology: v5e:2x2
jax: 0.10.0
libtpu: 0.0.40
codegen_flags: <defaults>
</compile_context>

<pallas_src>
import math

import jax
import jax.numpy as jnp
from jax.experimental import pallas as pl
from jax.experimental.pallas import tpu as pltpu


# ---------------------------------------------------------------------------
# Fused kernel: whole network for one batch tile.
# ---------------------------------------------------------------------------
def fused_net_kernel(x_ref, w1_ref, b1_ref, w2_ref, b2_ref,
                     fw1_ref, fb1_ref, fw2_ref, fb2_ref, o_ref):
    rows = x_ref.shape[0]          # = bt * 24 (im2col rows for this tile)
    bt = rows // 24

    # ---- conv1: one im2col matmul  (M=bt*24, K=140, N=256) ------------------
    # Output lanes: parity*128 + o*12 + t  (o = out channel, column = 2t+parity;
    # lanes 120..127 of each half are zero padding).
    acc1 = jnp.dot(x_ref[...], w1_ref[...],
                   preferred_element_type=jnp.float32)               # (bt*24, 256)
    acc1 = acc1 + b1_ref[...]
    # 2x2 pool, width: even/odd column halves are vreg-aligned -> VPU max.
    wp = jnp.maximum(acc1[:, :128], acc1[:, 128:])                   # (bt*24, 128)
    # 2x2 pool, height: adjacent output-row pairs; then relu.
    a1 = jnp.maximum(jnp.max(wp.reshape(bt, 12, 2, 128), axis=2), 0.0)  # (bt,12,128)

    # ---- conv2: 5 banded MXU matmuls (K=128, N=160) -------------------------
    # TODO(synk): Dropout2d is a training-time stochastic op; identity here.
    # Output lanes: parity*80 + o*4 + u  (column = 2u+parity).
    acc2 = None
    for ki in range(5):
        s = a1[:, ki:ki + 8, :].reshape(bt * 8, 128).astype(jnp.bfloat16)
        t = jnp.dot(s, w2_ref[ki], preferred_element_type=jnp.float32)
        acc2 = t if acc2 is None else acc2 + t                       # (bt*8, 160)
    acc2 = acc2 + b2_ref[...]
    wp2 = jnp.maximum(acc2[:, :80], acc2[:, 80:])                    # (bt*8, 80)
    a2 = jnp.maximum(jnp.max(wp2.reshape(bt, 4, 2, 80), axis=2), 0.0)  # (bt,4,80)

    # ---- fc1 (320->50) + relu ----------------------------------------------
    # Torch's channel-major .view(-1, 320) is folded into fw1 (4, 80, 50);
    # contract the 4 pooled-height slabs of the live value directly.
    h1 = None
    for h in range(4):
        t = jnp.dot(a2[:, h, :].astype(jnp.bfloat16), fw1_ref[h],
                    preferred_element_type=jnp.float32)              # (bt, 50)
        h1 = t if h1 is None else h1 + t
    h1 = jnp.maximum(h1 + fb1_ref[...], 0.0)
    # TODO(synk): F.dropout is identity at inference.

    # ---- fc2 (50->10, padded to 128 lanes) + log_softmax --------------------
    logits = jnp.dot(h1.astype(jnp.bfloat16), fw2_ref[...],
                     preferred_element_type=jnp.float32) + fb2_ref[...]   # (bt, 128)
    m = jnp.max(logits, axis=1, keepdims=True)
    e = jnp.exp(logits - m)
    o_ref[...] = logits - m - jnp.log(jnp.sum(e, axis=1, keepdims=True))


# ---------------------------------------------------------------------------
# Structured-weight construction (run ONCE, outside the jitted forward).
# ---------------------------------------------------------------------------
def prepare_net_params(p):
    f32, bf16 = jnp.float32, jnp.bfloat16

    # conv1 im2col weight (140, 256):
    #   row = ki*28 + q ; lane = parity*128 + o*12 + t  (output column j = 2t+p)
    w1 = p["conv1_w"].astype(f32)[:, 0]                        # (10, 5, 5) [o,ki,kj]
    q = jnp.arange(28)[:, None]
    j = jnp.arange(24)[None, :]
    d = q - j
    g = jnp.where((d >= 0) & (d <= 4), w1[:, :, jnp.clip(d, 0, 4)], 0.0)
    g = g.reshape(10, 5, 28, 12, 2)                            # [o, ki, q, t, p]
    g = jnp.transpose(g, (1, 2, 4, 0, 3)).reshape(5, 28, 2, 120)
    w1cat = jnp.zeros((5, 28, 2, 128), f32).at[..., :120].set(g)
    w1cat = w1cat.reshape(140, 256).astype(bf16)
    b1v = jnp.repeat(p["conv1_b"].astype(f32), 12)             # lane = o*12 + t
    b1cat = jnp.zeros((2, 128), f32).at[:, :120].set(b1v[None, :]).reshape(1, 256)

    # conv2 banded weight (5, 128, 160):
    #   K = c*12 + q (rows 120..127 zero) ; lane = parity*80 + o*4 + u
    w2 = p["conv2_w"].astype(f32)                              # (20, 10, 5, 5)
    q = jnp.arange(12)[:, None]
    j = jnp.arange(8)[None, :]
    d = q - j
    g = jnp.where((d >= 0) & (d <= 4), w2[:, :, :, jnp.clip(d, 0, 4)], 0.0)
    g = g.reshape(20, 10, 5, 12, 4, 2)                         # [o, c, ki, q, u, p]
    g = jnp.transpose(g, (2, 1, 3, 5, 0, 4)).reshape(5, 120, 160)
    w2s = jnp.zeros((5, 128, 160), f32).at[:, :120, :].set(g).astype(bf16)
    b2v = jnp.repeat(p["conv2_b"].astype(f32), 4)              # lane = o*4 + u
    b2cat = jnp.concatenate([b2v, b2v]).reshape(1, 160)

    # fc1: fold torch's (c, h, w) flatten; fw1[h, c*4+w, f] = fc1_w[f, c*16+h*4+w]
    fw1 = p["fc1_w"].astype(f32).reshape(50, 20, 4, 4)         # [f, c, h, w]
    fw1 = jnp.transpose(fw1, (2, 1, 3, 0)).reshape(4, 80, 50).astype(bf16)
    fb1 = p["fc1_b"].astype(f32).reshape(1, 50)

    # fc2 padded to 128 lanes; dummy classes get -1e30 bias (exp -> 0 exactly).
    fw2 = jnp.zeros((50, 128), f32).at[:, :10].set(p["fc2_w"].astype(f32).T)
    fw2 = fw2.astype(bf16)
    fb2 = jnp.full((1, 128), -1e30, f32).at[0, :10].set(p["fc2_b"].astype(f32))

    return (w1cat, b1cat, w2s, b2cat, fw1, fb1, fw2, fb2)


# ---------------------------------------------------------------------------
# Wrapper
# ---------------------------------------------------------------------------
def _round_up(n, m):
    return -(-n // m) * m


def _tiling(batch):
    """Pick (batch_tile, padded_batch): tile <= 128, multiple of 8, and >= 2
    grid steps once there is enough work (v7x has 2 TensorCores)."""
    b8 = _round_up(max(batch, 1), 8)
    n_tiles = max(-(-b8 // 128), 2 if b8 >= 32 else 1)
    bt = _round_up(-(-b8 // n_tiles), 8)
    return bt, n_tiles * bt


def net_forward(x_nchw, kparams):
    B = x_nchw.shape[0]
    bt, b_pad = _tiling(B)
    n_tiles = b_pad // bt

    # im2col over the 5 conv1 kernel rows: x_im[b, i, ki*28+q] = x[b, i+ki, q]
    x28 = x_nchw[:, 0, :, :].astype(jnp.float32)               # (B, 28, 28)
    x_im = jnp.concatenate([x28[:, ki:ki + 24, :] for ki in range(5)], axis=2)
    x_im = x_im.astype(jnp.bfloat16)                           # (B, 24, 140)
    if b_pad != B:
        x_im = jnp.pad(x_im, ((0, b_pad - B), (0, 0), (0, 0)))
    x_im = x_im.reshape(b_pad * 24, 140)                       # lane-dense 2-D slab

    (w1, b1, w2, b2, fw1, fb1, fw2, fb2) = kparams

    out = pl.pallas_call(
        fused_net_kernel,
        out_shape=jax.ShapeDtypeStruct((b_pad, 128), jnp.float32),
        grid=(n_tiles,),
        in_specs=[
            pl.BlockSpec((bt * 24, 140), lambda b: (b, 0)),    # im2col input tile
            pl.BlockSpec((140, 256), lambda b: (0, 0)),        # conv1 im2col W
            pl.BlockSpec((1, 256), lambda b: (0, 0)),          # conv1 bias
            pl.BlockSpec((5, 128, 160), lambda b: (0, 0, 0)),  # conv2 banded W
            pl.BlockSpec((1, 160), lambda b: (0, 0)),          # conv2 bias
            pl.BlockSpec((4, 80, 50), lambda b: (0, 0, 0)),    # fc1 (flatten folded)
            pl.BlockSpec((1, 50), lambda b: (0, 0)),           # fc1 bias
            pl.BlockSpec((50, 128), lambda b: (0, 0)),         # fc2 (padded lanes)
            pl.BlockSpec((1, 128), lambda b: (0, 0)),          # fc2 bias (padded)
        ],
        out_specs=pl.BlockSpec((bt, 128), lambda b: (b, 0)),
        compiler_params=pltpu.CompilerParams(
            dimension_semantics=("parallel",),
            vmem_limit_bytes=32 * 1024 * 1024),
    )(x_im, w1, b1, w2, b2, fw1, fb1, fw2, fb2)

    return out[:B, :10]


# ---------------------------------------------------------------------------
# Pure-JAX reference (correctness check)
# ---------------------------------------------------------------------------
def ref_forward(x_nchw, p):
    B = x_nchw.shape[0]
    x = jnp.transpose(x_nchw, (0, 2, 3, 1))
    dn = ("NHWC", "HWIO", "NHWC")
    w1 = jnp.transpose(p["conv1_w"], (2, 3, 1, 0))
    y = jax.lax.conv_general_dilated(x, w1, (1, 1), "VALID", dimension_numbers=dn)
    y = y + p["conv1_b"]
    y = jax.lax.reduce_window(y, -jnp.inf, jax.lax.max, (1, 2, 2, 1), (1, 2, 2, 1), "VALID")
    y = jnp.maximum(y, 0.0)
    w2 = jnp.transpose(p["conv2_w"], (2, 3, 1, 0))
    y = jax.lax.conv_general_dilated(y, w2, (1, 1), "VALID", dimension_numbers=dn)
    y = y + p["conv2_b"]
    y = jax.lax.reduce_window(y, -jnp.inf, jax.lax.max, (1, 2, 2, 1), (1, 2, 2, 1), "VALID")
    y = jnp.maximum(y, 0.0)
    flat = jnp.transpose(y, (0, 3, 1, 2)).reshape(B, 320)
    h = jnp.maximum(flat @ p["fc1_w"].T + p["fc1_b"], 0.0)
    logits = h @ p["fc2_w"].T + p["fc2_b"]
    return jax.nn.log_softmax(logits, axis=1)


def init_params(key):
    ks = jax.random.split(key, 8)

    def u(k, shape, fan_in):
        bound = 1.0 / math.sqrt(fan_in)
        return jax.random.uniform(k, shape, jnp.float32, -bound, bound)

    return {
        "conv1_w": u(ks[0], (10, 1, 5, 5), 25),
        "conv1_b": u(ks[1], (10,), 25),
        "conv2_w": u(ks[2], (20, 10, 5, 5), 250),
        "conv2_b": u(ks[3], (20,), 250),
        "fc1_w": u(ks[4], (50, 320), 320),
        "fc1_b": u(ks[5], (50,), 320),
        "fc2_w": u(ks[6], (10, 50), 50),
        "fc2_b": u(ks[7], (10,), 50),
    }


if __name__ == "__main__":
    key = jax.random.PRNGKey(0)
    kp_key, kx1, kx2 = jax.random.split(key, 3)
    params = init_params(kp_key)
    kparams = prepare_net_params(params)          # built once, outside jit

    fwd = jax.jit(net_forward)

    # Small primary check (batch=2, NCHW like PyTorch).
    x = jax.random.normal(kx1, (2, 1, 28, 28), jnp.float32)
    out = jax.block_until_ready(fwd(x, kparams))
    ref = jax.block_until_ready(ref_forward(x, params))
    assert out.shape == (2, 10), out.shape
    assert bool(jnp.allclose(out, ref, atol=2e-2, rtol=2e-2)), "mismatch (B=2)"

    # Exercise batch padding + a multi-step grid.
    x2 = jax.random.normal(kx2, (36, 1, 28, 28), jnp.float32)
    out2 = jax.block_until_ready(fwd(x2, kparams))
    ref2 = jax.block_until_ready(ref_forward(x2, params))
    assert out2.shape == (36, 10), out2.shape
    assert bool(jnp.allclose(out2, ref2, atol=2e-2, rtol=2e-2)), "mismatch (B=36)"

    print("KERNEL_OK")
</pallas_src>

<mosaic_0001>
module attributes {stable_mosaic.version = 11 : i64} {
  func.func @fused_net_kernel(%arg0: i32, %arg1: memref<192x140xbf16, #tpu.memory_space<vmem>>, %arg2: memref<140x256xbf16, #tpu.memory_space<vmem>>, %arg3: memref<1x256xf32, #tpu.memory_space<vmem>>, %arg4: memref<5x128x160xbf16, #tpu.memory_space<vmem>>, %arg5: memref<1x160xf32, #tpu.memory_space<vmem>>, %arg6: memref<4x80x50xbf16, #tpu.memory_space<vmem>>, %arg7: memref<1x50xf32, #tpu.memory_space<vmem>>, %arg8: memref<50x128xbf16, #tpu.memory_space<vmem>>, %arg9: memref<1x128xf32, #tpu.memory_space<vmem>>, %arg10: memref<8x128xf32, #tpu.memory_space<vmem>>) attributes {dimension_semantics = [#tpu.dimension_semantics<parallel>], iteration_bounds = array<i64: 1>, scalar_prefetch = 0 : i64, scratch_operands = 0 : i64, tpu.core_type = #tpu.core_type<tc>, window_params = [{transform_indices = @transform_0, window_bounds = array<i64: 192, 140>}, {pipeline_mode = #tpu.pipeline_mode<synchronous>, transform_indices = @transform_1, window_bounds = array<i64: 140, 256>}, {pipeline_mode = #tpu.pipeline_mode<synchronous>, transform_indices = @transform_2, window_bounds = array<i64: 1, 256>}, {pipeline_mode = #tpu.pipeline_mode<synchronous>, transform_indices = @transform_3, window_bounds = array<i64: 5, 128, 160>}, {pipeline_mode = #tpu.pipeline_mode<synchronous>, transform_indices = @transform_4, window_bounds = array<i64: 1, 160>}, {pipeline_mode = #tpu.pipeline_mode<synchronous>, transform_indices = @transform_5, window_bounds = array<i64: 4, 80, 50>}, {pipeline_mode = #tpu.pipeline_mode<synchronous>, transform_indices = @transform_6, window_bounds = array<i64: 1, 50>}, {pipeline_mode = #tpu.pipeline_mode<synchronous>, transform_indices = @transform_7, window_bounds = array<i64: 50, 128>}, {pipeline_mode = #tpu.pipeline_mode<synchronous>, transform_indices = @transform_8, window_bounds = array<i64: 1, 128>}, {transform_indices = @transform_9, window_bounds = array<i64: 8, 128>}]} {
    %c0 = arith.constant 0 : index
    %c0_0 = arith.constant 0 : index
    %0 = vector.load %arg1[%c0, %c0_0] : memref<192x140xbf16, #tpu.memory_space<vmem>>, vector<192x140xbf16>
    %c0_1 = arith.constant 0 : index
    %c0_2 = arith.constant 0 : index
    %1 = vector.load %arg2[%c0_1, %c0_2] : memref<140x256xbf16, #tpu.memory_space<vmem>>, vector<140x256xbf16>
    %cst = arith.constant dense<0.000000e+00> : vector<192x256xf32>
    %2 = tpu.matmul %0, %1, %cst {dimension_numbers = #tpu.dot_dimension_numbers<[1], [0], [0], [1], [0, 0, 1, 1], [], []>} : vector<192x140xbf16>, vector<140x256xbf16>, vector<192x256xf32> -> vector<192x256xf32>
    %c0_3 = arith.constant 0 : index
    %c0_4 = arith.constant 0 : index
    %3 = vector.load %arg3[%c0_3, %c0_4] : memref<1x256xf32, #tpu.memory_space<vmem>>, vector<1x256xf32>
    %4 = vector.broadcast %3 : vector<1x256xf32> to vector<192x256xf32>
    %5 = arith.addf %2, %4 : vector<192x256xf32>
    %6 = vector.extract_strided_slice %5 {offsets = [0, 0], sizes = [192, 128], strides = [1, 1]} : vector<192x256xf32> to vector<192x128xf32>
    %7 = vector.extract_strided_slice %5 {offsets = [0, 128], sizes = [192, 128], strides = [1, 1]} : vector<192x256xf32> to vector<192x128xf32>
    %8 = arith.maximumf %6, %7 : vector<192x128xf32>
    %9 = vector.shape_cast %8 : vector<192x128xf32> to vector<8x12x2x128xf32>
    %cst_5 = arith.constant dense<0xFF800000> : vector<8x12x128xf32>
    %10 = vector.multi_reduction <maximumf>, %9, %cst_5 [2] : vector<8x12x2x128xf32> to vector<8x12x128xf32>
    %cst_6 = arith.constant 0.000000e+00 : f32
    %11 = vector.broadcast %cst_6 : f32 to vector<8x12x128xf32>
    %12 = arith.maximumf %10, %11 : vector<8x12x128xf32>
    %13 = vector.extract_strided_slice %12 {offsets = [0, 0, 0], sizes = [8, 8, 128], strides = [1, 1, 1]} : vector<8x12x128xf32> to vector<8x8x128xf32>
    %14 = vector.shape_cast %13 : vector<8x8x128xf32> to vector<64x128xf32>
    %15 = arith.truncf %14 : vector<64x128xf32> to vector<64x128xbf16>
    %c0_7 = arith.constant 0 : index
    %c0_8 = arith.constant 0 : index
    %c0_9 = arith.constant 0 : index
    %16 = vector.load %arg4[%c0_7, %c0_8, %c0_9] : memref<5x128x160xbf16, #tpu.memory_space<vmem>>, vector<1x128x160xbf16>
    %17 = vector.shape_cast %16 : vector<1x128x160xbf16> to vector<128x160xbf16>
    %cst_10 = arith.constant dense<0.000000e+00> : vector<64x160xf32>
    %18 = tpu.matmul %15, %17, %cst_10 {dimension_numbers = #tpu.dot_dimension_numbers<[1], [0], [0], [1], [0, 0, 1, 1], [], []>} : vector<64x128xbf16>, vector<128x160xbf16>, vector<64x160xf32> -> vector<64x160xf32>
    %19 = vector.extract_strided_slice %12 {offsets = [0, 1, 0], sizes = [8, 8, 128], strides = [1, 1, 1]} : vector<8x12x128xf32> to vector<8x8x128xf32>
    %20 = vector.shape_cast %19 : vector<8x8x128xf32> to vector<64x128xf32>
    %21 = arith.truncf %20 : vector<64x128xf32> to vector<64x128xbf16>
    %c1 = arith.constant 1 : index
    %c0_11 = arith.constant 0 : index
    %c0_12 = arith.constant 0 : index
    %22 = vector.load %arg4[%c1, %c0_11, %c0_12] : memref<5x128x160xbf16, #tpu.memory_space<vmem>>, vector<1x128x160xbf16>
    %23 = vector.shape_cast %22 : vector<1x128x160xbf16> to vector<128x160xbf16>
    %cst_13 = arith.constant dense<0.000000e+00> : vector<64x160xf32>
    %24 = tpu.matmul %21, %23, %cst_13 {dimension_numbers = #tpu.dot_dimension_numbers<[1], [0], [0], [1], [0, 0, 1, 1], [], []>} : vector<64x128xbf16>, vector<128x160xbf16>, vector<64x160xf32> -> vector<64x160xf32>
    %25 = arith.addf %18, %24 : vector<64x160xf32>
    %26 = vector.extract_strided_slice %12 {offsets = [0, 2, 0], sizes = [8, 8, 128], strides = [1, 1, 1]} : vector<8x12x128xf32> to vector<8x8x128xf32>
    %27 = vector.shape_cast %26 : vector<8x8x128xf32> to vector<64x128xf32>
    %28 = arith.truncf %27 : vector<64x128xf32> to vector<64x128xbf16>
    %c2 = arith.constant 2 : index
    %c0_14 = arith.constant 0 : index
    %c0_15 = arith.constant 0 : index
    %29 = vector.load %arg4[%c2, %c0_14, %c0_15] : memref<5x128x160xbf16, #tpu.memory_space<vmem>>, vector<1x128x160xbf16>
    %30 = vector.shape_cast %29 : vector<1x128x160xbf16> to vector<128x160xbf16>
    %cst_16 = arith.constant dense<0.000000e+00> : vector<64x160xf32>
    %31 = tpu.matmul %28, %30, %cst_16 {dimension_numbers = #tpu.dot_dimension_numbers<[1], [0], [0], [1], [0, 0, 1, 1], [], []>} : vector<64x128xbf16>, vector<128x160xbf16>, vector<64x160xf32> -> vector<64x160xf32>
    %32 = arith.addf %25, %31 : vector<64x160xf32>
    %33 = vector.extract_strided_slice %12 {offsets = [0, 3, 0], sizes = [8, 8, 128], strides = [1, 1, 1]} : vector<8x12x128xf32> to vector<8x8x128xf32>
    %34 = vector.shape_cast %33 : vector<8x8x128xf32> to vector<64x128xf32>
    %35 = arith.truncf %34 : vector<64x128xf32> to vector<64x128xbf16>
    %c3 = arith.constant 3 : index
    %c0_17 = arith.constant 0 : index
    %c0_18 = arith.constant 0 : index
    %36 = vector.load %arg4[%c3, %c0_17, %c0_18] : memref<5x128x160xbf16, #tpu.memory_space<vmem>>, vector<1x128x160xbf16>
    %37 = vector.shape_cast %36 : vector<1x128x160xbf16> to vector<128x160xbf16>
    %cst_19 = arith.constant dense<0.000000e+00> : vector<64x160xf32>
    %38 = tpu.matmul %35, %37, %cst_19 {dimension_numbers = #tpu.dot_dimension_numbers<[1], [0], [0], [1], [0, 0, 1, 1], [], []>} : vector<64x128xbf16>, vector<128x160xbf16>, vector<64x160xf32> -> vector<64x160xf32>
    %39 = arith.addf %32, %38 : vector<64x160xf32>
    %40 = vector.extract_strided_slice %12 {offsets = [0, 4, 0], sizes = [8, 8, 128], strides = [1, 1, 1]} : vector<8x12x128xf32> to vector<8x8x128xf32>
    %41 = vector.shape_cast %40 : vector<8x8x128xf32> to vector<64x128xf32>
    %42 = arith.truncf %41 : vector<64x128xf32> to vector<64x128xbf16>
    %c4 = arith.constant 4 : index
    %c0_20 = arith.constant 0 : index
    %c0_21 = arith.constant 0 : index
    %43 = vector.load %arg4[%c4, %c0_20, %c0_21] : memref<5x128x160xbf16, #tpu.memory_space<vmem>>, vector<1x128x160xbf16>
    %44 = vector.shape_cast %43 : vector<1x128x160xbf16> to vector<128x160xbf16>
    %cst_22 = arith.constant dense<0.000000e+00> : vector<64x160xf32>
    %45 = tpu.matmul %42, %44, %cst_22 {dimension_numbers = #tpu.dot_dimension_numbers<[1], [0], [0], [1], [0, 0, 1, 1], [], []>} : vector<64x128xbf16>, vector<128x160xbf16>, vector<64x160xf32> -> vector<64x160xf32>
    %46 = arith.addf %39, %45 : vector<64x160xf32>
    %c0_23 = arith.constant 0 : index
    %c0_24 = arith.constant 0 : index
    %47 = vector.load %arg5[%c0_23, %c0_24] : memref<1x160xf32, #tpu.memory_space<vmem>>, vector<1x160xf32>
    %48 = vector.broadcast %47 : vector<1x160xf32> to vector<64x160xf32>
    %49 = arith.addf %46, %48 : vector<64x160xf32>
    %50 = vector.extract_strided_slice %49 {offsets = [0, 0], sizes = [64, 80], strides = [1, 1]} : vector<64x160xf32> to vector<64x80xf32>
    %51 = vector.extract_strided_slice %49 {offsets = [0, 80], sizes = [64, 80], strides = [1, 1]} : vector<64x160xf32> to vector<64x80xf32>
    %52 = arith.maximumf %50, %51 : vector<64x80xf32>
    %53 = vector.shape_cast %52 : vector<64x80xf32> to vector<8x4x2x80xf32>
    %cst_25 = arith.constant dense<0xFF800000> : vector<8x4x80xf32>
    %54 = vector.multi_reduction <maximumf>, %53, %cst_25 [2] : vector<8x4x2x80xf32> to vector<8x4x80xf32>
    %cst_26 = arith.constant 0.000000e+00 : f32
    %55 = vector.broadcast %cst_26 : f32 to vector<8x4x80xf32>
    %56 = arith.maximumf %54, %55 : vector<8x4x80xf32>
    %57 = vector.extract_strided_slice %56 {offsets = [0, 0, 0], sizes = [8, 1, 80], strides = [1, 1, 1]} : vector<8x4x80xf32> to vector<8x1x80xf32>
    %58 = vector.shape_cast %57 : vector<8x1x80xf32> to vector<8x80xf32>
    %59 = arith.truncf %58 : vector<8x80xf32> to vector<8x80xbf16>
    %c0_27 = arith.constant 0 : index
    %c0_28 = arith.constant 0 : index
    %c0_29 = arith.constant 0 : index
    %60 = vector.load %arg6[%c0_27, %c0_28, %c0_29] : memref<4x80x50xbf16, #tpu.memory_space<vmem>>, vector<1x80x50xbf16>
    %61 = vector.shape_cast %60 : vector<1x80x50xbf16> to vector<80x50xbf16>
    %cst_30 = arith.constant dense<0.000000e+00> : vector<8x50xf32>
    %62 = tpu.matmul %59, %61, %cst_30 {dimension_numbers = #tpu.dot_dimension_numbers<[1], [0], [0], [1], [0, 0, 1, 1], [], []>} : vector<8x80xbf16>, vector<80x50xbf16>, vector<8x50xf32> -> vector<8x50xf32>
    %63 = vector.extract_strided_slice %56 {offsets = [0, 1, 0], sizes = [8, 1, 80], strides = [1, 1, 1]} : vector<8x4x80xf32> to vector<8x1x80xf32>
    %64 = vector.shape_cast %63 : vector<8x1x80xf32> to vector<8x80xf32>
    %65 = arith.truncf %64 : vector<8x80xf32> to vector<8x80xbf16>
    %c1_31 = arith.constant 1 : index
    %c0_32 = arith.constant 0 : index
    %c0_33 = arith.constant 0 : index
    %66 = vector.load %arg6[%c1_31, %c0_32, %c0_33] : memref<4x80x50xbf16, #tpu.memory_space<vmem>>, vector<1x80x50xbf16>
    %67 = vector.shape_cast %66 : vector<1x80x50xbf16> to vector<80x50xbf16>
    %cst_34 = arith.constant dense<0.000000e+00> : vector<8x50xf32>
    %68 = tpu.matmul %65, %67, %cst_34 {dimension_numbers = #tpu.dot_dimension_numbers<[1], [0], [0], [1], [0, 0, 1, 1], [], []>} : vector<8x80xbf16>, vector<80x50xbf16>, vector<8x50xf32> -> vector<8x50xf32>
    %69 = arith.addf %62, %68 : vector<8x50xf32>
    %70 = vector.extract_strided_slice %56 {offsets = [0, 2, 0], sizes = [8, 1, 80], strides = [1, 1, 1]} : vector<8x4x80xf32> to vector<8x1x80xf32>
    %71 = vector.shape_cast %70 : vector<8x1x80xf32> to vector<8x80xf32>
    %72 = arith.truncf %71 : vector<8x80xf32> to vector<8x80xbf16>
    %c2_35 = arith.constant 2 : index
    %c0_36 = arith.constant 0 : index
    %c0_37 = arith.constant 0 : index
    %73 = vector.load %arg6[%c2_35, %c0_36, %c0_37] : memref<4x80x50xbf16, #tpu.memory_space<vmem>>, vector<1x80x50xbf16>
    %74 = vector.shape_cast %73 : vector<1x80x50xbf16> to vector<80x50xbf16>
    %cst_38 = arith.constant dense<0.000000e+00> : vector<8x50xf32>
    %75 = tpu.matmul %72, %74, %cst_38 {dimension_numbers = #tpu.dot_dimension_numbers<[1], [0], [0], [1], [0, 0, 1, 1], [], []>} : vector<8x80xbf16>, vector<80x50xbf16>, vector<8x50xf32> -> vector<8x50xf32>
    %76 = arith.addf %69, %75 : vector<8x50xf32>
    %77 = vector.extract_strided_slice %56 {offsets = [0, 3, 0], sizes = [8, 1, 80], strides = [1, 1, 1]} : vector<8x4x80xf32> to vector<8x1x80xf32>
    %78 = vector.shape_cast %77 : vector<8x1x80xf32> to vector<8x80xf32>
    %79 = arith.truncf %78 : vector<8x80xf32> to vector<8x80xbf16>
    %c3_39 = arith.constant 3 : index
    %c0_40 = arith.constant 0 : index
    %c0_41 = arith.constant 0 : index
    %80 = vector.load %arg6[%c3_39, %c0_40, %c0_41] : memref<4x80x50xbf16, #tpu.memory_space<vmem>>, vector<1x80x50xbf16>
    %81 = vector.shape_cast %80 : vector<1x80x50xbf16> to vector<80x50xbf16>
    %cst_42 = arith.constant dense<0.000000e+00> : vector<8x50xf32>
    %82 = tpu.matmul %79, %81, %cst_42 {dimension_numbers = #tpu.dot_dimension_numbers<[1], [0], [0], [1], [0, 0, 1, 1], [], []>} : vector<8x80xbf16>, vector<80x50xbf16>, vector<8x50xf32> -> vector<8x50xf32>
    %83 = arith.addf %76, %82 : vector<8x50xf32>
    %c0_43 = arith.constant 0 : index
    %c0_44 = arith.constant 0 : index
    %84 = vector.load %arg7[%c0_43, %c0_44] : memref<1x50xf32, #tpu.memory_space<vmem>>, vector<1x50xf32>
    %85 = vector.broadcast %84 : vector<1x50xf32> to vector<8x50xf32>
    %86 = arith.addf %83, %85 : vector<8x50xf32>
    %cst_45 = arith.constant 0.000000e+00 : f32
    %87 = vector.broadcast %cst_45 : f32 to vector<8x50xf32>
    %88 = arith.maximumf %86, %87 : vector<8x50xf32>
    %89 = arith.truncf %88 : vector<8x50xf32> to vector<8x50xbf16>
    %c0_46 = arith.constant 0 : index
    %c0_47 = arith.constant 0 : index
    %90 = vector.load %arg8[%c0_46, %c0_47] : memref<50x128xbf16, #tpu.memory_space<vmem>>, vector<50x128xbf16>
    %cst_48 = arith.constant dense<0.000000e+00> : vector<8x128xf32>
    %91 = tpu.matmul %89, %90, %cst_48 {dimension_numbers = #tpu.dot_dimension_numbers<[1], [0], [0], [1], [0, 0, 1, 1], [], []>} : vector<8x50xbf16>, vector<50x128xbf16>, vector<8x128xf32> -> vector<8x128xf32>
    %c0_49 = arith.constant 0 : index
    %c0_50 = arith.constant 0 : index
    %92 = vector.load %arg9[%c0_49, %c0_50] : memref<1x128xf32, #tpu.memory_space<vmem>>, vector<1x128xf32>
    %93 = vector.broadcast %92 : vector<1x128xf32> to vector<8x128xf32>
    %94 = arith.addf %91, %93 : vector<8x128xf32>
    %cst_51 = arith.constant dense<0xFF800000> : vector<8xf32>
    %95 = vector.multi_reduction <maximumf>, %94, %cst_51 [1] : vector<8x128xf32> to vector<8xf32>
    %96 = vector.shape_cast %95 : vector<8xf32> to vector<8x1xf32>
    %97 = vector.broadcast %96 : vector<8x1xf32> to vector<8x128xf32>
    %98 = arith.subf %94, %97 : vector<8x128xf32>
    %99 = math.exp %98 : vector<8x128xf32>
    %100 = vector.broadcast %96 : vector<8x1xf32> to vector<8x128xf32>
    %101 = arith.subf %94, %100 : vector<8x128xf32>
    %cst_52 = arith.constant dense<0.000000e+00> : vector<8xf32>
    %102 = vector.multi_reduction <add>, %99, %cst_52 [1] : vector<8x128xf32> to vector<8xf32>
    %103 = vector.shape_cast %102 : vector<8xf32> to vector<8x1xf32>
    %104 = math.log %103 : vector<8x1xf32>
    %105 = vector.broadcast %104 : vector<8x1xf32> to vector<8x128xf32>
    %106 = arith.subf %101, %105 : vector<8x128xf32>
    %c0_53 = arith.constant 0 : index
    %c0_54 = arith.constant 0 : index
    %107 = vector.load %arg10[%c0_53, %c0_54] : memref<8x128xf32, #tpu.memory_space<vmem>>, vector<8x128xf32>
    tpu.vector_store %arg10[%c0_53, %c0_54], %106 {strides = array<i32>} : memref<8x128xf32, #tpu.memory_space<vmem>>, vector<8x128xf32>,
    return
  }
  func.func @transform_0(%arg0: i32) -> (i32, i32) {
    %c0_i32 = arith.constant 0 : i32
    %c0_i32_0 = arith.constant 0 : i32
    return %arg0, %c0_i32 : i32, i32
  }
  func.func @transform_1(%arg0: i32) -> (i32, i32) {
    %c0_i32 = arith.constant 0 : i32
    %c0_i32_0 = arith.constant 0 : i32
    %c0_i32_1 = arith.constant 0 : i32
    return %c0_i32, %c0_i32_0 : i32, i32
  }
  func.func @transform_2(%arg0: i32) -> (i32, i32) {
    %c0_i32 = arith.constant 0 : i32
    %c0_i32_0 = arith.constant 0 : i32
    %c0_i32_1 = arith.constant 0 : i32
    return %c0_i32, %c0_i32_0 : i32, i32
  }
  func.func @transform_3(%arg0: i32) -> (i32, i32, i32) {
    %c0_i32 = arith.constant 0 : i32
    %c0_i32_0 = arith.constant 0 : i32
    %c0_i32_1 = arith.constant 0 : i32
    %c0_i32_2 = arith.constant 0 : i32
    return %c0_i32, %c0_i32_0, %c0_i32_1 : i32, i32, i32
  }
  func.func @transform_4(%arg0: i32) -> (i32, i32) {
    %c0_i32 = arith.constant 0 : i32
    %c0_i32_0 = arith.constant 0 : i32
    %c0_i32_1 = arith.constant 0 : i32
    return %c0_i32, %c0_i32_0 : i32, i32
  }
  func.func @transform_5(%arg0: i32) -> (i32, i32, i32) {
    %c0_i32 = arith.constant 0 : i32
    %c0_i32_0 = arith.constant 0 : i32
    %c0_i32_1 = arith.constant 0 : i32
    %c0_i32_2 = arith.constant 0 : i32
    return %c0_i32, %c0_i32_0, %c0_i32_1 : i32, i32, i32
  }
  func.func @transform_6(%arg0: i32) -> (i32, i32) {
    %c0_i32 = arith.constant 0 : i32
    %c0_i32_0 = arith.constant 0 : i32
    %c0_i32_1 = arith.constant 0 : i32
    return %c0_i32, %c0_i32_0 : i32, i32
  }
  func.func @transform_7(%arg0: i32) -> (i32, i32) {
    %c0_i32 = arith.constant 0 : i32
    %c0_i32_0 = arith.constant 0 : i32
    %c0_i32_1 = arith.constant 0 : i32
    return %c0_i32, %c0_i32_0 : i32, i32
  }
  func.func @transform_8(%arg0: i32) -> (i32, i32) {
    %c0_i32 = arith.constant 0 : i32
    %c0_i32_0 = arith.constant 0 : i32
    %c0_i32_1 = arith.constant 0 : i32
    return %c0_i32, %c0_i32_0 : i32, i32
  }
  func.func @transform_9(%arg0: i32) -> (i32, i32) {
    %c0_i32 = arith.constant 0 : i32
    %c0_i32_0 = arith.constant 0 : i32
    return %arg0, %c0_i32 : i32, i32
  }
}

</mosaic_0001>

<bundles_post_ra>
// kernel: net_forward.1
= control target key start
LH: loop header
LB: loop body
LE: loop exit
PB: predicated region body
PF: predicated region fallthrough
CT: control target
= control target key end

     0   :  { %vm314_vm0 = vcmask 1045504   ;;  %vm277_vm1 = vcmask 97280   ;;  %vm789_vm2 = vcmask 1041408   ;;  %vm1791_vm3 = vcmask 1041409   ;;  %s7445_s1 = inlined_call_operand.vmem [shape: bf16[140,256], index: 1, kind: input, shape index: {}]   ;;  %s7446_s0 = inlined_call_operand.vmem [shape: bf16[192,140], index: 0, kind: input, shape index: {}]   ;;  %s7447_s3 = inlined_call_operand.vmem [shape: bf16[5,128,160], index: 3, kind: input, shape index: {}]   ;;  %s7448_s2 = inlined_call_operand.vmem [shape: f32[1,256], index: 2, kind: input, shape index: {}]   ;;  %s7449_s4 = inlined_call_operand.vmem [shape: f32[1,160], index: 4, kind: input, shape index: {}]   ;;  %s7450_s5 = inlined_call_operand.vmem [shape: bf16[4,80,50], index: 5, kind: input, shape index: {}]   ;;  %s7451_s6 = inlined_call_operand.vmem [shape: f32[1,50], index: 6, kind: input, shape index: {}]   ;;  %s7452_s8 = inlined_call_operand.vmem [shape: f32[1,128], index: 8, kind: input, shape index: {}]   ;;  %s7453_s7 = inlined_call_operand.vmem [shape: bf16[50,128], index: 7, kind: input, shape index: {}]   ;;  %s7454_s9 = inlined_call_operand.vmem [shape: f32[8,128], index: 9, kind: output, shape index: {}]  }
   0x1   :  { %v3990_v0 = vld [vmem:[%s7445_s1 + $0x70] sm:$0xf]  ;;  %v4578_v1 = vld [vmem:[%s7445_s1 + $0x74] sm:$0xf0]  ;;  %v4577_v2 = vld [vmem:[%s7445_s1 + $0x74] sm:$0xf] }
   0x2   :  { %v3991_v3 = vor.u32 %v4578_v1, %v3990_v0  ;;  %v3992_v4 = vld [vmem:[%s7445_s1 + $0x78] sm:$0xf0]  ;;  %v3982_v5 = vld [vmem:[%s7445_s1 + $0x60] sm:$0xf]  ;;  %v4576_v6 = vld [vmem:[%s7445_s1 + $0x64] sm:$0xf0] }
   0x3   :  { %v3995_v7 = vor.u32 %v4577_v2, %v3992_v4  ;;  %v4575_v8 = vld [vmem:[%s7445_s1 + $0x64] sm:$0xf]  ;;  %v3984_v9 = vld [vmem:[%s7445_s1 + $0x68] sm:$0xf0]  ;;  %v3983_v10 = vor.u32 %v4576_v6, %v3982_v5  ;;  %v3974_v12 = vld [vmem:[%s7445_s1 + $0x50] sm:$0xf] }
   0x4   :  { %321 = vmatpush.bf16.msra.mxu0 %v3991_v3  ;;  %v3987_v11 = vor.u32 %v4575_v8, %v3984_v9  ;;  %v4574_v13 = vld [vmem:[%s7445_s1 + $0x54] sm:$0xf0]  ;;  %v4573_v14 = vld [vmem:[%s7445_s1 + $0x54] sm:$0xf]  ;;  %v3976_v15 = vld [vmem:[%s7445_s1 + $0x58] sm:$0xf0] }
   0x5   :  { %459 = vmatpush.bf16.msra.mxu2 %v3995_v7  ;;  %v3975_v16 = vor.u32 %v4574_v13, %v3974_v12  ;;  %v3966_v17 = vld [vmem:[%s7445_s1 + $0x40] sm:$0xf]  ;;  %v3979_v18 = vor.u32 %v4573_v14, %v3976_v15  ;;  %v4572_v19 = vld [vmem:[%s7445_s1 + $0x44] sm:$0xf0]  ;;  %v4579_v20 = vld [vmem:[%s7445_s1 + $0x84] sm:$0xf] }
   0x6   :  { %v4000_v21 = vld [vmem:[%s7445_s1 + $0x88] sm:$0x30]  ;;  %v4571_v22 = vld [vmem:[%s7445_s1 + $0x44] sm:$0xf]  ;;  %v3967_v27 = vor.u32 %v4572_v19, %v3966_v17  ;;  %v3998_v30 = vld [vmem:[%s7445_s1 + $0x80] sm:$0xf] }
   0x7   :  { %v3968_v23 = vld [vmem:[%s7445_s1 + $0x48] sm:$0xf0]  ;;  %v4003_v24 = vor.u32 %v4579_v20, %v4000_v21  ;;  %v4539_v25 = vld [vmem:[%s7446_s0 + $0x4] sm:$0xf]  ;;  %v3958_v32 = vld [vmem:[%s7445_s1 + $0x30] sm:$0xf] }
   0x8   :  { %322 = vmatpush.bf16.msra.mxu0 %v3983_v10  ;;  %v3840_v26 = vld [vmem:[%s7446_s0 + $0x8] sm:$0xf0]  ;;  %v3971_v31 = vor.u32 %v4571_v22, %v3968_v23  ;;  %v4570_v33 = vld [vmem:[%s7445_s1 + $0x34] sm:$0xf0]  ;;  %v4580_v34 = vld [vmem:[%s7445_s1 + $0x84] sm:$0x30] }
   0x9   :  { %460 = vmatpush.bf16.msra.mxu2 %v3987_v11  ;;  %v319_v28 = vsel %vm314_vm0, %v4003_v24, 0  ;;  %v3843_v29 = vor.u32 %v4539_v25, %v3840_v26  ;;  %v4569_v35 = vld [vmem:[%s7445_s1 + $0x34] sm:$0xf]  ;;  %v3960_v36 = vld [vmem:[%s7445_s1 + $0x38] sm:$0xf0]  ;;  %v3999_v37 = vor.u32 %v4580_v34, %v3998_v30  ;;  %v3959_v38 = vor.u32 %v4570_v33, %v3958_v32 }
   0xa   :  { %535 = vmatpush.bf16.msra.mxu3 %v319_v28  ;;  %v3963_v40 = vor.u32 %v4569_v35, %v3960_v36  ;;  %v3950_v41 = vld [vmem:[%s7445_s1 + $0x20] sm:$0xf]  ;;  %v4568_v42 = vld [vmem:[%s7445_s1 + $0x24] sm:$0xf0]  ;;  %v4567_v43 = vld [vmem:[%s7445_s1 + $0x24] sm:$0xf] }
   0xb   :  { %v316_v39 = vsel %vm314_vm0, %v3999_v37, 0  ;;  %v3952_v44 = vld [vmem:[%s7445_s1 + $0x28] sm:$0xf0]  ;;  %v3951_v45 = vor.u32 %v4568_v42, %v3950_v41  ;;  %v3942_v47 = vld [vmem:[%s7445_s1 + $0x10] sm:$0xf]  ;;  %vm1793_vm4 = vcmask 1042434  }
   0xc   :  { %323 = vmatpush.bf16.msra.mxu0 %v3975_v16  ;;  %397 = vmatpush.bf16.msra.mxu1 %v316_v39  ;;  %v3955_v46 = vor.u32 %v4567_v43, %v3952_v44  ;;  %v4566_v48 = vld [vmem:[%s7445_s1 + $0x14] sm:$0xf0]  ;;  %v4565_v49 = vld [vmem:[%s7445_s1 + $0x14] sm:$0xf]  ;;  %v3944_v50 = vld [vmem:[%s7445_s1 + $0x18] sm:$0xf0] }
   0xd   :  { %461 = vmatpush.bf16.msra.mxu2 %v3979_v18  ;;  %4016 = vmatmul.msk.bf16.vlgmr.msra.gmra.mxu3 %vm277_vm1, %v3843_v29  ;;  %v3943_v51 = vor.u32 %v4566_v48, %v3942_v47  ;;  %v3934_v52 = vld [vmem:[%s7445_s1] sm:$0xf]  ;;  %v3947_v53 = vor.u32 %v4565_v49, %v3944_v50  ;;  %v4564_v54 = vld [vmem:[%s7445_s1 + $0x4] sm:$0xf0]  ;;  %v4541_v55 = vld [vmem:[%s7446_s0 + $0x14] sm:$0xf] }
   0xe   :  { %v3848_v56 = vld [vmem:[%s7446_s0 + $0x18] sm:$0xf0]  ;;  %v4563_v57 = vld [vmem:[%s7445_s1 + $0x4] sm:$0xf]  ;;  %v3936_v58 = vld [vmem:[%s7445_s1 + $0x8] sm:$0xf0]  ;;  %v3935_v59 = vor.u32 %v4564_v54, %v3934_v52 }
   0xf   :  { %4004 = vmatmul.msk.bf16.vlgmr.msra.gmra.mxu1 %vm277_vm1, %v3843_v29  ;;  %v3838_v60 = vld [vmem:[%s7446_s0] sm:$0xf]  ;;  %v4540_v61 = vld [vmem:[%s7446_s0 + $0x4] sm:$0xf0]  ;;  %v3851_v62 = vor.u32 %v4541_v55, %v3848_v56  ;;  %v3939_v63 = vor.u32 %v4563_v57, %v3936_v58  ;;  %v4543_v1 = vld [vmem:[%s7446_s0 + $0x24] sm:$0xf] }
  0x10   :  { %324 = vmatpush.bf16.msra.mxu0 %v3967_v27  ;;  %v3839_v0 = vor.u32 %v4540_v61, %v3838_v60  ;;  %v3856_v2 = vld [vmem:[%s7446_s0 + $0x28] sm:$0xf0]  ;;  %v3846_v3 = vld [vmem:[%s7446_s0 + $0x10] sm:$0xf]  ;;  %v4542_v4 = vld [vmem:[%s7446_s0 + $0x14] sm:$0xf0] }
  0x11   :  { %462 = vmatpush.bf16.msra.mxu2 %v3971_v31  ;;  %v3859_v5 = vor.u32 %v4543_v1, %v3856_v2  ;;  %v3847_v6 = vor.u32 %v4542_v4, %v3846_v3  ;;  %v4545_v7 = vld [vmem:[%s7446_s0 + $0x34] sm:$0xf]  ;;  %v3864_v8 = vld [vmem:[%s7446_s0 + $0x38] sm:$0xf0]  ;;  %v3854_v9 = vld [vmem:[%s7446_s0 + $0x20] sm:$0xf] }
  0x12   :  { %v4544_v10 = vld [vmem:[%s7446_s0 + $0x24] sm:$0xf0]  ;;  %v3867_v11 = vor.u32 %v4545_v7, %v3864_v8  ;;  %v4547_v13 = vld [vmem:[%s7446_s0 + $0x44] sm:$0xf]  ;;  %v3872_v14 = vld [vmem:[%s7446_s0 + $0x48] sm:$0xf0] }
  0x13   :  { %v3855_v12 = vor.u32 %v4544_v10, %v3854_v9  ;;  %v3862_v15 = vld [vmem:[%s7446_s0 + $0x30] sm:$0xf]  ;;  %v4546_v16 = vld [vmem:[%s7446_s0 + $0x34] sm:$0xf0]  ;;  %v3875_v17 = vor.u32 %v4547_v13, %v3872_v14  ;;  %v4549_v19 = vld [vmem:[%s7446_s0 + $0x54] sm:$0xf] }
  0x14   :  { %325 = vmatpush.bf16.msra.mxu0 %v3959_v38  ;;  %v3863_v18 = vor.u32 %v4546_v16, %v3862_v15  ;;  %v3880_v20 = vld [vmem:[%s7446_s0 + $0x58] sm:$0xf0]  ;;  %v3870_v21 = vld [vmem:[%s7446_s0 + $0x40] sm:$0xf]  ;;  %v4548_v22 = vld [vmem:[%s7446_s0 + $0x44] sm:$0xf0] }
  0x15   :  { %463 = vmatpush.bf16.msra.mxu2 %v3963_v40  ;;  %v3883_v23 = vor.u32 %v4549_v19, %v3880_v20  ;;  %v3871_v24 = vor.u32 %v4548_v22, %v3870_v21  ;;  %v4611_v25 = vld [vmem:[%s7447_s3 + $0xf4] sm:$0xf]  ;;  %v4104_v26 = vld [vmem:[%s7447_s3 + $0xf8] sm:$0xf0]  ;;  %v4102_v28 = vld [vmem:[%s7447_s3 + $0xf0] sm:$0xf] }
  0x16   :  { %v4107_v27 = vor.u32 %v4611_v25, %v4104_v26  ;;  %v4612_v29 = vld [vmem:[%s7447_s3 + $0xf4] sm:$0xf0]  ;;  %v4551_v31 = vld [vmem:[%s7446_s0 + $0x64] sm:$0xf]  ;;  %v3888_v32 = vld [vmem:[%s7446_s0 + $0x68] sm:$0xf0] }
  0x17   :  { %v4103_v30 = vor.u32 %v4612_v29, %v4102_v28  ;;  %v3878_v33 = vld [vmem:[%s7446_s0 + $0x50] sm:$0xf]  ;;  %v4550_v34 = vld [vmem:[%s7446_s0 + $0x54] sm:$0xf0]  ;;  %v3891_v35 = vor.u32 %v4551_v31, %v3888_v32  ;;  %v4553_v37 = vld [vmem:[%s7446_s0 + $0x74] sm:$0xf] }
  0x18   :  { %326 = vmatpush.bf16.msra.mxu0 %v3951_v45  ;;  %1971 = vmatpush.bf16.msrb.mxu3 %v4107_v27  ;;  %v3879_v36 = vor.u32 %v4550_v34, %v3878_v33  ;;  %v3896_v38 = vld [vmem:[%s7446_s0 + $0x78] sm:$0xf0]  ;;  %v3886_v39 = vld [vmem:[%s7446_s0 + $0x60] sm:$0xf]  ;;  %v4552_v40 = vld [vmem:[%s7446_s0 + $0x64] sm:$0xf0] }
  0x19   :  { %464 = vmatpush.bf16.msra.mxu2 %v3955_v46  ;;  %1942 = vmatpush.bf16.msrb.mxu1 %v4103_v30  ;;  %v3899_v41 = vor.u32 %v4553_v37, %v3896_v38  ;;  %v3887_v42 = vor.u32 %v4552_v40, %v3886_v39  ;;  %v4609_v43 = vld [vmem:[%s7447_s3 + $0xe4] sm:$0xf]  ;;  %v4096_v44 = vld [vmem:[%s7447_s3 + $0xe8] sm:$0xf0]  ;;  %v3894_v48 = vld [vmem:[%s7446_s0 + $0x70] sm:$0xf] }
  0x1a   :  { %v4099_v45 = vor.u32 %v4609_v43, %v4096_v44  ;;  %v4555_v46 = vld [vmem:[%s7446_s0 + $0x84] sm:$0xf]  ;;  %v3904_v47 = vld [vmem:[%s7446_s0 + $0x88] sm:$0xf0]  ;;  %v4554_v49 = vld [vmem:[%s7446_s0 + $0x74] sm:$0xf0] }
  0x1b   :  { %v3907_v50 = vor.u32 %v4555_v46, %v3904_v47  ;;  %v4557_v52 = vld [vmem:[%s7446_s0 + $0x94] sm:$0xf]  ;;  %v3902_v54 = vld [vmem:[%s7446_s0 + $0x80] sm:$0xf]  ;;  %v4556_v55 = vld [vmem:[%s7446_s0 + $0x84] sm:$0xf0] }
  0x1c   :  { %327 = vmatpush.bf16.msra.mxu0 %v3943_v51  ;;  %1972 = vmatpush.bf16.msrb.mxu3 %v4099_v45  ;;  %v3895_v51 = vor.u32 %v4554_v49, %v3894_v48  ;;  %v75_v57 = vld [vmem:[%s7448_s2] sm:$0x3]  ;;  %v3903_v58 = vor.u32 %v4556_v55, %v3902_v54  ;;  %v4559_v7 = vld [vmem:[%s7446_s0 + $0xa4] sm:$0xf]  ;;  %v3920_v8 = vld [vmem:[%s7446_s0 + $0xa8] sm:$0xf0] }
  0x1d   :  { %465 = vmatpush.bf16.msra.mxu2 %v3947_v53  ;;  %4017 = vmatmul.msk.bf16.gmra.mxu3 %vm277_vm1, %v3851_v62  ;;  %v3912_v53 = vld [vmem:[%s7446_s0 + $0x98] sm:$0xf0]  ;;  %v4094_v61 = vld [vmem:[%s7447_s3 + $0xe0] sm:$0xf]  ;;  %v4558_v13 = vld [vmem:[%s7446_s0 + $0x94] sm:$0xf0]  ;;  %v3923_v14 = vor.u32 %v4559_v7, %v3920_v8 }
  0x1e   :  { %v3915_v56 = vor.u32 %v4557_v52, %v3912_v53  ;;  %vm1795_vm5 = vcmask 1043459   ;;  %vm1797_vm6 = vcmask 1044484   ;;  %vm1799_vm7 = vcmask 1045509  }
  0x1f   :  { %4005 = vmatmul.msk.bf16.gmra.mxu1 %vm277_vm1, %v3851_v62  ;;  %v4610_v62 = vld [vmem:[%s7447_s3 + $0xe4] sm:$0xf0]  ;;  %vm1801_vm8 = vcmask 1046534   ;;  %vm1803_vm9 = vcmask 1047559   ;;  %vm3065_vm10 = vcmask 392192   ;;  %vm3146_vm11 = vcmask 648192  }
  0x20   :  { %328 = vmatpush.bf16.msra.mxu0 %v3935_v59  ;;  %v5045_v59 = vperm.slane %v75_v57, 0  ;;  %v4095_v1 = vor.u32 %v4610_v62, %v4094_v61  ;;  %vm3494_vm12 = vcmask 654336   ;;  %vm3804_vm13 = vcmask 1040384  }
  0x21   :  { %466 = vmatpush.bf16.msra.mxu2 %v3939_v63  ;;  %vm3800_vm14 = vcmask 408576  }
  0x22   :  { %1943 = vmatpush.bf16.msrb.mxu1 %v4095_v1 }
  0x23   :  { %329 = vmatmul.bf16.vlgmr.msra.gmra.mxu0 %v3839_v0 }
  0x24   :  { %467 = vmatmul.bf16.vlgmr.msra.gmra.mxu2 %v3839_v0  ;;  %v5055_v0 = vperm.slane %v75_v57, 1 }
  0x2d   :  { %4018 = vmatmul.msk.bf16.gmra.mxu3 %vm277_vm1, %v3859_v5 }
  0x2f   :  { %4006 = vmatmul.msk.bf16.gmra.mxu1 %vm277_vm1, %v3859_v5 }
  0x33   :  { %334 = vmatmul.bf16.gmra.mxu0 %v3847_v6 }
  0x34   :  { %472 = vmatmul.bf16.gmra.mxu2 %v3847_v6 }
  0x3d   :  { %4019 = vmatmul.msk.bf16.gmra.mxu3 %vm277_vm1, %v3867_v11 }
  0x3f   :  { %4007 = vmatmul.msk.bf16.gmra.mxu1 %vm277_vm1, %v3867_v11 }
  0x43   :  { %339 = vmatmul.bf16.gmra.mxu0 %v3855_v12 }
  0x44   :  { %477 = vmatmul.bf16.gmra.mxu2 %v3855_v12  ;;  %v3910_v12 = vld [vmem:[%s7446_s0 + $0x90] sm:$0xf] }
  0x45   :  { %v3911_v22 = vor.u32 %v4558_v13, %v3910_v12 }
  0x4d   :  { %4020 = vmatmul.msk.bf16.gmra.mxu3 %vm277_vm1, %v3875_v17 }
  0x4f   :  { %4008 = vmatmul.msk.bf16.gmra.mxu1 %vm277_vm1, %v3875_v17 }
  0x53   :  { %344 = vmatmul.bf16.gmra.mxu0 %v3863_v18 }
  0x54   :  { %482 = vmatmul.bf16.gmra.mxu2 %v3863_v18 }
  0x5d   :  { %4021 = vmatmul.msk.bf16.gmra.mxu3 %vm277_vm1, %v3883_v23 }
  0x5f   :  { %4009 = vmatmul.msk.bf16.gmra.mxu1 %vm277_vm1, %v3883_v23 }
  0x63   :  { %349 = vmatmul.bf16.gmra.mxu0 %v3871_v24 }
  0x64   :  { %487 = vmatmul.bf16.gmra.mxu2 %v3871_v24 }
  0x6d   :  { %4022 = vmatmul.msk.bf16.gmra.mxu3 %vm277_vm1, %v3891_v35 }
  0x6f   :  { %4010 = vmatmul.msk.bf16.gmra.mxu1 %vm277_vm1, %v3891_v35 }
  0x73   :  { %354 = vmatmul.bf16.gmra.mxu0 %v3879_v36 }
  0x74   :  { %492 = vmatmul.bf16.gmra.mxu2 %v3879_v36 }
  0x7d   :  { %4023 = vmatmul.msk.bf16.gmra.mxu3 %vm277_vm1, %v3899_v41 }
  0x7f   :  { %4011 = vmatmul.msk.bf16.gmra.mxu1 %vm277_vm1, %v3899_v41 }
  0x83   :  { %359 = vmatmul.bf16.gmra.mxu0 %v3887_v42 }
  0x84   :  { %497 = vmatmul.bf16.gmra.mxu2 %v3887_v42 }
  0x8c   :  { %v399_v2 = vpop.f32.mrf.mxu1 }
  0x8d   :  { %4024 = vmatmul.msk.bf16.gmra.mxu3 %vm277_vm1, %v3907_v50 }
  0x8f   :  { %4012 = vmatmul.msk.bf16.gmra.mxu1 %vm277_vm1, %v3907_v50 }
  0x90   :  { %v537_v3 = vpop.f32.mrf.mxu3 }
  0x93   :  { %364 = vmatmul.bf16.gmra.mxu0 %v3895_v51 }
  0x94   :  { %502 = vmatmul.bf16.gmra.mxu2 %v3895_v51  ;;  %v401_v31 = vpop.f32.mrf.mxu1 }
  0x98   :  { %v539_v32 = vpop.f32.mrf.mxu3 }
  0x9d   :  { %4025 = vmatmul.msk.bf16.gmra.mxu3 %vm277_vm1, %v3915_v56 }
  0x9f   :  { %4013 = vmatmul.msk.bf16.gmra.mxu1 %vm277_vm1, %v3915_v56 }
  0xa0   :  { %v330_v60 = vpop.f32.mrf.mxu0 }
  0xa1   :  { %v331_v63 = vadd.f32 %v330_v60, %v5045_v59 }
  0xa3   :  { %369 = vmatmul.bf16.gmra.mxu0 %v3903_v58  ;;  %v400_v5 = vadd.f32 %v399_v2, %v331_v63 }
  0xa4   :  { %507 = vmatmul.bf16.gmra.mxu2 %v3903_v58 }
  0xa7   :  { %v468_v4 = vpop.f32.mrf.mxu2 }
  0xa8   :  { %v469_v6 = vadd.f32 %v468_v4, %v5055_v0  ;;  %v332_v10 = vpop.f32.mrf.mxu0 }
  0xa9   :  { %v333_v15 = vadd.f32 %v332_v10, %v5045_v59  ;;  %v4560_v10 = vld [vmem:[%s7446_s0 + $0xa4] sm:$0xf0] }
  0xaa   :  { %v538_v9 = vadd.f32 %v537_v3, %v469_v6 }
  0xab   :  { %v402_v33 = vadd.f32 %v401_v31, %v333_v15  ;;  %v404_v15 = vpop.f32.mrf.mxu1 }
  0xac   :  { %v597_v11 = vmax.f32 %v400_v5, %v538_v9  ;;  %v3918_v9 = vld [vmem:[%s7446_s0 + $0xa0] sm:$0xf] }
  0xad   :  { %4026 = vmatmul.msk.bf16.gmra.mxu3 %vm277_vm1, %v3923_v14 }
  0xae   :  { %v645_v16 = vrot.slane %v597_v11, 2  ;;  %v646_v17 = vrot.slane %v597_v11, 4  ;;  %v647_v18 = vrot.slane %v597_v11, 6  ;;  %v790_v19 = vsel %vm789_vm2, %v597_v11, -inf }
  0xaf   :  { %v791_v20 = vrot.slane %v790_v19, 4  ;;  %v470_v21 = vpop.f32.mrf.mxu2  ;;  %4014 = vmatmul.msk.bf16.gmra.mxu1 %vm277_vm1, %v3923_v14 }
  0xb0   :  { %v797_v23 = vsel %vm789_vm2, %v645_v16, -inf  ;;  %v804_v24 = vsel %vm789_vm2, %v646_v17, -inf  ;;  %v811_v25 = vsel %vm789_vm2, %v647_v18, -inf  ;;  %v471_v26 = vadd.f32 %v470_v21, %v5055_v0  ;;  %v335_v51 = vpop.f32.mrf.mxu0 }
  0xb1   :  { %v792_v27 = vmax.f32 %v790_v19, %v791_v20  ;;  %v798_v28 = vrot.slane %v797_v23, 4  ;;  %v805_v29 = vrot.slane %v804_v24, 4  ;;  %v812_v30 = vrot.slane %v811_v25, 4  ;;  %v542_v20 = vpop.f32.mrf.mxu3 }
  0xb2   :  { %v540_v34 = vadd.f32 %v539_v32, %v471_v26  ;;  %v336_v14 = vadd.f32 %v335_v51, %v5045_v59  ;;  %v4607_v26 = vld [vmem:[%s7447_s3 + $0xd4] sm:$0xf] }
  0xb3   :  { %v793_v35 = vrot.slane %v792_v27, 2  ;;  %v799_v36 = vmax.f32 %v797_v23, %v798_v28  ;;  %v806_v37 = vmax.f32 %v804_v24, %v805_v29  ;;  %v813_v38 = vmax.f32 %v811_v25, %v812_v30  ;;  %374 = vmatmul.bf16.gmra.mxu0 %v3911_v22  ;;  %v406_v51 = vpop.f32.mrf.mxu1 }
  0xb4   :  { %v598_v39 = vmax.f32 %v402_v33, %v540_v34  ;;  %512 = vmatmul.bf16.gmra.mxu2 %v3911_v22  ;;  %v3919_v22 = vor.u32 %v4560_v10, %v3918_v9  ;;  %v405_v29 = vadd.f32 %v404_v15, %v336_v14 }
  0xb5   :  { %v794_v40 = vmax.f32 %v792_v27, %v793_v35  ;;  %v800_v41 = vrot.slane %v799_v36, 2  ;;  %v807_v42 = vrot.slane %v806_v37, 2  ;;  %v814_v43 = vrot.slane %v813_v38, 2  ;;  %v4088_v27 = vld [vmem:[%s7447_s3 + $0xd8] sm:$0xf0] }
  0xb6   :  { %v648_v44 = vrot.slane %v598_v39, 2  ;;  %v649_v45 = vrot.slane %v598_v39, 4  ;;  %v650_v46 = vrot.slane %v598_v39, 6  ;;  %v818_v47 = vsel %vm789_vm2, %v598_v39, -inf }
  0xb7   :  { %v801_v48 = vmax.f32 %v799_v36, %v800_v41  ;;  %v808_v49 = vmax.f32 %v806_v37, %v807_v42  ;;  %v815_v50 = vmax.f32 %v813_v38, %v814_v43  ;;  %v819_v52 = vrot.slane %v818_v47, 4  ;;  %v473_v56 = vpop.f32.mrf.mxu2 }
  0xb8   :  { %v825_v53 = vsel %vm789_vm2, %v648_v44, -inf  ;;  %v832_v54 = vsel %vm789_vm2, %v649_v45, -inf  ;;  %v839_v55 = vsel %vm789_vm2, %v650_v46, -inf  ;;  %v795_v57 = vrot.slane %v794_v40, 1  ;;  %v337_v31 = vpop.f32.mrf.mxu0 }
  0xb9   :  { %v802_v58 = vrot.slane %v801_v48, 1  ;;  %v809_v60 = vrot.slane %v808_v49, 1  ;;  %v816_v61 = vrot.slane %v815_v50, 1  ;;  %v820_v62 = vmax.f32 %v818_v47, %v819_v52 }
  0xba   :  { %v826_v63 = vrot.slane %v825_v53, 4  ;;  %v833_v1 = vrot.slane %v832_v54, 4  ;;  %v840_v2 = vrot.slane %v839_v55, 4  ;;  %v796_v11 = vmax.f32 %v794_v40, %v795_v57 }
  0xbb   :  { %v810_v3 = vmax.f32 %v808_v49, %v809_v60  ;;  %v817_v4 = vmax.f32 %v815_v50, %v816_v61  ;;  %v821_v5 = vrot.slane %v820_v62, 2  ;;  %v803_v12 = vmax.f32 %v801_v48, %v802_v58  ;;  %v4086_v60 = vld [vmem:[%s7447_s3 + $0xd0] sm:$0xf]  ;;  %v4608_v61 = vld [vmem:[%s7447_s3 + $0xd4] sm:$0xf0] }
  0xbc   :  { %v827_v6 = vmax.f32 %v825_v53, %v826_v63  ;;  %v834_v7 = vmax.f32 %v832_v54, %v833_v1  ;;  %v841_v8 = vmax.f32 %v839_v55, %v840_v2  ;;  %v474_v30 = vadd.f32 %v473_v56, %v5055_v0  ;;  %v544_v54 = vpop.f32.mrf.mxu3 }
  0xbd   :  { %v1464_v13 = vmax.f32 %v810_v3, 0.0  ;;  %v822_v16 = vmax.f32 %v820_v62, %v821_v5  ;;  %v1465_v21 = vmax.f32 %v817_v4, 0.0  ;;  %v1462_v32 = vmax.f32 %v796_v11, 0.0 }
  0xbe   :  { %v828_v17 = vrot.slane %v827_v6, 2  ;;  %v835_v18 = vrot.slane %v834_v7, 2  ;;  %v842_v19 = vrot.slane %v841_v8, 2  ;;  %v1463_v33 = vmax.f32 %v803_v12, 0.0 }
  0xbf   :  { %v823_v28 = vrot.slane %v822_v16, 1  ;;  %v1560_v34 = vpack.c.bf16 %v1464_v13, %v1464_v13  ;;  %v475_v35 = vpop.f32.mrf.mxu2  ;;  %v1561_v36 = vpack.c.bf16 %v1465_v21, %v1465_v21  ;;  %v543_v38 = vadd.f32 %v542_v20, %v474_v30 }
  0xc0   :  { %v829_v23 = vmax.f32 %v827_v6, %v828_v17  ;;  %v836_v24 = vmax.f32 %v834_v7, %v835_v18  ;;  %v843_v25 = vmax.f32 %v841_v8, %v842_v19  ;;  %v4091_v39 = vor.u32 %v4607_v26, %v4088_v27  ;;  %v340_v7 = vpop.f32.mrf.mxu0 }
  0xc1   :  { %v824_v42 = vmax.f32 %v822_v16, %v823_v28  ;;  %v599_v43 = vmax.f32 %v405_v29, %v543_v38  ;;  %v338_v44 = vadd.f32 %v337_v31, %v5045_v59  ;;  %v476_v45 = vadd.f32 %v475_v35, %v5055_v0  ;;  %v4166_v38 = vld [vmem:[%s7447_s3 + $0x70] sm:$0xf] }
  0xc2   :  { %v830_v37 = vrot.slane %v829_v23, 1  ;;  %v837_v40 = vrot.slane %v836_v24, 1  ;;  %v844_v41 = vrot.slane %v843_v25, 1  ;;  %1973 = vmatpush.bf16.msrb.mxu3 %v4091_v39  ;;  %v5099_v46 = vpack.c.bf16 %v1462_v32, %v1462_v32  ;;  %v4596_v39 = vld [vmem:[%s7447_s3 + $0x74] sm:$0xf0] }
  0xc3   :  { %379 = vmatmul.bf16.gmra.mxu0 %v3919_v22  ;;  %v5101_v47 = vpack.c.bf16 %v1463_v33, %v1463_v33  ;;  %v5103_v48 = vunpack.c.l.b16 %v1560_v34  ;;  %v5105_v49 = vunpack.c.l.b16 %v1561_v36  ;;  %v1466_v55 = vmax.f32 %v824_v42, 0.0  ;;  %v409_v33 = vpop.f32.mrf.mxu1 }
  0xc4   :  { %517 = vmatmul.bf16.gmra.mxu2 %v3919_v22  ;;  %v831_v50 = vmax.f32 %v829_v23, %v830_v37  ;;  %v838_v52 = vmax.f32 %v836_v24, %v837_v40  ;;  %v5107_v53 = vmax.f32 %v843_v25, %v844_v41  ;;  %v846_v56 = vsel %vm789_vm2, %v599_v43, -inf }
  0xc5   :  { %7563 = vst [vmem:[#allocation2_spill] sm:$0xff] %v5105_v49  ;;  %v407_v57 = vadd.f32 %v406_v51, %v338_v44  ;;  %v545_v58 = vadd.f32 %v544_v54, %v476_v45  ;;  %v2008_v63 = vunpack.c.l.b16 %v5099_v46  ;;  %v651_v1 = vrot.slane %v599_v43, 2  ;;  %v547_v44 = vpop.f32.mrf.mxu3  ;;  %v4595_v45 = vld [vmem:[%s7447_s3 + $0x74] sm:$0xf] }
  0xc6   :  { %v652_v2 = vrot.slane %v599_v43, 4  ;;  %v5121_v3 = vsel %vm1791_vm3, %v5105_v49, %v5103_v48  ;;  %v1467_v4 = vmax.f32 %v831_v50, 0.0  ;;  %v653_v5 = vrot.slane %v599_v43, 6 }
  0xc7   :  { %7564 = vst [vmem:[#allocation3_spill] sm:$0xff] %v5121_v3  ;;  %v600_v6 = vmax.f32 %v407_v57, %v545_v58  ;;  %v1468_v8 = vmax.f32 %v838_v52, 0.0  ;;  %v847_v9 = vrot.slane %v846_v56, 4  ;;  %v341_v10 = vadd.f32 %v340_v7, %v5045_v59  ;;  %v478_v16 = vpop.f32.mrf.mxu2 }
  0xc8   :  { %v4087_v11 = vor.u32 %v4608_v61, %v4086_v60  ;;  %v1469_v12 = vmax.f32 %v5107_v53, 0.0  ;;  %v1562_v13 = vpack.c.bf16 %v1466_v55, %v1466_v55  ;;  %v853_v17 = vsel %vm789_vm2, %v651_v1, -inf  ;;  %v4168_v55 = vld [vmem:[%s7447_s3 + $0x78] sm:$0xf0] }
  0xc9   :  { %v654_v14 = vrot.slane %v600_v6, 2  ;;  %v655_v15 = vrot.slane %v600_v6, 4  ;;  %v860_v18 = vsel %vm789_vm2, %v652_v2, -inf  ;;  %v656_v19 = vrot.slane %v600_v6, 6 }
  0xca   :  { %v874_v20 = vsel %vm789_vm2, %v600_v6, -inf  ;;  %1944 = vmatpush.bf16.msrb.mxu1 %v4087_v11  ;;  %v1563_v21 = vpack.c.bf16 %v1467_v4, %v1467_v4  ;;  %v867_v22 = vsel %vm789_vm2, %v653_v5, -inf  ;;  %v848_v25 = vmax.f32 %v846_v56, %v847_v9 }
  0xcb   :  { %v875_v23 = vrot.slane %v874_v20, 4  ;;  %v881_v24 = vsel %vm789_vm2, %v654_v14, -inf  ;;  %v888_v27 = vsel %vm789_vm2, %v655_v15, -inf  ;;  %v479_v28 = vadd.f32 %v478_v16, %v5055_v0 }
  0xcc   :  { %v882_v26 = vrot.slane %v881_v24, 4  ;;  %v854_v29 = vrot.slane %v853_v17, 4  ;;  %v861_v30 = vrot.slane %v860_v18, 4  ;;  %v889_v32 = vrot.slane %v888_v27, 4 }
  0xcd   :  { %v876_v31 = vmax.f32 %v874_v20, %v875_v23  ;;  %v5132_v34 = vpack.c.bf16 %v1468_v8, %v1468_v8  ;;  %v895_v36 = vsel %vm789_vm2, %v656_v19, -inf  ;;  %v410_v37 = vadd.f32 %v409_v33, %v341_v10 }
  0xce   :  { %v883_v35 = vmax.f32 %v881_v24, %v882_v26  ;;  %v5141_v40 = vunpack.c.l.b16 %v1562_v13  ;;  %v868_v41 = vrot.slane %v867_v22, 4  ;;  %v890_v43 = vmax.f32 %v888_v27, %v889_v32 }
  0xcf   :  { %v877_v42 = vrot.slane %v876_v31, 2  ;;  %v849_v50 = vrot.slane %v848_v25, 2  ;;  %v896_v52 = vrot.slane %v895_v36, 4  ;;  %v548_v54 = vadd.f32 %v547_v44, %v479_v28 }
  0xd0   :  { %7565 = vst [vmem:[#allocation4_spill] sm:$0xff] %v5141_v40  ;;  %v884_v51 = vrot.slane %v883_v35, 2  ;;  %v855_v56 = vmax.f32 %v853_v17, %v854_v29  ;;  %v862_v57 = vmax.f32 %v860_v18, %v861_v30  ;;  %v891_v58 = vrot.slane %v890_v43, 2 }
  0xd1   :  { %v4167_v60 = vor.u32 %v4596_v39, %v4166_v38  ;;  %v878_v61 = vmax.f32 %v876_v31, %v877_v42  ;;  %v897_v2 = vmax.f32 %v895_v36, %v896_v52  ;;  %v601_v4 = vmax.f32 %v410_v37, %v548_v54  ;;  %v4594_v42 = vld [vmem:[%s7447_s3 + $0x64] sm:$0xf0]  ;;  %v4160_v52 = vld [vmem:[%s7447_s3 + $0x68] sm:$0xf0] }
  0xd2   :  { %v885_v1 = vmax.f32 %v883_v35, %v884_v51  ;;  %v5149_v5 = vunpack.c.l.b16 %v1563_v21  ;;  %v869_v6 = vmax.f32 %v867_v22, %v868_v41  ;;  %v892_v7 = vmax.f32 %v890_v43, %v891_v58  ;;  %v342_v35 = vpop.f32.mrf.mxu0  ;;  %v4158_v41 = vld [vmem:[%s7447_s3 + $0x60] sm:$0xf]  ;;  %v4593_v51 = vld [vmem:[%s7447_s3 + $0x64] sm:$0xf]  ;;  %v4561_v58 = vld [vmem:[%s7446_s0 + $0xb4] sm:$0xf] }
  0xd3   :  { %2160 = vmatpush.bf16.msrb.mxu0 %v4167_v60  ;;  %v4171_v8 = vor.u32 %v4595_v45, %v4168_v55  ;;  %v5151_v9 = vmax.f32 %v848_v25, %v849_v50  ;;  %v898_v10 = vrot.slane %v897_v2, 2  ;;  %v657_v11 = vrot.slane %v601_v4, 2  ;;  %v3928_v60 = vld [vmem:[%s7446_s0 + $0xb8] sm:$0xf0] }
  0xd4   :  { %7566 = vst [vmem:[#allocation5_spill] sm:$0xff] %v5149_v5  ;;  %v658_v13 = vrot.slane %v601_v4, 4  ;;  %v856_v14 = vrot.slane %v855_v56, 2  ;;  %v863_v15 = vrot.slane %v862_v57, 2  ;;  %v659_v16 = vrot.slane %v601_v4, 6 }
  0xd5   :  { %v902_v17 = vsel %vm789_vm2, %v601_v4, -inf  ;;  %2189 = vmatpush.bf16.msrb.mxu2 %v4171_v8  ;;  %v879_v18 = vrot.slane %v878_v61, 1  ;;  %v886_v19 = vrot.slane %v885_v1, 1  ;;  %v909_v21 = vsel %vm789_vm2, %v657_v11, -inf  ;;  %v4592_v8 = vld [vmem:[%s7447_s3 + $0x54] sm:$0xf0] }
  0xd6   :  { %v903_v20 = vrot.slane %v902_v17, 4  ;;  %v870_v22 = vrot.slane %v869_v6, 2  ;;  %v893_v23 = vrot.slane %v892_v7, 1  ;;  %v910_v24 = vrot.slane %v909_v21, 4 }
  0xd7   :  { %v916_v25 = vsel %vm789_vm2, %v658_v13, -inf  ;;  %v851_v26 = vrot.slane %v5151_v9, 1  ;;  %v899_v27 = vmax.f32 %v897_v2, %v898_v10  ;;  %v857_v30 = vmax.f32 %v855_v56, %v856_v14  ;;  %v411_v14 = vpop.f32.mrf.mxu1 }
  0xd8   :  { %v904_v28 = vmax.f32 %v902_v17, %v903_v20  ;;  %v917_v29 = vrot.slane %v916_v25, 4  ;;  %v5157_v31 = vmax.f32 %v862_v57, %v863_v15  ;;  %v911_v32 = vmax.f32 %v909_v21, %v910_v24  ;;  %v4152_v17 = vld [vmem:[%s7447_s3 + $0x58] sm:$0xf0] }
  0xd9   :  { %v923_v33 = vsel %vm789_vm2, %v659_v16, -inf  ;;  %v880_v36 = vmax.f32 %v878_v61, %v879_v18  ;;  %v887_v37 = vmax.f32 %v885_v1, %v886_v19  ;;  %v5166_v43 = vmax.f32 %v869_v6, %v870_v22  ;;  %v480_v61 = vpop.f32.mrf.mxu2  ;;  %v4591_v16 = vld [vmem:[%s7447_s3 + $0x54] sm:$0xf]  ;;  %v3926_v22 = vld [vmem:[%s7446_s0 + $0xb0] sm:$0xf] }
  0xda   :  { %v905_v38 = vrot.slane %v904_v28, 2  ;;  %v918_v39 = vmax.f32 %v916_v25, %v917_v29  ;;  %v894_v44 = vmax.f32 %v892_v7, %v893_v23  ;;  %v912_v45 = vrot.slane %v911_v32, 2  ;;  %v4150_v7 = vld [vmem:[%s7447_s3 + $0x50] sm:$0xf]  ;;  %v4562_v23 = vld [vmem:[%s7446_s0 + $0xb4] sm:$0xf0] }
  0xdb   :  { %7567 = vst [vmem:[#allocation6_spill] sm:$0xff] %v5166_v43  ;;  %v924_v50 = vrot.slane %v923_v33, 4  ;;  %v900_v54 = vrot.slane %v899_v27, 1  ;;  %v343_v57 = vadd.f32 %v342_v35, %v5045_v59  ;;  %v858_v1 = vrot.slane %v857_v30, 1  ;;  %v4590_v35 = vld [vmem:[%s7447_s3 + $0x44] sm:$0xf0] }
  0xdc   :  { %v906_v55 = vmax.f32 %v904_v28, %v905_v38  ;;  %v919_v56 = vrot.slane %v918_v39, 2  ;;  %v913_v2 = vmax.f32 %v911_v32, %v912_v45  ;;  %v4159_v6 = vor.u32 %v4594_v42, %v4158_v41  ;;  %v549_v32 = vpop.f32.mrf.mxu3 }
  0xdd   :  { %v925_v4 = vmax.f32 %v923_v33, %v924_v50  ;;  %v1474_v10 = vmax.f32 %v880_v36, 0.0  ;;  %v1475_v11 = vmax.f32 %v887_v37, 0.0  ;;  %v4163_v15 = vor.u32 %v4593_v51, %v4160_v52  ;;  %v4142_v33 = vld [vmem:[%s7447_s3 + $0x40] sm:$0xf]  ;;  %v345_v52 = vpop.f32.mrf.mxu0 }
  0xde   :  { %v920_v13 = vmax.f32 %v918_v39, %v919_v56  ;;  %v1476_v18 = vmax.f32 %v894_v44, 0.0  ;;  %v907_v19 = vrot.slane %v906_v55, 1  ;;  %2161 = vmatpush.bf16.msrb.mxu0 %v4159_v6  ;;  %v3931_v20 = vor.u32 %v4561_v58, %v3928_v60 }
  0xdf   :  { %v481_v21 = vadd.f32 %v480_v61, %v5055_v0  ;;  %v5201_v24 = vmax.f32 %v5151_v9, %v851_v26  ;;  %v901_v25 = vmax.f32 %v899_v27, %v900_v54  ;;  %v926_v28 = vrot.slane %v925_v4, 2  ;;  %2190 = vmatpush.bf16.msrb.mxu2 %v4163_v15  ;;  %v4605_v26 = vld [vmem:[%s7447_s3 + $0xc4] sm:$0xf]  ;;  %v4080_v27 = vld [vmem:[%s7447_s3 + $0xc8] sm:$0xf0] }
  0xe0   :  { %v412_v29 = vadd.f32 %v411_v14, %v343_v57  ;;  %v914_v36 = vrot.slane %v913_v2, 1  ;;  %v921_v37 = vrot.slane %v920_v13, 1  ;;  %4027 = vmatmul.msk.bf16.gmra.mxu3 %vm277_vm1, %v3931_v20  ;;  %v4151_v9 = vor.u32 %v4592_v8, %v4150_v7  ;;  %4015 = vmatmul.msk.bf16.gmra.mxu1 %vm277_vm1, %v3931_v20 }
  0xe1   :  { %v550_v38 = vadd.f32 %v549_v32, %v481_v21  ;;  %v5216_v39 = vmax.f32 %v857_v30, %v858_v1  ;;  %v5218_v41 = vpack.c.bf16 %v1474_v10, %v1474_v10  ;;  %v5220_v42 = vpack.c.bf16 %v1475_v11, %v1475_v11  ;;  %v483_v10 = vpop.f32.mrf.mxu2  ;;  %v4078_v11 = vld [vmem:[%s7447_s3 + $0xc0] sm:$0xf] }
  0xe2   :  { %v4155_v44 = vor.u32 %v4591_v16, %v4152_v17  ;;  %v1568_v45 = vpack.c.bf16 %v1476_v18, %v1476_v18  ;;  %v908_v50 = vmax.f32 %v906_v55, %v907_v19  ;;  %2162 = vmatpush.bf16.msrb.mxu0 %v4151_v9  ;;  %v3927_v54 = vor.u32 %v4562_v23, %v3926_v22  ;;  %v4589_v55 = vld [vmem:[%s7447_s3 + $0x44] sm:$0xf]  ;;  %v4606_v17 = vld [vmem:[%s7447_s3 + $0xc4] sm:$0xf0]  ;;  %v414_v22 = vpop.f32.mrf.mxu1  ;;  %v4134_v23 = vld [vmem:[%s7447_s3 + $0x30] sm:$0xf] }
  0xe3   :  { %v602_v51 = vmax.f32 %v412_v29, %v550_v38  ;;  %v1477_v56 = vmax.f32 %v901_v25, 0.0  ;;  %v927_v57 = vmax.f32 %v925_v4, %v926_v28  ;;  %v4083_v58 = vor.u32 %v4605_v26, %v4080_v27  ;;  %v4144_v4 = vld [vmem:[%s7447_s3 + $0x48] sm:$0xf0]  ;;  %v4588_v25 = vld [vmem:[%s7447_s3 + $0x34] sm:$0xf0] }
  0xe4   :  { %2191 = vmatpush.bf16.msrb.mxu2 %v4155_v44  ;;  %v4143_v60 = vor.u32 %v4590_v35, %v4142_v33  ;;  %v5224_v30 = vunpack.c.l.b16 %v5132_v34  ;;  %v915_v61 = vmax.f32 %v913_v2, %v914_v36  ;;  %v5226_v1 = vmax.f32 %v920_v13, %v921_v37  ;;  %384 = vmatmul.bf16.gmra.mxu0 %v3927_v54  ;;  %v4587_v35 = vld [vmem:[%s7447_s3 + $0x34] sm:$0xf]  ;;  %v4136_v36 = vld [vmem:[%s7447_s3 + $0x38] sm:$0xf0]  ;;  %v552_v9 = vpop.f32.mrf.mxu3  ;;  %v4070_v44 = vld [vmem:[%s7447_s3 + $0xb0] sm:$0xf] }
  0xe5   :  { %v346_v6 = vadd.f32 %v345_v52, %v5045_v59  ;;  %522 = vmatmul.bf16.gmra.mxu2 %v3927_v54  ;;  %v660_v8 = vrot.slane %v602_v51, 2  ;;  %v661_v2 = vrot.slane %v602_v51, 4  ;;  %1974 = vmatpush.bf16.msrb.mxu3 %v4083_v58  ;;  %v1478_v15 = vmax.f32 %v908_v50, 0.0  ;;  %v4072_v58 = vld [vmem:[%s7447_s3 + $0xb8] sm:$0xf0] }
  0xe6   :  { %7568 = vst [vmem:[#allocation7_spill] sm:$0xff] %v5224_v30  ;;  %v662_v16 = vrot.slane %v602_v51, 6  ;;  %2163 = vmatpush.bf16.msrb.mxu0 %v4143_v60  ;;  %v1569_v18 = vpack.c.bf16 %v1477_v56, %v1477_v56  ;;  %v928_v20 = vrot.slane %v927_v57, 1  ;;  %v930_v21 = vsel %vm789_vm2, %v602_v51, -inf  ;;  %v4603_v56 = vld [vmem:[%s7447_s3 + $0xb4] sm:$0xf] }
  0xe7   :  { %v5253_v28 = vunpack.c.l.b16 %v1568_v45  ;;  %v1479_v29 = vmax.f32 %v915_v61, 0.0  ;;  %v1480_v32 = vmax.f32 %v5226_v1, 0.0  ;;  %v415_v33 = vadd.f32 %v414_v22, %v346_v6  ;;  %v4604_v45 = vld [vmem:[%s7447_s3 + $0xb4] sm:$0xf0]  ;;  %v4128_v22 = vld [vmem:[%s7447_s3 + $0x28] sm:$0xf0] }
  0xe8   :  { %v937_v37 = vsel %vm789_vm2, %v660_v8, -inf  ;;  %v944_v38 = vsel %vm789_vm2, %v661_v2, -inf  ;;  %v4147_v26 = vor.u32 %v4589_v55, %v4144_v4  ;;  %v484_v27 = vadd.f32 %v483_v10, %v5055_v0  ;;  %v4126_v55 = vld [vmem:[%s7447_s3 + $0x20] sm:$0xf]  ;;  %v4586_v4 = vld [vmem:[%s7447_s3 + $0x24] sm:$0xf0] }
  0xe9   :  { %7569 = vst [vmem:[#allocation8_spill] sm:$0xff] %v5253_v28  ;;  %v1570_v50 = vpack.c.bf16 %v1478_v15, %v1478_v15  ;;  %v931_v51 = vrot.slane %v930_v21, 4  ;;  %v951_v52 = vsel %vm789_vm2, %v662_v16, -inf  ;;  %v4079_v54 = vor.u32 %v4606_v17, %v4078_v11  ;;  %v347_v11 = vpop.f32.mrf.mxu0 }
  0xea   :  { %v5278_v60 = vunpack.c.l.b16 %v1569_v18  ;;  %v5280_v61 = vmax.f32 %v927_v57, %v928_v20  ;;  %2192 = vmatpush.bf16.msrb.mxu2 %v4147_v26  ;;  %v553_v1 = vadd.f32 %v552_v9, %v484_v27  ;;  %v4135_v6 = vor.u32 %v4588_v25, %v4134_v23  ;;  %v4585_v20 = vld [vmem:[%s7447_s3 + $0x24] sm:$0xf] }
  0xeb   :  { %v5288_v8 = vpack.c.bf16 %v1479_v29, %v1479_v29  ;;  %v938_v2 = vrot.slane %v937_v37, 4  ;;  %v945_v10 = vrot.slane %v944_v38, 4  ;;  %1945 = vmatpush.bf16.msrb.mxu1 %v4079_v54  ;;  %v4139_v15 = vor.u32 %v4587_v35, %v4136_v36  ;;  %v4602_v36 = vld [vmem:[%s7447_s3 + $0xa4] sm:$0xf0] }
  0xec   :  { %7570 = vst [vmem:[#allocation9_spill] sm:$0xff] %v5278_v60  ;;  %v952_v57 = vrot.slane %v951_v52, 4  ;;  %v603_v16 = vmax.f32 %v415_v33, %v553_v1  ;;  %2164 = vmatpush.bf16.msrb.mxu0 %v4135_v6  ;;  %v4071_v17 = vor.u32 %v4604_v45, %v4070_v44  ;;  %v4075_v18 = vor.u32 %v4603_v56, %v4072_v58  ;;  %v4062_v33 = vld [vmem:[%s7447_s3 + $0xa0] sm:$0xf]  ;;  %v4064_v56 = vld [vmem:[%s7447_s3 + $0xa8] sm:$0xf0] }
  0xed   :  { %v5296_v23 = vpack.c.bf16 %v1480_v32, %v1480_v32  ;;  %v5298_v25 = vunpack.c.l.b16 %v1570_v50  ;;  %v5300_v29 = vmax.f32 %v930_v21, %v931_v51  ;;  %v4127_v35 = vor.u32 %v4586_v4, %v4126_v55  ;;  %v485_v32 = vpop.f32.mrf.mxu2  ;;  %v4601_v21 = vld [vmem:[%s7447_s3 + $0xa4] sm:$0xf]  ;;  %v4118_v58 = vld [vmem:[%s7447_s3 + $0x10] sm:$0xf]  ;;  %v4584_v55 = vld [vmem:[%s7447_s3 + $0x14] sm:$0xf0] }
  0xee   :  { %v663_v9 = vrot.slane %v603_v16, 2  ;;  %v664_v26 = vrot.slane %v603_v16, 4  ;;  %v665_v27 = vrot.slane %v603_v16, 6  ;;  %v348_v44 = vadd.f32 %v347_v11, %v5045_v59  ;;  %2193 = vmatpush.bf16.msrb.mxu2 %v4139_v15  ;;  %1975 = vmatpush.bf16.msrb.mxu3 %v4075_v18  ;;  %v416_v11 = vpop.f32.mrf.mxu1  ;;  %v554_v18 = vpop.f32.mrf.mxu3 }
  0xef   :  { %7571 = vst [vmem:[#allocation10_spill] sm:$0xff] %v5298_v25  ;;  %v5312_v45 = vmax.f32 %v937_v37, %v938_v2  ;;  %v5314_v50 = vmax.f32 %v944_v38, %v945_v10  ;;  %v958_v51 = vsel %vm789_vm2, %v603_v16, -inf  ;;  %1946 = vmatpush.bf16.msrb.mxu1 %v4071_v17  ;;  %v4131_v54 = vor.u32 %v4585_v20, %v4128_v22  ;;  %v4120_v22 = vld [vmem:[%s7447_s3 + $0x18] sm:$0xf0] }
  0xf0   :  { %v5323_v1 = vmax.f32 %v951_v52, %v952_v57  ;;  %v959_v6 = vrot.slane %v958_v51, 4  ;;  %v965_v37 = vsel %vm789_vm2, %v663_v9, -inf  ;;  %v972_v38 = vsel %vm789_vm2, %v664_v26, -inf  ;;  %2165 = vmatpush.bf16.msrb.mxu0 %v4127_v35  ;;  %v4583_v52 = vld [vmem:[%s7447_s3 + $0x14] sm:$0xf] }
  0xf1   :  { %v966_v4 = vrot.slane %v965_v37, 4  ;;  %v973_v2 = vrot.slane %v972_v38, 4  ;;  %v979_v10 = vsel %vm789_vm2, %v665_v27, -inf  ;;  %v486_v15 = vadd.f32 %v485_v32, %v5055_v0  ;;  %v4054_v35 = vld [vmem:[%s7447_s3 + $0x90] sm:$0xf] }
  0xf2   :  { %v960_v57 = vmax.f32 %v958_v51, %v959_v6  ;;  %v980_v16 = vrot.slane %v979_v10, 4  ;;  %v417_v17 = vadd.f32 %v416_v11, %v348_v44  ;;  %2194 = vmatpush.bf16.msrb.mxu2 %v4131_v54  ;;  %v4063_v20 = vor.u32 %v4602_v36, %v4062_v33  ;;  %v4600_v51 = vld [vmem:[%s7447_s3 + $0x94] sm:$0xf0]  ;;  %v4599_v33 = vld [vmem:[%s7447_s3 + $0x94] sm:$0xf] }
  0xf3   :  { %v967_v9 = vmax.f32 %v965_v37, %v966_v4  ;;  %v974_v26 = vmax.f32 %v972_v38, %v973_v2  ;;  %v555_v27 = vadd.f32 %v554_v18, %v486_v15  ;;  %v4067_v32 = vor.u32 %v4601_v21, %v4064_v56  ;;  %v4056_v36 = vld [vmem:[%s7447_s3 + $0x98] sm:$0xf0] }
  0xf4   :  { %v940_v44 = vrot.slane %v5312_v45, 2  ;;  %v961_v54 = vrot.slane %v960_v57, 2  ;;  %v981_v6 = vmax.f32 %v979_v10, %v980_v16  ;;  %1947 = vmatpush.bf16.msrb.mxu1 %v4063_v20  ;;  %v4119_v37 = vor.u32 %v4584_v55, %v4118_v58  ;;  %v350_v55 = vpop.f32.mrf.mxu0 }
  0xf5   :  { %v968_v38 = vrot.slane %v967_v9, 2  ;;  %v975_v21 = vrot.slane %v974_v26, 2  ;;  %v604_v56 = vmax.f32 %v417_v17, %v555_v27  ;;  %1976 = vmatpush.bf16.msrb.mxu3 %v4067_v32  ;;  %v4123_v4 = vor.u32 %v4583_v52, %v4120_v22 }
  0xf6   :  { %v962_v2 = vmax.f32 %v960_v57, %v961_v54  ;;  %v982_v11 = vrot.slane %v981_v6, 2  ;;  %2166 = vmatpush.bf16.msrb.mxu0 %v4119_v37  ;;  %v4055_v15 = vor.u32 %v4600_v51, %v4054_v35  ;;  %v4059_v18 = vor.u32 %v4599_v33, %v4056_v36  ;;  %v488_v37 = vpop.f32.mrf.mxu2 }
  0xf7   :  { %v969_v34 = vmax.f32 %v967_v9, %v968_v38  ;;  %v976_v13 = vmax.f32 %v974_v26, %v975_v21  ;;  %v666_v7 = vrot.slane %v604_v56, 2  ;;  %v667_v19 = vrot.slane %v604_v56, 4  ;;  %2195 = vmatpush.bf16.msrb.mxu2 %v4123_v4 }
  0xf8   :  { %v963_v14 = vrot.slane %v962_v2, 1  ;;  %v983_v62 = vmax.f32 %v981_v6, %v982_v11  ;;  %v668_v10 = vrot.slane %v604_v56, 6  ;;  %v986_v58 = vsel %vm789_vm2, %v604_v56, -inf  ;;  %1948 = vmatpush.bf16.msrb.mxu1 %v4055_v15 }
  0xf9   :  { %v933_v16 = vrot.slane %v5300_v29, 2  ;;  %v970_v52 = vrot.slane %v969_v34, 1  ;;  %v987_v57 = vrot.slane %v986_v58, 4  ;;  %v993_v17 = vsel %vm789_vm2, %v666_v7, -inf  ;;  %1977 = vmatpush.bf16.msrb.mxu3 %v4059_v18 }
  0xfa   :  { %v977_v20 = vrot.slane %v976_v13, 1  ;;  %v984_v22 = vrot.slane %v983_v62, 1  ;;  %v994_v35 = vrot.slane %v993_v17, 4  ;;  %v1000_v9 = vsel %vm789_vm2, %v667_v19, -inf }
  0xfb   :  { %v947_v26 = vrot.slane %v5314_v50, 2  ;;  %v964_v27 = vmax.f32 %v962_v2, %v963_v14  ;;  %v988_v32 = vmax.f32 %v986_v58, %v987_v57  ;;  %v1001_v51 = vrot.slane %v1000_v9, 4  ;;  %v4110_v14 = vld [vmem:[%s7447_s3] sm:$0xf] }
  0xfc   :  { %v941_v33 = vmax.f32 %v5312_v45, %v940_v44  ;;  %v954_v36 = vrot.slane %v5323_v1, 2  ;;  %v995_v54 = vmax.f32 %v993_v17, %v994_v35  ;;  %v1007_v6 = vsel %vm789_vm2, %v668_v10, -inf  ;;  %v4582_v45 = vld [vmem:[%s7447_s3 + $0x4] sm:$0xf0] }
  0xfd   :  { %v1481_v7 = vmax.f32 %v5280_v61, 0.0  ;;  %v971_v38 = vmax.f32 %v969_v34, %v970_v52  ;;  %v989_v21 = vrot.slane %v988_v32, 2  ;;  %v1002_v56 = vmax.f32 %v1000_v9, %v1001_v51  ;;  %v5385_v51 = vpop.f32.mrf.mxu0 }
  0xfe   :  { %v978_v4 = vmax.f32 %v976_v13, %v977_v20  ;;  %v985_v19 = vmax.f32 %v983_v62, %v984_v22  ;;  %v996_v11 = vrot.slane %v995_v54, 2  ;;  %v1008_v15 = vrot.slane %v1007_v6, 4  ;;  %v4581_v62 = vld [vmem:[%s7447_s3 + $0x4] sm:$0xf]  ;;  %v4112_v13 = vld [vmem:[%s7447_s3 + $0x8] sm:$0xf0] }
  0xff   :  { %v5367_v44 = vunpack.c.l.b16 %v5288_v8  ;;  %v5370_v61 = vmax.f32 %v5300_v29, %v933_v16  ;;  %v1486_v34 = vmax.f32 %v964_v27, 0.0  ;;  %v1003_v2 = vrot.slane %v1002_v56, 2  ;;  %v419_v29 = vpop.f32.mrf.mxu1  ;;  %v557_v16 = vpop.f32.mrf.mxu3 }
 0x100   :  { %v942_v18 = vrot.slane %v941_v33, 1  ;;  %v5379_v10 = vmax.f32 %v5314_v50, %v947_v26  ;;  %v5382_v8 = vmax.f32 %v5323_v1, %v954_v36  ;;  %v990_v58 = vmax.f32 %v988_v32, %v989_v21 }
 0x101   :  { %7572 = vst [vmem:[#allocation11_spill] sm:$0xff] %v5367_v44  ;;  %v1487_v52 = vmax.f32 %v971_v38, 0.0  ;;  %v997_v57 = vmax.f32 %v995_v54, %v996_v11  ;;  %v1009_v17 = vmax.f32 %v1007_v6, %v1008_v15  ;;  %v4111_v20 = vor.u32 %v4582_v45, %v4110_v14 }
 0x102   :  { %7573 = vst [vmem:[#allocation12_spill] sm:$0xff] %v5382_v8  ;;  %v1488_v22 = vmax.f32 %v978_v4, 0.0  ;;  %v1489_v35 = vmax.f32 %v985_v19, 0.0  ;;  %v351_v9 = vadd.f32 %v350_v55, %v5045_v59  ;;  %v4115_v27 = vor.u32 %v4581_v62, %v4112_v13 }
 0x103   :  { %v5388_v50 = vunpack.c.l.b16 %v5296_v23  ;;  %v5390_v26 = vpack.c.bf16 %v1486_v34, %v1486_v34  ;;  %v1004_v1 = vmax.f32 %v1002_v56, %v1003_v2  ;;  %2167 = vmatpush.bf16.msrb.mxu0 %v4111_v20  ;;  %v489_v32 = vadd.f32 %v488_v37, %v5055_v0  ;;  %v490_v37 = vpop.f32.mrf.mxu2 }
 0x104   :  { %v1573_v36 = vpack.c.bf16 %v1481_v7, %v1481_v7  ;;  %v935_v54 = vrot.slane %v5370_v61, 1  ;;  %v991_v38 = vrot.slane %v990_v58, 1  ;;  %2196 = vmatpush.bf16.msrb.mxu2 %v4115_v27  ;;  %v5396_v21 = vpack.c.bf16 %v1487_v52, %v1487_v52 }
 0x105   :  { %7574 = vst [vmem:[#allocation13_spill] sm:$0xff] %v5388_v50  ;;  %v998_v4 = vrot.slane %v997_v57, 1  ;;  %v1010_v23 = vrot.slane %v1009_v17, 2  ;;  %v5398_v19 = vmax.f32 %v941_v33, %v942_v18  ;;  %v5400_v11 = vpack.c.bf16 %v1488_v22, %v1488_v22 }
 0x106   :  { %v1577_v56 = vpack.c.bf16 %v1489_v35, %v1489_v35  ;;  %v420_v15 = vadd.f32 %v419_v29, %v351_v9  ;;  %v1005_v14 = vrot.slane %v1004_v1, 1  ;;  %v558_v45 = vadd.f32 %v557_v16, %v489_v32  ;;  %v4598_v35 = vld [vmem:[%s7447_s3 + $0x84] sm:$0xf0]  ;;  %v4597_v32 = vld [vmem:[%s7447_s3 + $0x84] sm:$0xf] }
 0x107   :  { %v5403_v34 = vmax.f32 %v990_v58, %v991_v38  ;;  %v1565_v2 = vpack.c.bf16 %v1469_v12, %v1469_v12  ;;  %v7575_v33 = vunpack.c.l.b16 %v5101_v47  ;;  %v7576_v13 = vunpack.c.l.b16 %v5218_v41  ;;  %v421_v12 = vpop.f32.mrf.mxu1  ;;  %v559_v41 = vpop.f32.mrf.mxu3 }
 0x108   :  { %v7577_v18 = vunpack.c.l.b16 %v5220_v42  ;;  %v5419_v58 = vmax.f32 %v997_v57, %v998_v4  ;;  %v5421_v52 = vmax.f32 %v1009_v17, %v1010_v23  ;;  %v5423_v53 = vunpack.c.l.b16 %v1577_v56  ;;  %v4046_v17 = vld [vmem:[%s7447_s3 + $0x80] sm:$0xf]  ;;  %v355_v38 = vpop.f32.mrf.mxu0 }
 0x109   :  { %v2016_v62 = vsel %vm1791_vm3, %v7575_v33, %v2008_v63  ;;  %v5429_v20 = vmax.f32 %v1004_v1, %v1005_v14  ;;  %v5431_v22 = vmax.f32 %v420_v15, %v558_v45  ;;  %v5433_v57 = vunpack.c.l.b16 %v1573_v36  ;;  %v4048_v36 = vld [vmem:[%s7447_s3 + $0x88] sm:$0xf0] }
 0x10a   :  { %v2023_v29 = vsel %vm1791_vm3, %v7577_v18, %v7576_v13  ;;  %7578 = vst [vmem:[#allocation14_spill] sm:$0xff] %v5423_v53  ;;  %v2017_v46 = vsel %vm1793_vm4, %v5103_v48, %v2016_v62  ;;  %v5442_v27 = vunpack.c.l.b16 %v1565_v2  ;;  %v4047_v2 = vor.u32 %v4598_v35, %v4046_v17 }
 0x10b   :  { %v2024_v63 = vsel %vm1793_vm4, %v5253_v28, %v2023_v29  ;;  %7579 = vst [vmem:[#allocation15_spill] sm:$0xff] %v5433_v57  ;;  %v2018_v1 = vsel %vm1795_vm5, %v5105_v49, %v2017_v46  ;;  %v4051_v18 = vor.u32 %v4597_v32, %v4048_v36  ;;  %v353_v46 = vadd.f32 %v5385_v51, %v5045_v59  ;;  %v493_v35 = vpop.f32.mrf.mxu2 }
 0x10c   :  { %7580 = vst [vmem:[#allocation16_spill] sm:$0xff] %v5442_v27  ;;  %v2019_v56 = vsel %vm1797_vm6, %v5141_v40, %v2018_v1  ;;  %v2025_v15 = vsel %vm1795_vm5, %v5278_v60, %v2024_v63  ;;  %1949 = vmatpush.bf16.msrb.mxu1 %v4047_v2  ;;  %v936_v63 = vmax.f32 %v5370_v61, %v935_v54  ;;  %v1470_v17 = vmax.f32 %v5201_v24, 0.0 }
 0x10d   :  { %v2020_v14 = vsel %vm1799_vm7, %v5149_v5, %v2019_v56  ;;  %v2026_v45 = vsel %vm1797_vm6, %v5298_v25, %v2025_v15  ;;  %1978 = vmatpush.bf16.msrb.mxu3 %v4051_v18  ;;  %v7581_v32 = vmov %v7575_v33  ;;  %v7582_v51 = vunpack.c.l.b16 %v5220_v42 }
 0x10e   :  { %v2021_v62 = vsel %vm1801_vm8, %v5224_v30, %v2020_v14  ;;  %v2027_v13 = vsel %vm1799_vm7, %v5367_v44, %v2026_v45  ;;  %v1792_v36 = vsel %vm1791_vm3, %v5103_v48, %v7581_v32  ;;  %v1482_v24 = vmax.f32 %v936_v63, 0.0 }
 0x10f   :  { %v2028_v29 = vsel %vm1801_vm8, %v5388_v50, %v2027_v13  ;;  %v2022_v1 = vsel %vm1803_vm9, %v5442_v27, %v2021_v62  ;;  %v1805_v61 = vsel %vm1791_vm3, %v5253_v28, %v7582_v51  ;;  %v1638_v15 = vpack.c.bf16 %v1470_v17, %v1470_v17  ;;  %v562_v63 = vpop.f32.mrf.mxu3 }
 0x110   :  { %v2029_v56 = vsel %vm1803_vm9, %v5433_v57, %v2028_v29  ;;  %v1794_v14 = vsel %vm1793_vm4, %v5105_v49, %v1792_v36  ;;  %v1806_v47 = vsel %vm1793_vm4, %v5278_v60, %v1805_v61  ;;  %v491_v2 = vadd.f32 %v490_v37, %v5055_v0  ;;  %v424_v29 = vpop.f32.mrf.mxu1  ;;  %v5508_v61 = vpop.f32.mrf.mxu0 }
 0x111   :  { %v2072_v54 = vpack.c.b16 %v2029_v56, %v2022_v1  ;;  %v1796_v45 = vsel %vm1795_vm5, %v5141_v40, %v1794_v14  ;;  %v356_v48 = vadd.f32 %v355_v38, %v5045_v59  ;;  %v1639_v42 = vpack.c.bf16 %v1482_v24, %v1482_v24 }
 0x112   :  { %v5493_v62 = vunpack.c.l.b16 %v1638_v15  ;;  %v1798_v13 = vsel %vm1797_vm6, %v5149_v5, %v1796_v45  ;;  %v1807_v18 = vsel %vm1795_vm5, %v5298_v25, %v1806_v47  ;;  %v422_v17 = vadd.f32 %v421_v12, %v353_v46 }
 0x113   :  { %2168 = vmatmul.bf16.vlgmr.msrb.gmra.mxu0 %v2072_v54  ;;  %2197 = vmatmul.bf16.vlgmr.msrb.gmra.mxu2 %v2072_v54  ;;  %v1800_v1 = vsel %vm1799_vm7, %v5224_v30, %v1798_v13  ;;  %v1808_v37 = vsel %vm1797_vm6, %v5367_v44, %v1807_v18  ;;  %v560_v38 = vadd.f32 %v559_v41, %v491_v2  ;;  %v5503_v56 = vunpack.c.l.b16 %v1639_v42 }
 0x114   :  { %7583 = vst [vmem:[#allocation17_spill] sm:$0xff] %v5493_v62  ;;  %v1809_v32 = vsel %vm1799_vm7, %v5388_v50, %v1808_v37  ;;  %v425_v36 = vadd.f32 %v424_v29, %v356_v48  ;;  %v494_v51 = vadd.f32 %v493_v35, %v5055_v0  ;;  %v5512_v12 = vsel %vm789_vm2, %v5431_v22, -inf }
 0x115   :  { %7584 = vst [vmem:[#allocation18_spill] sm:$0xff] %v5503_v56  ;;  %v1802_v46 = vsel %vm1801_vm8, %v5442_v27, %v1800_v1  ;;  %v1810_v41 = vsel %vm1801_vm8, %v5433_v57, %v1809_v32  ;;  %v606_v54 = vmax.f32 %v422_v17, %v560_v38  ;;  %v1015_v13 = vrot.slane %v5512_v12, 4  ;;  %v495_v17 = vpop.f32.mrf.mxu2 }
 0x116   :  { %v1804_v15 = vsel %vm1803_vm9, %v5493_v62, %v1802_v46  ;;  %v1811_v35 = vsel %vm1803_vm9, %v5503_v56, %v1810_v41  ;;  %v563_v14 = vadd.f32 %v562_v63, %v494_v51 }
 0x117   :  { %v1854_v45 = vpack.c.b16 %v1811_v35, %v1804_v15  ;;  %v672_v47 = vrot.slane %v606_v54, 2  ;;  %v673_v2 = vrot.slane %v606_v54, 4  ;;  %v674_v48 = vrot.slane %v606_v54, 6  ;;  %v564_v7 = vpop.f32.mrf.mxu3 }
 0x118   :  { %v1042_v18 = vsel %vm789_vm2, %v606_v54, -inf  ;;  %v607_v29 = vmax.f32 %v425_v36, %v563_v14  ;;  %v426_v16 = vpop.f32.mrf.mxu1  ;;  %v360_v24 = vpop.f32.mrf.mxu0 }
 0x119   :  { %1950 = vmatmul.bf16.vlgmr.msrb.gmra.mxu1 %v1854_v45  ;;  %1979 = vmatmul.bf16.vlgmr.msrb.gmra.mxu3 %v1854_v45  ;;  %v1043_v1 = vrot.slane %v1042_v18, 4  ;;  %v1049_v37 = vsel %vm789_vm2, %v672_v47, -inf  ;;  %v1056_v38 = vsel %vm789_vm2, %v673_v2, -inf  ;;  %v1063_v63 = vsel %vm789_vm2, %v674_v48, -inf }
 0x11a   :  { %v1050_v32 = vrot.slane %v1049_v37, 4  ;;  %v1057_v51 = vrot.slane %v1056_v38, 4  ;;  %v1064_v46 = vrot.slane %v1063_v63, 4  ;;  %v675_v41 = vrot.slane %v607_v29, 2 }
 0x11b   :  { %v1044_v15 = vmax.f32 %v1042_v18, %v1043_v1  ;;  %v676_v35 = vrot.slane %v607_v29, 4  ;;  %v677_v55 = vrot.slane %v607_v29, 6  ;;  %v1070_v54 = vsel %vm789_vm2, %v607_v29, -inf }
 0x11c   :  { %v1051_v36 = vmax.f32 %v1049_v37, %v1050_v32  ;;  %v1058_v14 = vmax.f32 %v1056_v38, %v1057_v51  ;;  %v1065_v6 = vmax.f32 %v1063_v63, %v1064_v46  ;;  %v1071_v45 = vrot.slane %v1070_v54, 4 }
 0x11d   :  { %v1045_v47 = vrot.slane %v1044_v15, 2  ;;  %v1077_v2 = vsel %vm789_vm2, %v675_v41, -inf  ;;  %v1084_v48 = vsel %vm789_vm2, %v676_v35, -inf  ;;  %v1091_v4 = vsel %vm789_vm2, %v677_v55, -inf }
 0x11e   :  { %v1052_v23 = vrot.slane %v1051_v36, 2  ;;  %v1059_v42 = vrot.slane %v1058_v14, 2  ;;  %v1066_v18 = vrot.slane %v1065_v6, 2  ;;  %v1072_v1 = vmax.f32 %v1070_v54, %v1071_v45 }
 0x11f   :  { %v1046_v9 = vmax.f32 %v1044_v15, %v1045_v47  ;;  %v1078_v29 = vrot.slane %v1077_v2, 4  ;;  %v1085_v37 = vrot.slane %v1084_v48, 4  ;;  %v1092_v38 = vrot.slane %v1091_v4, 4  ;;  %v498_v15 = vpop.f32.mrf.mxu2 }
 0x120   :  { %v1053_v63 = vmax.f32 %v1051_v36, %v1052_v23  ;;  %v1060_v32 = vmax.f32 %v1058_v14, %v1059_v42  ;;  %v1067_v51 = vmax.f32 %v1065_v6, %v1066_v18  ;;  %v1073_v46 = vrot.slane %v1072_v1, 2 }
 0x121   :  { %v1047_v33 = vrot.slane %v1046_v9, 1  ;;  %v1079_v8 = vmax.f32 %v1077_v2, %v1078_v29  ;;  %v1086_v41 = vmax.f32 %v1084_v48, %v1085_v37  ;;  %v1093_v43 = vmax.f32 %v1091_v4, %v1092_v38 }
 0x122   :  { %v7585_v35 = vrot.slane %v5431_v22, 2  ;;  %v1054_v56 = vrot.slane %v1053_v63, 1  ;;  %v1074_v57 = vmax.f32 %v1072_v1, %v1073_v46  ;;  %v496_v54 = vadd.f32 %v495_v17, %v5055_v0 }
 0x123   :  { %v1016_v45 = vmax.f32 %v5512_v12, %v1015_v13  ;;  %v1080_v47 = vrot.slane %v1079_v8, 2  ;;  %v1087_v23 = vrot.slane %v1086_v41, 2  ;;  %v358_v6 = vadd.f32 %v5508_v61, %v5045_v59  ;;  %v429_v61 = vpop.f32.mrf.mxu1 }
 0x124   :  { %v1021_v55 = vsel %vm789_vm2, %v7585_v35, -inf  ;;  %v1048_v42 = vmax.f32 %v1046_v9, %v1047_v33  ;;  %v1055_v36 = vmax.f32 %v1053_v63, %v1054_v56  ;;  %v1068_v14 = vrot.slane %v1067_v51, 1  ;;  %v567_v9 = vpop.f32.mrf.mxu3 }
 0x125   :  { %v1075_v4 = vrot.slane %v1074_v57, 1  ;;  %v1061_v2 = vrot.slane %v1060_v32, 1  ;;  %v1081_v48 = vmax.f32 %v1079_v8, %v1080_v47  ;;  %v1088_v18 = vmax.f32 %v1086_v41, %v1087_v23  ;;  %v362_v23 = vpop.f32.mrf.mxu0 }
 0x126   :  { %v1094_v29 = vrot.slane %v1093_v43, 2  ;;  %v7586_v1 = vmax.f32 %v5403_v34, 0.0  ;;  %v7587_v37 = vrot.slane %v5431_v22, 4  ;;  %v565_v38 = vadd.f32 %v564_v7, %v496_v54 }
 0x127   :  { %v1076_v13 = vmax.f32 %v1074_v57, %v1075_v4  ;;  %v1017_v33 = vrot.slane %v1016_v45, 2  ;;  %v1022_v56 = vrot.slane %v1021_v55, 4  ;;  %v7589_v63 = vrot.slane %v5431_v22, 6 }
 0x128   :  { %v1578_v17 = vpack.c.bf16 %v7586_v1, %v7586_v1  ;;  %v5546_v12 = vsel %vm789_vm2, %v7587_v37, -inf  ;;  %v1082_v46 = vrot.slane %v1081_v48, 1  ;;  %v1069_v34 = vmax.f32 %v1067_v51, %v1068_v14 }
 0x129   :  { %7588 = vst [vmem:[#allocation19_spill] sm:$0xff] %v5546_v12  ;;  %v5551_v8 = vsel %vm789_vm2, %v7589_v63, -inf  ;;  %v1498_v41 = vmax.f32 %v1048_v42, 0.0  ;;  %v1499_v35 = vmax.f32 %v1055_v36, 0.0  ;;  %v427_v47 = vadd.f32 %v426_v16, %v358_v6 }
 0x12a   :  { %7590 = vst [vmem:[#allocation20_spill] sm:$0xff] %v5551_v8  ;;  %v5553_v1 = vmax.f32 %v1060_v32, %v1061_v2  ;;  %v1089_v37 = vrot.slane %v1088_v18, 1  ;;  %v5555_v57 = vmax.f32 %v1093_v43, %v1094_v29  ;;  %v1502_v7 = vmax.f32 %v1076_v13, 0.0  ;;  %v500_v2 = vpop.f32.mrf.mxu2 }
 0x12b   :  { %v7591_v54 = vmax.f32 %v5419_v58, 0.0  ;;  %v5562_v22 = vunpack.c.l.b16 %v1578_v17  ;;  %v5564_v63 = vmax.f32 %v427_v47, %v565_v38  ;;  %v361_v51 = vadd.f32 %v360_v24, %v5045_v59 }
 0x12c   :  { %v5567_v42 = vmax.f32 %v1021_v55, %v1022_v56  ;;  %v1083_v43 = vmax.f32 %v1081_v48, %v1082_v46  ;;  %v5571_v6 = vmax.f32 %v1016_v45, %v1017_v33  ;;  %v1501_v36 = vmax.f32 %v1069_v34, 0.0 }
 0x12d   :  { %v5560_v4 = vpack.c.bf16 %v7591_v54, %v7591_v54  ;;  %7592 = vst [vmem:[#allocation21_spill] sm:$0xff] %v5562_v22  ;;  %v5573_v58 = vpack.c.bf16 %v1498_v41, %v1498_v41  ;;  %v5575_v14 = vpack.c.bf16 %v1499_v35, %v1499_v35  ;;  %v5578_v17 = vmax.f32 %v1088_v18, %v1089_v37  ;;  %v431_v37 = vpop.f32.mrf.mxu1  ;;  %v365_v32 = vpop.f32.mrf.mxu0 }
 0x12e   :  { %7593 = vst [vmem:[#allocation22_spill] sm:$0xff] %v5567_v42  ;;  %v1586_v55 = vpack.c.bf16 %v1502_v7, %v1502_v7  ;;  %v678_v13 = vrot.slane %v5564_v63, 2  ;;  %v679_v38 = vrot.slane %v5564_v63, 4  ;;  %v430_v48 = vadd.f32 %v429_v61, %v361_v51  ;;  %v569_v61 = vpop.f32.mrf.mxu3 }
 0x12f   :  { %v499_v45 = vadd.f32 %v498_v15, %v5055_v0  ;;  %v1503_v33 = vmax.f32 %v1083_v43, 0.0  ;;  %v5586_v56 = vsel %vm789_vm2, %v5564_v63, -inf  ;;  %v363_v46 = vadd.f32 %v362_v23, %v5045_v59 }
 0x130   :  { %v501_v18 = vadd.f32 %v500_v2, %v5055_v0  ;;  %v5590_v34 = vpack.c.bf16 %v1501_v36, %v1501_v36  ;;  %v5596_v43 = vunpack.c.l.b16 %v1586_v55  ;;  %v5600_v36 = vsel %vm789_vm2, %v678_v13, -inf }
 0x131   :  { %v568_v47 = vadd.f32 %v567_v9, %v499_v45  ;;  %v432_v54 = vadd.f32 %v431_v37, %v363_v46  ;;  %v5602_v16 = vpack.c.bf16 %v1503_v33, %v1503_v33  ;;  %v5605_v9 = vsel %vm789_vm2, %v679_v38, -inf }
 0x132   :  { %v570_v51 = vadd.f32 %v569_v61, %v501_v18  ;;  %7594 = vst [vmem:[#allocation23_spill] sm:$0xff] %v5596_v43  ;;  %v5608_v41 = vadd.f32 %v365_v32, %v5045_v59  ;;  %v503_v44 = vpop.f32.mrf.mxu2 }
 0x133   :  { %v609_v2 = vmax.f32 %v430_v48, %v568_v47  ;;  %7595 = vst [vmem:[#allocation24_spill] sm:$0xff] %v5605_v9 }
 0x134   :  { %v610_v45 = vmax.f32 %v432_v54, %v570_v51 }
 0x135   :  { %v681_v46 = vrot.slane %v609_v2, 2  ;;  %v682_v18 = vrot.slane %v609_v2, 4  ;;  %v683_v55 = vrot.slane %v609_v2, 6  ;;  %v1126_v37 = vsel %vm789_vm2, %v609_v2, -inf  ;;  %v434_v27 = vpop.f32.mrf.mxu1 }
 0x136   :  { %v1127_v61 = vrot.slane %v1126_v37, 4  ;;  %v684_v35 = vrot.slane %v610_v45, 2  ;;  %v685_v13 = vrot.slane %v610_v45, 4  ;;  %v686_v15 = vrot.slane %v610_v45, 6 }
 0x137   :  { %v1133_v48 = vsel %vm789_vm2, %v681_v46, -inf  ;;  %v1140_v33 = vsel %vm789_vm2, %v682_v18, -inf  ;;  %v1147_v38 = vsel %vm789_vm2, %v683_v55, -inf  ;;  %v1154_v47 = vsel %vm789_vm2, %v610_v45, -inf }
 0x138   :  { %v1128_v54 = vmax.f32 %v1126_v37, %v1127_v61  ;;  %v1134_v32 = vrot.slane %v1133_v48, 4  ;;  %v1141_v51 = vrot.slane %v1140_v33, 4  ;;  %v1148_v29 = vrot.slane %v1147_v38, 4 }
 0x139   :  { %v1155_v7 = vrot.slane %v1154_v47, 4  ;;  %v1161_v23 = vsel %vm789_vm2, %v684_v35, -inf  ;;  %v1168_v2 = vsel %vm789_vm2, %v685_v13, -inf  ;;  %v1175_v24 = vsel %vm789_vm2, %v686_v15, -inf }
 0x13a   :  { %v1129_v8 = vrot.slane %v1128_v54, 2  ;;  %v1135_v12 = vmax.f32 %v1133_v48, %v1134_v32  ;;  %v1142_v46 = vmax.f32 %v1140_v33, %v1141_v51  ;;  %v1149_v62 = vmax.f32 %v1147_v38, %v1148_v29 }
 0x13b   :  { %v1156_v18 = vmax.f32 %v1154_v47, %v1155_v7  ;;  %v1162_v28 = vrot.slane %v1161_v23, 4  ;;  %v1169_v55 = vrot.slane %v1168_v2, 4  ;;  %v1176_v3 = vrot.slane %v1175_v24, 4 }
 0x13c   :  { %v1130_v45 = vmax.f32 %v1128_v54, %v1129_v8  ;;  %v1136_v37 = vrot.slane %v1135_v12, 2  ;;  %v1143_v61 = vrot.slane %v1142_v46, 2  ;;  %v1150_v50 = vrot.slane %v1149_v62, 2 }
 0x13d   :  { %v1157_v30 = vrot.slane %v1156_v18, 2  ;;  %v1163_v35 = vmax.f32 %v1161_v23, %v1162_v28  ;;  %v1170_v25 = vmax.f32 %v1168_v2, %v1169_v55  ;;  %v1177_v13 = vmax.f32 %v1175_v24, %v1176_v3 }
 0x13e   :  { %v1131_v60 = vrot.slane %v1130_v45, 1  ;;  %v1137_v15 = vmax.f32 %v1135_v12, %v1136_v37  ;;  %v1144_v5 = vmax.f32 %v1142_v46, %v1143_v61  ;;  %v1151_v48 = vmax.f32 %v1149_v62, %v1150_v50  ;;  %v572_v62 = vpop.f32.mrf.mxu3 }
 0x13f   :  { %v1158_v33 = vmax.f32 %v1156_v18, %v1157_v30  ;;  %v1164_v29 = vrot.slane %v1163_v35, 2  ;;  %v1171_v7 = vrot.slane %v1170_v25, 2  ;;  %v504_v38 = vadd.f32 %v503_v44, %v5055_v0 }
 0x140   :  { %v1132_v47 = vmax.f32 %v1130_v45, %v1131_v60  ;;  %v1138_v8 = vrot.slane %v1137_v15, 1  ;;  %v1145_v54 = vrot.slane %v1144_v5, 1  ;;  %v1152_v32 = vrot.slane %v1151_v48, 1 }
 0x141   :  { %v1106_v51 = vrot.slane %v5600_v36, 4  ;;  %v1159_v40 = vrot.slane %v1158_v33, 1  ;;  %v1165_v49 = vmax.f32 %v1163_v35, %v1164_v29  ;;  %v1178_v28 = vrot.slane %v1177_v13, 2  ;;  %v5639_v29 = vpop.f32.mrf.mxu1 }
 0x142   :  { %v1139_v23 = vmax.f32 %v1137_v15, %v1138_v8  ;;  %v1146_v3 = vmax.f32 %v1144_v5, %v1145_v54  ;;  %v1153_v24 = vmax.f32 %v1151_v48, %v1152_v32  ;;  %v1172_v12 = vmax.f32 %v1170_v25, %v1171_v7 }
 0x143   :  { %v1510_v2 = vmax.f32 %v1132_v47, 0.0  ;;  %v1160_v50 = vmax.f32 %v1158_v33, %v1159_v40  ;;  %v1166_v30 = vrot.slane %v1165_v49, 1  ;;  %v7596_v46 = vrot.slane %v5421_v52, 1 }
 0x144   :  { %v435_v18 = vadd.f32 %v434_v27, %v5608_v41  ;;  %v573_v55 = vadd.f32 %v572_v62, %v504_v38  ;;  %v7597_v45 = vrot.slane %v5555_v57, 1  ;;  %v7598_v5 = vrot.slane %v5586_v56, 4  ;;  %v367_v41 = vpop.f32.mrf.mxu0  ;;  %v5645_v38 = vpop.f32.mrf.mxu2 }
 0x145   :  { %v1013_v60 = vmax.f32 %v5421_v52, %v7596_v46  ;;  %v7599_v40 = vrot.slane %v5564_v63, 6  ;;  %v1511_v35 = vmax.f32 %v1139_v23, 0.0  ;;  %v1513_v52 = vmax.f32 %v1153_v24, 0.0 }
 0x146   :  { %v1097_v37 = vmax.f32 %v5555_v57, %v7597_v45  ;;  %v1100_v25 = vmax.f32 %v5586_v56, %v7598_v5  ;;  %v1512_v15 = vmax.f32 %v1146_v3, 0.0  ;;  %v1173_v48 = vrot.slane %v1172_v12, 1 }
 0x147   :  { %v5634_v61 = vsel %vm789_vm2, %v7599_v40, -inf  ;;  %v5636_v33 = vmax.f32 %v1177_v13, %v1178_v28  ;;  %v1492_v27 = vmax.f32 %v5429_v20, 0.0  ;;  %v5641_v57 = vpack.c.bf16 %v1510_v2, %v1510_v2 }
 0x148   :  { %7600 = vst [vmem:[#allocation25_spill] sm:$0xff] %v5634_v61  ;;  %v5643_v7 = vmax.f32 %v1165_v49, %v1166_v30  ;;  %v1514_v56 = vmax.f32 %v1160_v50, 0.0  ;;  %v1493_v63 = vmax.f32 %v1013_v60, 0.0  ;;  %v5648_v47 = vunpack.c.l.b16 %v5602_v16 }
 0x149   :  { %v5651_v8 = vmax.f32 %v5600_v36, %v1106_v51  ;;  %v5653_v13 = vmax.f32 %v435_v18, %v573_v55  ;;  %v1505_v20 = vmax.f32 %v1097_v37, 0.0  ;;  %v1101_v54 = vrot.slane %v1100_v25, 2 }
 0x14a   :  { %7601 = vst [vmem:[#allocation26_spill] sm:$0xff] %v5648_v47  ;;  %v5655_v32 = vpack.c.bf16 %v1511_v35, %v1511_v35  ;;  %v1593_v28 = vpack.c.bf16 %v1513_v52, %v1513_v52  ;;  %v7603_v49 = vmax.f32 %v5553_v1, 0.0  ;;  %v5660_v3 = vpack.c.bf16 %v1512_v15, %v1512_v15 }
 0x14b   :  { %7602 = vst [vmem:[#allocation27_spill] sm:$0xff] %v5651_v8  ;;  %v5662_v24 = vmax.f32 %v1172_v12, %v1173_v48  ;;  %v1580_v2 = vpack.c.bf16 %v1492_v27, %v1492_v27  ;;  %v1515_v51 = vmax.f32 %v5643_v7, 0.0  ;;  %v5667_v50 = vpack.c.bf16 %v1514_v56, %v1514_v56 }
 0x14c   :  { %v1584_v23 = vpack.c.bf16 %v7603_v49, %v7603_v49  ;;  %v1581_v30 = vpack.c.bf16 %v1493_v63, %v1493_v63  ;;  %v687_v62 = vrot.slane %v5653_v13, 2  ;;  %v7604_v1 = vmax.f32 %v5578_v17, 0.0 }
 0x14d   :  { %v1589_v60 = vpack.c.bf16 %v1505_v20, %v1505_v20  ;;  %v5674_v12 = vunpack.c.l.b16 %v5400_v11  ;;  %v5677_v55 = vunpack.c.l.b16 %v1593_v28  ;;  %v5681_v37 = vunpack.c.l.b16 %v5560_v4  ;;  %v574_v11 = vpop.f32.mrf.mxu3 }
 0x14e   :  { %v1588_v46 = vpack.c.bf16 %v7604_v1, %v7604_v1  ;;  %v5683_v5 = vunpack.c.l.b16 %v1580_v2  ;;  %v5685_v40 = vunpack.c.l.b16 %v1581_v30  ;;  %v5687_v17 = vunpack.c.l.b16 %v1584_v23  ;;  %v439_v2 = vpop.f32.mrf.mxu1 }
 0x14f   :  { %7605 = vst [vmem:[#allocation28_spill] sm:$0xff] %v5674_v12  ;;  %v5690_v35 = vunpack.c.l.b16 %v5590_v34  ;;  %v5694_v15 = vunpack.c.l.b16 %v1589_v60  ;;  %v7613_v48 = vunpack.c.l.b16 %v5390_v26  ;;  %v7614_v27 = vunpack.c.l.b16 %v5396_v21  ;;  %v370_v26 = vpop.f32.mrf.mxu0 }
 0x150   :  { %7606 = vst [vmem:[#allocation29_spill] sm:$0xff] %v5681_v37  ;;  %v5692_v52 = vunpack.c.l.b16 %v1588_v46  ;;  %v7615_v56 = vunpack.c.l.b16 %v5573_v58  ;;  %v7616_v63 = vunpack.c.l.b16 %v5575_v14  ;;  %v1019_v49 = vrot.slane %v5571_v6, 1 }
 0x151   :  { %7607 = vst [vmem:[#allocation30_spill] sm:$0xff] %v5683_v5  ;;  %v2030_v4 = vsel %vm1791_vm3, %v7614_v27, %v7613_v48  ;;  %v1102_v23 = vmax.f32 %v1100_v25, %v1101_v54  ;;  %v368_v1 = vadd.f32 %v367_v41, %v5045_v59  ;;  %v7617_v46 = vmov %v7614_v27  ;;  %v508_v48 = vpop.f32.mrf.mxu2 }
 0x152   :  { %7608 = vst [vmem:[#allocation31_spill] sm:$0xff] %v5685_v40  ;;  %v2037_v20 = vsel %vm1791_vm3, %v7616_v63, %v7615_v56  ;;  %v2031_v34 = vsel %vm1793_vm4, %v5674_v12, %v2030_v4  ;;  %v1812_v60 = vsel %vm1791_vm3, %v5674_v12, %v7617_v46  ;;  %v1020_v54 = vmax.f32 %v5571_v6, %v1019_v49 }
 0x153   :  { %7609 = vst [vmem:[#allocation32_spill] sm:$0xff] %v5687_v17  ;;  %v2038_v28 = vsel %vm1793_vm4, %v5687_v17, %v2037_v20  ;;  %v2032_v30 = vsel %vm1795_vm5, %v5423_v53, %v2031_v34  ;;  %v1103_v4 = vrot.slane %v1102_v23, 1  ;;  %v1813_v21 = vsel %vm1793_vm4, %v5423_v53, %v1812_v60 }
 0x154   :  { %7610 = vst [vmem:[#allocation33_spill] sm:$0xff] %v5690_v35  ;;  %v2039_v58 = vsel %vm1795_vm5, %v5690_v35, %v2038_v28  ;;  %v2033_v27 = vsel %vm1797_vm6, %v5562_v22, %v2032_v30  ;;  %v1819_v20 = vsel %vm1791_vm3, %v5687_v17, %v7616_v63  ;;  %v1494_v49 = vmax.f32 %v1020_v54, 0.0 }
 0x155   :  { %7611 = vst [vmem:[#allocation34_spill] sm:$0xff] %v5692_v52  ;;  %v2040_v25 = vsel %vm1797_vm6, %v5596_v43, %v2039_v58  ;;  %v2034_v56 = vsel %vm1799_vm7, %v5681_v37, %v2033_v27  ;;  %v1104_v28 = vmax.f32 %v1102_v23, %v1103_v4  ;;  %v1814_v14 = vsel %vm1795_vm5, %v5562_v22, %v1813_v21 }
 0x156   :  { %7612 = vst [vmem:[#allocation35_spill] sm:$0xff] %v5694_v15  ;;  %v2041_v41 = vsel %vm1799_vm7, %v5648_v47, %v2040_v25  ;;  %v2035_v34 = vsel %vm1801_vm8, %v5683_v5, %v2034_v56  ;;  %v1820_v46 = vsel %vm1793_vm4, %v5690_v35, %v1819_v20  ;;  %v1640_v25 = vpack.c.bf16 %v1494_v49, %v1494_v49 }
 0x157   :  { %v2042_v6 = vsel %vm1801_vm8, %v5692_v52, %v2041_v41  ;;  %v2036_v30 = vsel %vm1803_vm9, %v5685_v40, %v2035_v34  ;;  %v1506_v27 = vmax.f32 %v1104_v28, 0.0  ;;  %v1815_v56 = vsel %vm1797_vm6, %v5681_v37, %v1814_v14 }
 0x158   :  { %v2043_v58 = vsel %vm1803_vm9, %v5694_v15, %v2042_v6  ;;  %v1182_v23 = vsel %vm789_vm2, %v5653_v13, -inf  ;;  %v1821_v54 = vsel %vm1795_vm5, %v5596_v43, %v1820_v46  ;;  %v506_v4 = vadd.f32 %v5645_v38, %v5055_v0  ;;  %v577_v6 = vpop.f32.mrf.mxu3 }
 0x159   :  { %v2073_v60 = vpack.c.b16 %v2043_v58, %v2036_v30  ;;  %v371_v41 = vadd.f32 %v370_v26, %v5045_v59  ;;  %v1641_v21 = vpack.c.bf16 %v1506_v27, %v1506_v27  ;;  %v5756_v63 = vunpack.c.l.b16 %v1640_v25  ;;  %v5766_v30 = vpop.f32.mrf.mxu0  ;;  %v5771_v27 = vpop.f32.mrf.mxu1 }
 0x15a   :  { %v1816_v20 = vsel %vm1799_vm7, %v5683_v5, %v1815_v56  ;;  %v1822_v34 = vsel %vm1797_vm6, %v5648_v47, %v1821_v54  ;;  %v437_v28 = vadd.f32 %v5639_v29, %v368_v1  ;;  %v575_v38 = vadd.f32 %v574_v11, %v506_v4  ;;  %v510_v25 = vpop.f32.mrf.mxu2 }
 0x15b   :  { %2173 = vmatmul.bf16.gmra.mxu0 %v2073_v60  ;;  %2202 = vmatmul.bf16.gmra.mxu2 %v2073_v60  ;;  %7618 = vst [vmem:[#allocation36_spill] sm:$0xff] %v5756_v63  ;;  %v1823_v49 = vsel %vm1799_vm7, %v5692_v52, %v1822_v34  ;;  %v509_v26 = vadd.f32 %v508_v48, %v5055_v0  ;;  %v1183_v14 = vrot.slane %v1182_v23, 4  ;;  %v5769_v46 = vunpack.c.l.b16 %v1641_v21 }
 0x15c   :  { %v440_v60 = vadd.f32 %v439_v2, %v371_v41  ;;  %v1817_v29 = vsel %vm1801_vm8, %v5685_v40, %v1816_v20  ;;  %v1824_v1 = vsel %vm1801_vm8, %v5694_v15, %v1823_v49  ;;  %v612_v11 = vmax.f32 %v437_v28, %v575_v38 }
 0x15d   :  { %7619 = vst [vmem:[#allocation37_spill] sm:$0xff] %v5769_v46  ;;  %v578_v56 = vadd.f32 %v577_v6, %v509_v26  ;;  %v5780_v48 = vpack.c.bf16 %v1515_v51, %v1515_v51  ;;  %v5783_v54 = vunpack.c.l.b16 %v5667_v50  ;;  %v1818_v2 = vsel %vm1803_vm9, %v5756_v63, %v1817_v29 }
 0x15e   :  { %v1825_v4 = vsel %vm1803_vm9, %v5769_v46, %v1824_v1  ;;  %v690_v21 = vrot.slane %v612_v11, 2  ;;  %v691_v20 = vrot.slane %v612_v11, 4  ;;  %v692_v34 = vrot.slane %v612_v11, 6 }
 0x15f   :  { %v1855_v41 = vpack.c.b16 %v1825_v4, %v1818_v2  ;;  %v5789_v28 = vmax.f32 %v1182_v23, %v1183_v14  ;;  %v5794_v7 = vsel %vm789_vm2, %v687_v62, -inf  ;;  %v1210_v51 = vsel %vm789_vm2, %v612_v11, -inf }
 0x160   :  { %v613_v50 = vmax.f32 %v440_v60, %v578_v56  ;;  %v1211_v6 = vrot.slane %v1210_v51, 4  ;;  %v1217_v49 = vsel %vm789_vm2, %v690_v21, -inf  ;;  %v1224_v38 = vsel %vm789_vm2, %v691_v20, -inf  ;;  %v579_v18 = vpop.f32.mrf.mxu3 }
 0x161   :  { %1955 = vmatmul.bf16.gmra.mxu1 %v1855_v41  ;;  %1984 = vmatmul.bf16.gmra.mxu3 %v1855_v41  ;;  %v1231_v26 = vsel %vm789_vm2, %v692_v34, -inf  ;;  %v1218_v29 = vrot.slane %v1217_v49, 4  ;;  %v1225_v23 = vrot.slane %v1224_v38, 4  ;;  %v375_v16 = vpop.f32.mrf.mxu0  ;;  %v5804_v61 = vpop.f32.mrf.mxu1 }
 0x162   :  { %v1232_v14 = vrot.slane %v1231_v26, 4  ;;  %v693_v1 = vrot.slane %v613_v50, 2  ;;  %v1212_v2 = vmax.f32 %v1210_v51, %v1211_v6  ;;  %v694_v4 = vrot.slane %v613_v50, 4 }
 0x163   :  { %v695_v62 = vrot.slane %v613_v50, 6  ;;  %v1238_v44 = vsel %vm789_vm2, %v613_v50, -inf  ;;  %v1219_v11 = vmax.f32 %v1217_v49, %v1218_v29  ;;  %v1226_v60 = vmax.f32 %v1224_v38, %v1225_v23  ;;  %v5806_v50 = vpop.f32.mrf.mxu2 }
 0x164   :  { %v1233_v56 = vmax.f32 %v1231_v26, %v1232_v14  ;;  %v1239_v41 = vrot.slane %v1238_v44, 4  ;;  %v1213_v36 = vrot.slane %v1212_v2, 2  ;;  %v1245_v21 = vsel %vm789_vm2, %v693_v1, -inf }
 0x165   :  { %v1252_v20 = vsel %vm789_vm2, %v694_v4, -inf  ;;  %v1259_v34 = vsel %vm789_vm2, %v695_v62, -inf  ;;  %v1220_v58 = vrot.slane %v1219_v11, 2  ;;  %v1227_v45 = vrot.slane %v1226_v60, 2 }
 0x166   :  { %v1234_v51 = vrot.slane %v1233_v56, 2  ;;  %v1240_v6 = vmax.f32 %v1238_v44, %v1239_v41  ;;  %v1214_v49 = vmax.f32 %v1212_v2, %v1213_v36  ;;  %v1246_v38 = vrot.slane %v1245_v21, 4 }
 0x167   :  { %v1253_v26 = vrot.slane %v1252_v20, 4  ;;  %v1260_v29 = vrot.slane %v1259_v34, 4  ;;  %v1221_v23 = vmax.f32 %v1219_v11, %v1220_v58  ;;  %v1228_v14 = vmax.f32 %v1226_v60, %v1227_v45 }
 0x168   :  { %v1235_v1 = vmax.f32 %v1233_v56, %v1234_v51  ;;  %v1241_v17 = vrot.slane %v1240_v6, 2  ;;  %v1215_v4 = vrot.slane %v1214_v49, 1  ;;  %v1247_v12 = vmax.f32 %v1245_v21, %v1246_v38 }
 0x169   :  { %v1254_v62 = vmax.f32 %v1252_v20, %v1253_v26  ;;  %v1261_v46 = vmax.f32 %v1259_v34, %v1260_v29  ;;  %v1222_v15 = vrot.slane %v1221_v23, 1  ;;  %v511_v44 = vadd.f32 %v510_v25, %v5055_v0 }
 0x16a   :  { %v1236_v63 = vrot.slane %v1235_v1, 1  ;;  %v1242_v40 = vmax.f32 %v1240_v6, %v1241_v17  ;;  %v1216_v41 = vmax.f32 %v1214_v49, %v1215_v4  ;;  %v1248_v52 = vrot.slane %v1247_v12, 2  ;;  %v582_v49 = vpop.f32.mrf.mxu3 }
 0x16b   :  { %v1255_v5 = vrot.slane %v1254_v62, 2  ;;  %v373_v36 = vadd.f32 %v5766_v30, %v5045_v59  ;;  %v1223_v2 = vmax.f32 %v1221_v23, %v1222_v15  ;;  %v1229_v58 = vrot.slane %v1228_v14, 1  ;;  %v446_v23 = vpop.f32.mrf.mxu1 }
 0x16c   :  { %v1243_v45 = vrot.slane %v1242_v40, 1  ;;  %v1262_v11 = vrot.slane %v1261_v46, 2  ;;  %v1237_v60 = vmax.f32 %v1235_v1, %v1236_v63  ;;  %v1522_v56 = vmax.f32 %v1216_v41, 0.0  ;;  %v515_v1 = vpop.f32.mrf.mxu2 }
 0x16d   :  { %v1249_v21 = vmax.f32 %v1247_v12, %v1248_v52  ;;  %v1256_v20 = vmax.f32 %v1254_v62, %v1255_v5  ;;  %v1190_v34 = vrot.slane %v5794_v7, 4  ;;  %v7620_v17 = vrot.slane %v5653_v13, 4  ;;  %v377_v12 = vpop.f32.mrf.mxu0 }
 0x16e   :  { %v1244_v51 = vmax.f32 %v1242_v40, %v1243_v45  ;;  %v580_v6 = vadd.f32 %v579_v18, %v511_v44  ;;  %v1185_v30 = vrot.slane %v5789_v28, 2  ;;  %v7622_v15 = vrot.slane %v5653_v13, 6 }
 0x16f   :  { %v5815_v25 = vsel %vm789_vm2, %v7620_v17, -inf  ;;  %v1250_v63 = vrot.slane %v1249_v21, 1  ;;  %v7624_v5 = vrot.slane %v5157_v31, 1  ;;  %v5828_v26 = vmax.f32 %v1228_v14, %v1229_v58 }
 0x170   :  { %7621 = vst [vmem:[#allocation38_spill] sm:$0xff] %v5815_v25  ;;  %v5821_v38 = vsel %vm789_vm2, %v7622_v15, -inf  ;;  %v1523_v29 = vmax.f32 %v1223_v2, 0.0  ;;  %v1257_v40 = vrot.slane %v1256_v20, 1  ;;  %v442_v18 = vadd.f32 %v5771_v27, %v373_v36 }
 0x171   :  { %7623 = vst [vmem:[#allocation39_spill] sm:$0xff] %v5821_v38  ;;  %v5826_v52 = vmax.f32 %v5157_v31, %v7624_v5  ;;  %v1525_v4 = vmax.f32 %v1237_v60, 0.0  ;;  %v5831_v13 = vpack.c.bf16 %v1522_v56, %v1522_v56  ;;  %v5833_v62 = vmax.f32 %v1261_v46, %v1262_v11 }
 0x172   :  { %v1526_v44 = vmax.f32 %v1244_v51, 0.0  ;;  %v5836_v41 = vmax.f32 %v5794_v7, %v1190_v34  ;;  %v5839_v45 = vmax.f32 %v442_v18, %v580_v6  ;;  %v376_v14 = vadd.f32 %v375_v16, %v5045_v59 }
 0x173   :  { %v5843_v2 = vmax.f32 %v5789_v28, %v1185_v30  ;;  %v1251_v27 = vmax.f32 %v1249_v21, %v1250_v63  ;;  %v7626_v36 = vrot.slane %v5379_v10, 1  ;;  %v5852_v11 = vpack.c.bf16 %v1523_v29, %v1523_v29 }
 0x174   :  { %7625 = vst [vmem:[#allocation40_spill] sm:$0xff] %v5836_v41  ;;  %v5854_v60 = vmax.f32 %v1256_v20, %v1257_v40  ;;  %v5857_v16 = vpack.c.bf16 %v1525_v4, %v1525_v4  ;;  %v1602_v34 = vpack.c.bf16 %v1526_v44, %v1526_v44  ;;  %v697_v17 = vrot.slane %v5839_v45, 4  ;;  %v584_v4 = vpop.f32.mrf.mxu3  ;;  %v518_v44 = vpop.f32.mrf.mxu2 }
 0x175   :  { %v5848_v58 = vmax.f32 %v5379_v10, %v7626_v36  ;;  %v696_v10 = vrot.slane %v5839_v45, 2  ;;  %v445_v51 = vadd.f32 %v5804_v61, %v376_v14  ;;  %v514_v6 = vadd.f32 %v5806_v50, %v5055_v0  ;;  %v380_v5 = vpop.f32.mrf.mxu0 }
 0x176   :  { %v1527_v20 = vmax.f32 %v1251_v27, 0.0  ;;  %v5868_v30 = vsel %vm789_vm2, %v5839_v45, -inf  ;;  %v378_v15 = vadd.f32 %v377_v12, %v5045_v59  ;;  %v516_v63 = vadd.f32 %v515_v1, %v5055_v0 }
 0x177   :  { %v583_v18 = vadd.f32 %v582_v49, %v514_v6  ;;  %v381_v61 = vadd.f32 %v380_v5, %v5045_v59  ;;  %v5875_v50 = vunpack.c.l.b16 %v1602_v34  ;;  %v5880_v1 = vsel %vm789_vm2, %v696_v10, -inf  ;;  %v449_v49 = vpop.f32.mrf.mxu1 }
 0x178   :  { %v447_v27 = vadd.f32 %v446_v23, %v378_v15  ;;  %v585_v36 = vadd.f32 %v584_v4, %v516_v63  ;;  %v5883_v31 = vsel %vm789_vm2, %v697_v17, -inf  ;;  %v5885_v6 = vpack.c.bf16 %v1527_v20, %v1527_v20 }
 0x179   :  { %v615_v56 = vmax.f32 %v445_v51, %v583_v18  ;;  %v5887_v46 = vadd.f32 %v449_v49, %v381_v61  ;;  %v519_v34 = vadd.f32 %v518_v44, %v5055_v0 }
 0x17a   :  { %v616_v5 = vmax.f32 %v447_v27, %v585_v36 }
 0x17b   :  { %v699_v29 = vrot.slane %v615_v56, 2  ;;  %v700_v23 = vrot.slane %v615_v56, 4  ;;  %v701_v15 = vrot.slane %v615_v56, 6  ;;  %v1294_v63 = vsel %vm789_vm2, %v615_v56, -inf }
 0x17c   :  { %v1295_v4 = vrot.slane %v1294_v63, 4  ;;  %v702_v10 = vrot.slane %v616_v5, 2  ;;  %v703_v28 = vrot.slane %v616_v5, 4  ;;  %v704_v40 = vrot.slane %v616_v5, 6  ;;  %v587_v9 = vpop.f32.mrf.mxu3 }
 0x17d   :  { %v1301_v17 = vsel %vm789_vm2, %v699_v29, -inf  ;;  %v1308_v51 = vsel %vm789_vm2, %v700_v23, -inf  ;;  %v1315_v20 = vsel %vm789_vm2, %v701_v15, -inf  ;;  %v1322_v18 = vsel %vm789_vm2, %v616_v5, -inf }
 0x17e   :  { %v1296_v61 = vmax.f32 %v1294_v63, %v1295_v4  ;;  %v1302_v27 = vrot.slane %v1301_v17, 4  ;;  %v1309_v44 = vrot.slane %v1308_v51, 4  ;;  %v1316_v36 = vrot.slane %v1315_v20, 4 }
 0x17f   :  { %v1323_v49 = vrot.slane %v1322_v18, 4  ;;  %v1329_v7 = vsel %vm789_vm2, %v702_v10, -inf  ;;  %v1336_v56 = vsel %vm789_vm2, %v703_v28, -inf  ;;  %v1343_v21 = vsel %vm789_vm2, %v704_v40, -inf }
 0x180   :  { %v1297_v14 = vrot.slane %v1296_v61, 2  ;;  %v1303_v12 = vmax.f32 %v1301_v17, %v1302_v27  ;;  %v1310_v29 = vmax.f32 %v1308_v51, %v1309_v44  ;;  %v1317_v38 = vmax.f32 %v1315_v20, %v1316_v36 }
 0x181   :  { %v1324_v23 = vmax.f32 %v1322_v18, %v1323_v49  ;;  %v1330_v25 = vrot.slane %v1329_v7, 4  ;;  %v1337_v15 = vrot.slane %v1336_v56, 4  ;;  %v1344_v41 = vrot.slane %v1343_v21, 4 }
 0x182   :  { %v1298_v5 = vmax.f32 %v1296_v61, %v1297_v14  ;;  %v1304_v63 = vrot.slane %v1303_v12, 2  ;;  %v1311_v4 = vrot.slane %v1310_v29, 2  ;;  %v1318_v47 = vrot.slane %v1317_v38, 2 }
 0x183   :  { %v1325_v37 = vrot.slane %v1324_v23, 2  ;;  %v1331_v43 = vmax.f32 %v1329_v7, %v1330_v25  ;;  %v1338_v35 = vmax.f32 %v1336_v56, %v1337_v15  ;;  %v1345_v10 = vmax.f32 %v1343_v21, %v1344_v41 }
 0x184   :  { %v1299_v22 = vrot.slane %v1298_v5, 1  ;;  %v1305_v28 = vmax.f32 %v1303_v12, %v1304_v63  ;;  %v1312_v53 = vmax.f32 %v1310_v29, %v1311_v4  ;;  %v1319_v40 = vmax.f32 %v1317_v38, %v1318_v47 }
 0x185   :  { %v1326_v17 = vmax.f32 %v1324_v23, %v1325_v37  ;;  %v1332_v51 = vrot.slane %v1331_v43, 2  ;;  %v1339_v20 = vrot.slane %v1338_v35, 2  ;;  %v588_v18 = vadd.f32 %v587_v9, %v519_v34 }
 0x186   :  { %v1300_v27 = vmax.f32 %v1298_v5, %v1299_v22  ;;  %v1306_v44 = vrot.slane %v1305_v28, 1  ;;  %v1313_v36 = vrot.slane %v1312_v53, 1  ;;  %v1320_v14 = vrot.slane %v1319_v40, 1 }
 0x187   :  { %v1327_v61 = vrot.slane %v1326_v17, 1  ;;  %v1333_v49 = vmax.f32 %v1331_v43, %v1332_v51  ;;  %v1340_v8 = vmax.f32 %v1338_v35, %v1339_v20  ;;  %v1346_v42 = vrot.slane %v1345_v10, 2  ;;  %v382_v51 = vpop.f32.mrf.mxu0  ;;  %v5927_v20 = vpop.f32.mrf.mxu2 }
 0x188   :  { %v1307_v25 = vmax.f32 %v1305_v28, %v1306_v44  ;;  %v1314_v7 = vmax.f32 %v1312_v53, %v1313_v36  ;;  %v1321_v41 = vmax.f32 %v1319_v40, %v1320_v14  ;;  %v1534_v21 = vmax.f32 %v1300_v27, 0.0 }
 0x189   :  { %v1274_v12 = vrot.slane %v5880_v1, 4  ;;  %v1328_v47 = vmax.f32 %v1326_v17, %v1327_v61  ;;  %v1334_v38 = vrot.slane %v1333_v49, 1  ;;  %v7627_v37 = vrot.slane %v5636_v33, 1 }
 0x18a   :  { %v7628_v22 = vrot.slane %v5868_v30, 4  ;;  %v7629_v35 = vrot.slane %v5839_v45, 6  ;;  %v7631_v56 = vrot.slane %v5833_v62, 1  ;;  %v1535_v23 = vmax.f32 %v1307_v25, 0.0 }
 0x18b   :  { %v1181_v9 = vmax.f32 %v5636_v33, %v7627_v37  ;;  %v1536_v15 = vmax.f32 %v1314_v7, 0.0  ;;  %v1341_v5 = vrot.slane %v1340_v8, 1  ;;  %v5914_v63 = vmax.f32 %v1345_v10, %v1346_v42  ;;  %v5960_v37 = vpop.f32.mrf.mxu3 }
 0x18c   :  { %v1268_v34 = vmax.f32 %v5868_v30, %v7628_v22  ;;  %v5909_v53 = vsel %vm789_vm2, %v7629_v35, -inf  ;;  %v1265_v29 = vmax.f32 %v5833_v62, %v7631_v56  ;;  %v1537_v33 = vmax.f32 %v1321_v41, 0.0 }
 0x18d   :  { %7630 = vst [vmem:[#allocation41_spill] sm:$0xff] %v5909_v53  ;;  %v5916_v4 = vpack.c.bf16 %v1534_v21, %v1534_v21  ;;  %v5919_v30 = vmax.f32 %v5887_v46, %v588_v18  ;;  %v1516_v45 = vmax.f32 %v5662_v24, 0.0  ;;  %v5923_v28 = vunpack.c.l.b16 %v5885_v6 }
 0x18e   :  { %v5925_v40 = vmax.f32 %v1333_v49, %v1334_v38  ;;  %v1538_v17 = vmax.f32 %v1328_v47, 0.0  ;;  %v1517_v62 = vmax.f32 %v1181_v9, 0.0  ;;  %v1269_v42 = vrot.slane %v1268_v34, 2 }
 0x18f   :  { %7632 = vst [vmem:[#allocation42_spill] sm:$0xff] %v5919_v30  ;;  %v5930_v10 = vmax.f32 %v5880_v1, %v1274_v12  ;;  %v1529_v27 = vmax.f32 %v1265_v29, 0.0  ;;  %v7633_v46 = vmax.f32 %v5828_v26, 0.0  ;;  %v5935_v24 = vpack.c.bf16 %v1535_v23, %v1535_v23 }
 0x190   :  { %v5937_v6 = vpack.c.bf16 %v1536_v15, %v1536_v15  ;;  %v5939_v44 = vmax.f32 %v1340_v8, %v1341_v5  ;;  %v5942_v14 = vpack.c.bf16 %v1537_v33, %v1537_v33  ;;  %v5947_v1 = vsel %vm789_vm2, %v5919_v30, -inf }
 0x191   :  { %v1600_v18 = vpack.c.bf16 %v7633_v46, %v7633_v46  ;;  %v1596_v49 = vpack.c.bf16 %v1516_v45, %v1516_v45  ;;  %v5950_v25 = vpack.c.bf16 %v1538_v17, %v1538_v17  ;;  %v705_v7 = vrot.slane %v5919_v30, 2 }
 0x192   :  { %v1597_v41 = vpack.c.bf16 %v1517_v62, %v1517_v62  ;;  %v7634_v21 = vmax.f32 %v5854_v60, 0.0  ;;  %v1605_v47 = vpack.c.bf16 %v1529_v27, %v1529_v27  ;;  %v5958_v38 = vunpack.c.l.b16 %v5660_v3 }
 0x193   :  { %v1351_v22 = vrot.slane %v5947_v1, 4  ;;  %v5965_v35 = vunpack.c.l.b16 %v5780_v48  ;;  %v5967_v56 = vunpack.c.l.b16 %v1596_v49  ;;  %v5971_v60 = vunpack.c.l.b16 %v1600_v18  ;;  %v451_v18 = vpop.f32.mrf.mxu1 }
 0x194   :  { %v1604_v12 = vpack.c.bf16 %v7634_v21, %v7634_v21  ;;  %7635 = vst [vmem:[#allocation43_spill] sm:$0xff] %v5958_v38  ;;  %v5969_v29 = vunpack.c.l.b16 %v1597_v41  ;;  %v5974_v23 = vunpack.c.l.b16 %v5857_v16  ;;  %v5978_v15 = vunpack.c.l.b16 %v1605_v47  ;;  %v385_v47 = vpop.f32.mrf.mxu0 }
 0x195   :  { %7637 = vst [vmem:[#allocation45_spill] sm:$0xff] %v5971_v60  ;;  %v7640_v5 = vunpack.c.l.b16 %v5641_v57  ;;  %v7641_v33 = vunpack.c.l.b16 %v5655_v32  ;;  %v7642_v45 = vunpack.c.l.b16 %v5831_v13  ;;  %v7643_v17 = vunpack.c.l.b16 %v5852_v11 }
 0x196   :  { %7636 = vst [vmem:[#allocation44_spill] sm:$0xff] %v5969_v29  ;;  %v5976_v3 = vunpack.c.l.b16 %v1604_v12  ;;  %v383_v27 = vadd.f32 %v382_v51, %v5045_v59  ;;  %v1187_v57 = vrot.slane %v5843_v2, 1  ;;  %v1270_v49 = vmax.f32 %v1268_v34, %v1269_v42 }
 0x197   :  { %7639 = vst [vmem:[#allocation47_spill] sm:$0xff] %v5978_v15  ;;  %v2044_v48 = vsel %vm1791_vm3, %v7641_v33, %v7640_v5  ;;  %v2051_v62 = vsel %vm1791_vm3, %v7643_v17, %v7642_v45  ;;  %v7644_v12 = vmov %v7641_v33  ;;  %v523_v5 = vpop.f32.mrf.mxu2 }
 0x198   :  { %7638 = vst [vmem:[#allocation46_spill] sm:$0xff] %v5976_v3  ;;  %v2045_v16 = vsel %vm1793_vm4, %v5958_v38, %v2044_v48  ;;  %v2052_v46 = vsel %vm1793_vm4, %v5971_v60, %v2051_v62  ;;  %v452_v21 = vadd.f32 %v451_v18, %v383_v27  ;;  %v1826_v51 = vsel %vm1791_vm3, %v5958_v38, %v7644_v12 }
 0x199   :  { %v2046_v41 = vsel %vm1795_vm5, %v5677_v55, %v2045_v16  ;;  %v2053_v13 = vsel %vm1795_vm5, %v5974_v23, %v2052_v46  ;;  %v1188_v42 = vmax.f32 %v5843_v2, %v1187_v57  ;;  %v1271_v48 = vrot.slane %v1270_v49, 1  ;;  %v4627_v57 = vld [vmem:[%s7447_s3 + $0x174] sm:$0xf] }
 0x19a   :  { %v2047_v33 = vsel %vm1797_vm6, %v5783_v54, %v2046_v41  ;;  %v2054_v34 = vsel %vm1797_vm6, %v5875_v50, %v2053_v13  ;;  %v1827_v17 = vsel %vm1793_vm4, %v5677_v55, %v1826_v51  ;;  %v7645_v62 = vunpack.c.l.b16 %v5852_v11  ;;  %v4248_v41 = vld [vmem:[%s7447_s3 + $0x178] sm:$0xf0] }
 0x19b   :  { %v2048_v45 = vsel %vm1799_vm7, %v5965_v35, %v2047_v33  ;;  %v2055_v32 = vsel %vm1799_vm7, %v5923_v28, %v2054_v34  ;;  %v1272_v46 = vmax.f32 %v1270_v49, %v1271_v48  ;;  %v1518_v18 = vmax.f32 %v1188_v42, 0.0  ;;  %v592_v48 = vpop.f32.mrf.mxu3 }
 0x19c   :  { %v1833_v27 = vsel %vm1791_vm3, %v5971_v60, %v7645_v62  ;;  %v2049_v16 = vsel %vm1801_vm8, %v5967_v56, %v2048_v45  ;;  %v2056_v2 = vsel %vm1801_vm8, %v5976_v3, %v2055_v32  ;;  %v1828_v12 = vsel %vm1795_vm5, %v5783_v54, %v1827_v17  ;;  %v4246_v45 = vld [vmem:[%s7447_s3 + $0x170] sm:$0xf]  ;;  %v4628_v32 = vld [vmem:[%s7447_s3 + $0x174] sm:$0xf0]  ;;  %v387_v9 = vpop.f32.mrf.mxu0 }
 0x19d   :  { %v2050_v11 = vsel %vm1803_vm9, %v5969_v29, %v2049_v16  ;;  %v2057_v13 = vsel %vm1803_vm9, %v5978_v15, %v2056_v2  ;;  %v1834_v49 = vsel %vm1793_vm4, %v5974_v23, %v1833_v27  ;;  %v1530_v33 = vmax.f32 %v1272_v46, 0.0  ;;  %v4625_v2 = vld [vmem:[%s7447_s3 + $0x164] sm:$0xf]  ;;  %v4240_v46 = vld [vmem:[%s7447_s3 + $0x168] sm:$0xf0] }
 0x19e   :  { %v2074_v51 = vpack.c.b16 %v2057_v13, %v2050_v11  ;;  %v1642_v34 = vpack.c.bf16 %v1518_v18, %v1518_v18  ;;  %v1829_v42 = vsel %vm1797_vm6, %v5965_v35, %v1828_v12  ;;  %v1835_v62 = vsel %vm1795_vm5, %v5875_v50, %v1834_v49 }
 0x19f   :  { %v1830_v17 = vsel %vm1799_vm7, %v5967_v56, %v1829_v42  ;;  %v4251_v27 = vor.u32 %v4627_v57, %v4248_v41  ;;  %v521_v16 = vadd.f32 %v5927_v20, %v5055_v0  ;;  %v1643_v18 = vpack.c.bf16 %v1530_v33, %v1530_v33  ;;  %v4238_v20 = vld [vmem:[%s7447_s3 + $0x160] sm:$0xf]  ;;  %v4626_v33 = vld [vmem:[%s7447_s3 + $0x164] sm:$0xf0]  ;;  %v4232_v42 = vld [vmem:[%s7447_s3 + $0x158] sm:$0xf0] }
 0x1a0   :  { %2178 = vmatmul.bf16.gmra.mxu0 %v2074_v51  ;;  %2207 = vmatmul.bf16.gmra.mxu2 %v2074_v51  ;;  %v6057_v11 = vunpack.c.l.b16 %v1642_v34  ;;  %v1831_v13 = vsel %vm1801_vm8, %v5969_v29, %v1830_v17  ;;  %v1836_v57 = vsel %vm1797_vm6, %v5923_v28, %v1835_v62  ;;  %v386_v49 = vadd.f32 %v385_v47, %v5045_v59  ;;  %v4623_v34 = vld [vmem:[%s7447_s3 + $0x154] sm:$0xf]  ;;  %v525_v17 = vpop.f32.mrf.mxu2 }
 0x1a1   :  { %v1837_v41 = vsel %vm1799_vm7, %v5976_v3, %v1836_v57  ;;  %2432 = vmatpush.bf16.msra.mxu3 %v4251_v27  ;;  %v590_v12 = vadd.f32 %v5960_v37, %v521_v16  ;;  %v4247_v51 = vor.u32 %v4628_v32, %v4246_v45  ;;  %v6082_v37 = vsel %vm789_vm2, %v705_v7, -inf  ;;  %v454_v32 = vpop.f32.mrf.mxu1 }
 0x1a2   :  { %7646 = vst [vmem:[#allocation48_spill] sm:$0xff] %v6057_v11  ;;  %v6084_v47 = vunpack.c.l.b16 %v1643_v18  ;;  %v1832_v45 = vsel %vm1803_vm9, %v6057_v11, %v1831_v13  ;;  %v4243_v62 = vor.u32 %v4625_v2, %v4240_v46  ;;  %v1838_v27 = vsel %vm1801_vm8, %v5978_v15, %v1837_v41  ;;  %v4230_v2 = vld [vmem:[%s7447_s3 + $0x150] sm:$0xf] }
 0x1a3   :  { %v618_v16 = vmax.f32 %v452_v21, %v590_v12  ;;  %v455_v57 = vadd.f32 %v454_v32, %v386_v49  ;;  %2403 = vmatpush.bf16.msra.mxu1 %v4247_v51  ;;  %v524_v43 = vadd.f32 %v523_v5, %v5055_v0  ;;  %v4239_v61 = vor.u32 %v4626_v33, %v4238_v20  ;;  %v4624_v5 = vld [vmem:[%s7447_s3 + $0x154] sm:$0xf0]  ;;  %v4621_v51 = vld [vmem:[%s7447_s3 + $0x144] sm:$0xf]  ;;  %v4224_v33 = vld [vmem:[%s7447_s3 + $0x148] sm:$0xf0] }
 0x1a4   :  { %7647 = vst [vmem:[#allocation49_spill] sm:$0xff] %v6084_v47  ;;  %v1839_v7 = vsel %vm1803_vm9, %v6084_v47, %v1838_v27  ;;  %v4235_v18 = vor.u32 %v4623_v34, %v4232_v42  ;;  %v526_v36 = vadd.f32 %v525_v17, %v5055_v0  ;;  %v6103_v20 = vmax.f32 %v5947_v1, %v1351_v22  ;;  %v594_v17 = vpop.f32.mrf.mxu3  ;;  %v6240_v47 = vld [vmem:[%s7447_s3 + $0x1c4] sm:$0xf] }
 0x1a5   :  { %v1856_v46 = vpack.c.b16 %v1839_v7, %v1832_v45  ;;  %v708_v13 = vrot.slane %v618_v16, 2  ;;  %v709_v41 = vrot.slane %v618_v16, 4  ;;  %v710_v21 = vrot.slane %v618_v16, 6  ;;  %2433 = vmatpush.bf16.msra.mxu3 %v4243_v62 }
 0x1a6   :  { %v1378_v0 = vsel %vm789_vm2, %v618_v16, -inf  ;;  %v593_v12 = vadd.f32 %v592_v48, %v524_v43  ;;  %v6107_v49 = vadd.f32 %v387_v9, %v5045_v59  ;;  %v595_v32 = vadd.f32 %v594_v17, %v526_v36 }
 0x1a7   :  { %1960 = vmatmul.bf16.gmra.mxu1 %v1856_v46  ;;  %1989 = vmatmul.bf16.gmra.mxu3 %v1856_v46  ;;  %v1379_v34 = vrot.slane %v1378_v0, 4  ;;  %v1385_v1 = vsel %vm789_vm2, %v708_v13, -inf  ;;  %v1392_v22 = vsel %vm789_vm2, %v709_v41, -inf  ;;  %v1399_v43 = vsel %vm789_vm2, %v710_v21, -inf }
 0x1a8   :  { %v1386_v48 = vrot.slane %v1385_v1, 4  ;;  %v1393_v59 = vrot.slane %v1392_v22, 4  ;;  %v1400_v9 = vrot.slane %v1399_v43, 4  ;;  %v619_v42 = vmax.f32 %v455_v57, %v593_v12  ;;  %2404 = vmatpush.bf16.msra.mxu1 %v4239_v61 }
 0x1a9   :  { %v1380_v45 = vmax.f32 %v1378_v0, %v1379_v34  ;;  %2434 = vmatpush.bf16.msra.mxu3 %v4235_v18  ;;  %v4231_v62 = vor.u32 %v4624_v5, %v4230_v2  ;;  %v4227_v27 = vor.u32 %v4621_v51, %v4224_v33 }
 0x1aa   :  { %v1387_v16 = vmax.f32 %v1385_v1, %v1386_v48  ;;  %v1394_v7 = vmax.f32 %v1392_v22, %v1393_v59  ;;  %v1401_v46 = vmax.f32 %v1399_v43, %v1400_v9  ;;  %v711_v26 = vrot.slane %v619_v42, 2 }
 0x1ab   :  { %v1381_v13 = vrot.slane %v1380_v45, 2  ;;  %v712_v8 = vrot.slane %v619_v42, 4  ;;  %v713_v41 = vrot.slane %v619_v42, 6  ;;  %v1406_v21 = vsel %vm789_vm2, %v619_v42, -inf }
 0x1ac   :  { %v1388_v53 = vrot.slane %v1387_v16, 2  ;;  %v1395_v60 = vrot.slane %v1394_v7, 2  ;;  %v1402_v38 = vrot.slane %v1401_v46, 2  ;;  %v1407_v57 = vrot.slane %v1406_v21, 4  ;;  %2405 = vmatpush.bf16.msra.mxu1 %v4231_v62 }
 0x1ad   :  { %v1382_v61 = vmax.f32 %v1380_v45, %v1381_v13  ;;  %v1413_v18 = vsel %vm789_vm2, %v711_v26, -inf  ;;  %v1420_v36 = vsel %vm789_vm2, %v712_v8, -inf  ;;  %v1427_v2 = vsel %vm789_vm2, %v713_v41, -inf  ;;  %2435 = vmatpush.bf16.msra.mxu3 %v4227_v27 }
 0x1ae   :  { %v1389_v5 = vmax.f32 %v1387_v16, %v1388_v53  ;;  %v1396_v0 = vmax.f32 %v1394_v7, %v1395_v60  ;;  %v1403_v12 = vmax.f32 %v1401_v46, %v1402_v38  ;;  %v1408_v51 = vmax.f32 %v1406_v21, %v1407_v57  ;;  %v456_v46 = vpop.f32.mrf.mxu1 }
 0x1af   :  { %v1383_v33 = vrot.slane %v1382_v61, 1  ;;  %v1414_v34 = vrot.slane %v1413_v18, 4  ;;  %v1421_v1 = vrot.slane %v1420_v36, 4  ;;  %v1428_v22 = vrot.slane %v1427_v2, 4 }
 0x1b0   :  { %v1390_v43 = vrot.slane %v1389_v5, 1  ;;  %v1397_v48 = vrot.slane %v1396_v0, 1  ;;  %v1404_v59 = vrot.slane %v1403_v12, 1  ;;  %v1409_v9 = vrot.slane %v1408_v51, 2 }
 0x1b1   :  { %v1384_v42 = vmax.f32 %v1382_v61, %v1383_v33  ;;  %v1415_v17 = vmax.f32 %v1413_v18, %v1414_v34  ;;  %v1422_v26 = vmax.f32 %v1420_v36, %v1421_v1  ;;  %v1429_v45 = vmax.f32 %v1427_v2, %v1428_v22 }
 0x1b2   :  { %v1391_v8 = vmax.f32 %v1389_v5, %v1390_v43  ;;  %v1398_v62 = vmax.f32 %v1396_v0, %v1397_v48  ;;  %v1405_v13 = vmax.f32 %v1403_v12, %v1404_v59  ;;  %v1410_v27 = vmax.f32 %v1408_v51, %v1409_v9  ;;  %v6217_v48 = vld [vmem:[%s7447_s3 + $0x1d4] sm:$0xf] }
 0x1b3   :  { %v1358_v53 = vrot.slane %v6082_v37, 4  ;;  %v7648_v38 = vrot.slane %v5919_v30, 4  ;;  %v1416_v16 = vrot.slane %v1415_v17, 2  ;;  %v1423_v7 = vrot.slane %v1422_v26, 2  ;;  %v4617_v30 = vld [vmem:[%s7447_s3 + $0x124] sm:$0xf] }
 0x1b4   :  { %v1546_v41 = vmax.f32 %v1384_v42, 0.0  ;;  %v1411_v21 = vrot.slane %v1410_v27, 1  ;;  %v1430_v57 = vrot.slane %v1429_v45, 2  ;;  %v457_v61 = vadd.f32 %v456_v46, %v6107_v49 }
 0x1b5   :  { %v6126_v60 = vsel %vm789_vm2, %v7648_v38, -inf  ;;  %v1547_v18 = vmax.f32 %v1391_v8, 0.0  ;;  %v1549_v36 = vmax.f32 %v1405_v13, 0.0  ;;  %v1417_v2 = vmax.f32 %v1415_v17, %v1416_v16  ;;  %v4222_v13 = vld [vmem:[%s7447_s3 + $0x140] sm:$0xf] }
 0x1b6   :  { %7649 = vst [vmem:[#allocation50_spill] sm:$0xff] %v6126_v60  ;;  %v1424_v5 = vmax.f32 %v1422_v26, %v1423_v7  ;;  %v1353_v0 = vrot.slane %v6103_v20, 2  ;;  %v1548_v12 = vmax.f32 %v1398_v62, 0.0  ;;  %v1412_v51 = vmax.f32 %v1410_v27, %v1411_v21  ;;  %v4328_v62 = vld [vmem:[%s7447_s3 + $0x1f8] sm:$0xf0] }
 0x1b7   :  { %v6130_v33 = vmax.f32 %v457_v61, %v595_v32  ;;  %v6133_v34 = vunpack.c.l.b16 %v5942_v14  ;;  %v7651_v1 = vmax.f32 %v5925_v40, 0.0  ;;  %v1418_v43 = vrot.slane %v1417_v2, 1  ;;  %v4326_v32 = vld [vmem:[%s7447_s3 + $0x1f0] sm:$0xf]  ;;  %v4644_v40 = vld [vmem:[%s7447_s3 + $0x1f4] sm:$0xf0] }
 0x1b8   :  { %v1425_v49 = vrot.slane %v1424_v5, 1  ;;  %v6141_v59 = vpack.c.bf16 %v1546_v41, %v1546_v41  ;;  %v6143_v9 = vmax.f32 %v1429_v45, %v1430_v57  ;;  %v1550_v42 = vmax.f32 %v1412_v51, 0.0  ;;  %v4643_v45 = vld [vmem:[%s7447_s3 + $0x1f4] sm:$0xf]  ;;  %v4216_v38 = vld [vmem:[%s7447_s3 + $0x138] sm:$0xf0] }
 0x1b9   :  { %7650 = vst [vmem:[#allocation51_spill] sm:$0xff] %v6130_v33  ;;  %v6138_v22 = vpack.c.bf16 %v7651_v1, %v7651_v1  ;;  %v6152_v14 = vunpack.c.l.b16 %v5950_v25  ;;  %v6154_v17 = vpack.c.bf16 %v1547_v18, %v1547_v18  ;;  %v1617_v26 = vpack.c.bf16 %v1549_v36, %v1549_v36  ;;  %v4622_v25 = vld [vmem:[%s7447_s3 + $0x144] sm:$0xf0]  ;;  %v4619_v27 = vld [vmem:[%s7447_s3 + $0x134] sm:$0xf] }
 0x1ba   :  { %v1419_v8 = vmax.f32 %v1417_v2, %v1418_v43  ;;  %v6175_v16 = vmax.f32 %v6103_v20, %v1353_v0  ;;  %v6178_v7 = vmax.f32 %v6082_v37, %v1358_v53  ;;  %v6180_v46 = vpack.c.bf16 %v1548_v12, %v1548_v12  ;;  %v4318_v21 = vld [vmem:[%s7447_s3 + $0x1e0] sm:$0xf]  ;;  %v4642_v57 = vld [vmem:[%s7447_s3 + $0x1e4] sm:$0xf0]  ;;  %v4641_v37 = vld [vmem:[%s7447_s3 + $0x1e4] sm:$0xf] }
 0x1bb   :  { %v1434_v41 = vsel %vm789_vm2, %v6130_v33, -inf  ;;  %v1426_v61 = vmax.f32 %v1424_v5, %v1425_v49  ;;  %v714_v20 = vrot.slane %v6130_v33, 2  ;;  %v4320_v53 = vld [vmem:[%s7447_s3 + $0x1e8] sm:$0xf0]  ;;  %v1432_v0 = vrot.slane %v6143_v9, 1 }
 0x1bc   :  { %7652 = vst [vmem:[#allocation52_spill] sm:$0xff] %v6178_v7  ;;  %v1551_v18 = vmax.f32 %v1419_v8, 0.0  ;;  %v1435_v36 = vrot.slane %v1434_v41, 4  ;;  %v1618_v12 = vpack.c.bf16 %v1550_v42, %v1550_v42  ;;  %v4327_v51 = vor.u32 %v4644_v40, %v4326_v32  ;;  %v4310_v5 = vld [vmem:[%s7447_s3 + $0x1d0] sm:$0xf] }
 0x1bd   :  { %v4640_v1 = vld [vmem:[%s7447_s3 + $0x1d4] sm:$0xf0]  ;;  %v4214_v43 = vld [vmem:[%s7447_s3 + $0x130] sm:$0xf]  ;;  %v6212_v42 = vunpack.c.l.b16 %v1617_v26  ;;  %v4312_v2 = vld [vmem:[%s7447_s3 + $0x1d8] sm:$0xf0]  ;;  %v4223_v8 = vor.u32 %v4622_v25, %v4222_v13  ;;  %v4219_v60 = vor.u32 %v4619_v27, %v4216_v38  ;;  %v4319_v29 = vor.u32 %v4642_v57, %v4318_v21 }
 0x1be   :  { %v4620_v49 = vld [vmem:[%s7447_s3 + $0x134] sm:$0xf0]  ;;  %v1619_v32 = vpack.c.bf16 %v1551_v18, %v1551_v18  ;;  %v1436_v40 = vmax.f32 %v1434_v41, %v1435_v36  ;;  %v4208_v26 = vld [vmem:[%s7447_s3 + $0x128] sm:$0xf0]  ;;  %v6231_v41 = vld [vmem:[%s7447_s3 + $0x1c0] sm:$0xf]  ;;  %2662 = vmatpush.bf16.msra.mxu0 %v4327_v51  ;;  %v4331_v36 = vor.u32 %v4643_v45, %v4328_v62  ;;  %v6250_v62 = vunpack.c.l.b16 %v1618_v12 }
 0x1bf   :  { %v4638_v7 = vld [vmem:[%s7447_s3 + $0x1c4] sm:$0xf0]  ;;  %v1552_v15 = vmax.f32 %v1426_v61, 0.0  ;;  %v6243_v3 = vsel %vm789_vm2, %v714_v20, -inf  ;;  %v6248_v45 = vld [vmem:[%s7447_s3 + $0x1c8] sm:$0xf0]  ;;  %2406 = vmatpush.bf16.msra.mxu1 %v4223_v8  ;;  %v4323_v25 = vor.u32 %v4641_v37, %v4320_v53  ;;  %2436 = vmatpush.bf16.msra.mxu3 %v4219_v60  ;;  %v4311_v61 = vor.u32 %v4640_v1, %v4310_v5 }
 0x1c0   :  { %v1437_v11 = vrot.slane %v1436_v40, 2  ;;  %v6252_v13 = vunpack.c.l.b16 %v1619_v32  ;;  %2691 = vmatpush.bf16.msra.mxu2 %v4331_v36  ;;  %v1540_v27 = vmax.f32 %v5939_v44, 0.0  ;;  %v4215_v20 = vor.u32 %v4620_v49, %v4214_v43  ;;  %v4206_v5 = vld [vmem:[%s7447_s3 + $0x120] sm:$0xf]  ;;  %v4618_v1 = vld [vmem:[%s7447_s3 + $0x124] sm:$0xf0] }
 0x1c1   :  { %v4211_v21 = vor.u32 %v4617_v30, %v4208_v26  ;;  %v4315_v57 = vor.u32 %v6217_v48, %v4312_v2  ;;  %v4303_v51 = vor.u32 %v4638_v7, %v6231_v41  ;;  %v4307_v12 = vor.u32 %v6240_v47, %v6248_v45  ;;  %v6271_v30 = vld [vmem:[%s7447_s3 + $0x1b0] sm:$0xf]  ;;  %v6292_v7 = vld [vmem:[%s7447_s3 + $0x1b4] sm:$0xf]  ;;  %v6297_v2 = vld [vmem:[%s7447_s3 + $0x1b8] sm:$0xf0] }
 0x1c2   :  { %v6255_v38 = vmax.f32 %v1436_v40, %v1437_v11  ;;  %2663 = vmatpush.bf16.msra.mxu0 %v4319_v29  ;;  %v7653_v32 = vrot.slane %v5914_v63, 1  ;;  %v1433_v44 = vmax.f32 %v6143_v9, %v1432_v0  ;;  %v1612_v11 = vpack.c.bf16 %v1540_v27, %v1540_v27  ;;  %v6276_v29 = vld [vmem:[%s7447_s3 + $0x1b4] sm:$0xf0] }
 0x1c3   :  { %v1620_v53 = vpack.c.bf16 %v1552_v15, %v1552_v15  ;;  %v6266_v60 = vunpack.c.l.b16 %v5937_v6  ;;  %2407 = vmatpush.bf16.msra.mxu1 %v4215_v20  ;;  %v6279_v47 = vunpack.c.l.b16 %v6138_v22  ;;  %v6282_v15 = vunpack.c.l.b16 %v6180_v46  ;;  %2437 = vmatpush.bf16.msra.mxu3 %v4211_v21 }
 0x1c4   :  { %v1349_v37 = vmax.f32 %v5914_v63, %v7653_v32  ;;  %2692 = vmatpush.bf16.msra.mxu2 %v4323_v25  ;;  %v7654_v6 = vunpack.c.l.b16 %v5916_v4  ;;  %v7655_v48 = vunpack.c.l.b16 %v5935_v24  ;;  %v1553_v22 = vmax.f32 %v1433_v44, 0.0 }
 0x1c5   :  { %v6299_v46 = vunpack.c.l.b16 %v1612_v11  ;;  %v6301_v0 = vunpack.c.l.b16 %v1620_v53  ;;  %v7656_v8 = vunpack.c.l.b16 %v6141_v59  ;;  %v7657_v40 = vunpack.c.l.b16 %v6154_v17 }
 0x1c6   :  { %v1541_v63 = vmax.f32 %v1349_v37, 0.0  ;;  %v2058_v9 = vsel %vm1791_vm3, %v7655_v48, %v7654_v6  ;;  %2664 = vmatpush.bf16.msra.mxu0 %v4311_v61  ;;  %v4295_v41 = vor.u32 %v6276_v29, %v6271_v30  ;;  %v1621_v36 = vpack.c.bf16 %v1553_v22, %v1553_v22  ;;  %v4615_v6 = vld [vmem:[%s7447_s3 + $0x114] sm:$0xf]  ;;  %v4286_v22 = vld [vmem:[%s7447_s3 + $0x1a0] sm:$0xf] }
 0x1c7   :  { %v2059_v4 = vsel %vm1793_vm4, %v6266_v60, %v2058_v9  ;;  %v2065_v26 = vsel %vm1791_vm3, %v7657_v40, %v7656_v8  ;;  %v4299_v27 = vor.u32 %v6292_v7, %v6297_v2  ;;  %v4207_v21 = vor.u32 %v4618_v1, %v4206_v5  ;;  %v4200_v2 = vld [vmem:[%s7447_s3 + $0x118] sm:$0xf0]  ;;  %v6391_v8 = vld [vmem:[%s7447_s3 + $0x194] sm:$0xf] }
 0x1c8   :  { %v1613_v43 = vpack.c.bf16 %v1541_v63, %v1541_v63  ;;  %v2060_v49 = vsel %vm1795_vm5, %v6133_v34, %v2059_v4  ;;  %v2066_v25 = vsel %vm1793_vm4, %v6282_v15, %v2065_v26  ;;  %2693 = vmatpush.bf16.msra.mxu2 %v4315_v57  ;;  %v6332_v32 = vunpack.c.l.b16 %v1621_v36 }
 0x1c9   :  { %v2061_v45 = vsel %vm1797_vm6, %v6152_v14, %v2060_v49  ;;  %v2067_v20 = vsel %vm1795_vm5, %v6212_v42, %v2066_v25  ;;  %v1355_v11 = vrot.slane %v6175_v16, 1  ;;  %2408 = vmatpush.bf16.msra.mxu1 %v4207_v21  ;;  %v1439_v30 = vrot.slane %v6255_v38, 1  ;;  %v4288_v49 = vld [vmem:[%s7447_s3 + $0x1a8] sm:$0xf0]  ;;  %v4280_v25 = vld [vmem:[%s7447_s3 + $0x198] sm:$0xf0] }
 0x1ca   :  { %v6326_v61 = vunpack.c.l.b16 %v1613_v43  ;;  %v2062_v59 = vsel %vm1799_vm7, %v6279_v47, %v2061_v45  ;;  %v2068_v44 = vsel %vm1797_vm6, %v6250_v62, %v2067_v20  ;;  %2665 = vmatpush.bf16.msra.mxu0 %v4303_v51  ;;  %v7658_v29 = vmov %v7655_v48  ;;  %v4633_v43 = vld [vmem:[%s7447_s3 + $0x1a4] sm:$0xf] }
 0x1cb   :  { %v2063_v37 = vsel %vm1801_vm8, %v6299_v46, %v2062_v59  ;;  %v2069_v53 = vsel %vm1799_vm7, %v6252_v13, %v2068_v44  ;;  %v1840_v63 = vsel %vm1791_vm3, %v6266_v60, %v7658_v29  ;;  %v1356_v48 = vmax.f32 %v6175_v16, %v1355_v11  ;;  %v4634_v16 = vld [vmem:[%s7447_s3 + $0x1a4] sm:$0xf0]  ;;  %v4198_v59 = vld [vmem:[%s7447_s3 + $0x110] sm:$0xf]  ;;  %v4616_v11 = vld [vmem:[%s7447_s3 + $0x114] sm:$0xf0] }
 0x1cc   :  { %v2064_v57 = vsel %vm1803_vm9, %v6326_v61, %v2063_v37  ;;  %v2070_v51 = vsel %vm1801_vm8, %v6301_v0, %v2069_v53  ;;  %v1841_v9 = vsel %vm1793_vm4, %v6133_v34, %v1840_v63  ;;  %v7659_v7 = vmov %v7657_v40  ;;  %2694 = vmatpush.bf16.msra.mxu2 %v4307_v12  ;;  %v4278_v12 = vld [vmem:[%s7447_s3 + $0x190] sm:$0xf]  ;;  %v4192_v29 = vld [vmem:[%s7447_s3 + $0x108] sm:$0xf0]  ;;  %v4270_v63 = vld [vmem:[%s7447_s3 + $0x180] sm:$0xf] }
 0x1cd   :  { %v1847_v24 = vsel %vm1791_vm3, %v6282_v15, %v7659_v7  ;;  %v2071_v4 = vsel %vm1803_vm9, %v6332_v32, %v2070_v51  ;;  %v1440_v17 = vmax.f32 %v6255_v38, %v1439_v30  ;;  %v1842_v5 = vsel %vm1795_vm5, %v6152_v14, %v1841_v9  ;;  %v4632_v38 = vld [vmem:[%s7447_s3 + $0x194] sm:$0xf0]  ;;  %v6431_v7 = vld [vmem:[%s7447_s3 + $0x184] sm:$0xf] }
 0x1ce   :  { %v1848_v1 = vsel %vm1793_vm4, %v6212_v42, %v1847_v24  ;;  %v2075_v40 = vpack.c.b16 %v2071_v4, %v2064_v57  ;;  %v1542_v26 = vmax.f32 %v1356_v48, 0.0  ;;  %v1843_v36 = vsel %vm1797_vm6, %v6279_v47, %v1842_v5  ;;  %2666 = vmatpush.bf16.msra.mxu0 %v4295_v41  ;;  %v4613_v57 = vld [vmem:[%s7447_s3 + $0x104] sm:$0xf]  ;;  %v6436_v24 = vld [vmem:[%s7447_s3 + $0x188] sm:$0xf0] }
 0x1cf   :  { %v1849_v45 = vsel %vm1795_vm5, %v6250_v62, %v1848_v1  ;;  %v1554_v20 = vmax.f32 %v1440_v17, 0.0  ;;  %v1844_v21 = vsel %vm1799_vm7, %v6299_v46, %v1843_v36  ;;  %v4203_v44 = vor.u32 %v4615_v6, %v4200_v2  ;;  %v4630_v6 = vld [vmem:[%s7447_s3 + $0x184] sm:$0xf0] }
 0x1d0   :  { %v1850_v37 = vsel %vm1797_vm6, %v6252_v13, %v1849_v45  ;;  %2183 = vmatmul.bf16.gmra.mxu0 %v2075_v40  ;;  %2212 = vmatmul.bf16.gmra.mxu2 %v2075_v40  ;;  %v1644_v53 = vpack.c.bf16 %v1542_v26, %v1542_v26  ;;  %v1845_v41 = vsel %vm1801_vm8, %v6326_v61, %v1844_v21  ;;  %v1484_v2 = vmax.f32 %v5848_v58, 0.0 }
 0x1d1   :  { %v1851_v30 = vsel %vm1799_vm7, %v6301_v0, %v1850_v37  ;;  %2695 = vmatpush.bf16.msra.mxu2 %v4299_v27  ;;  %v1645_v51 = vpack.c.bf16 %v1554_v20, %v1554_v20  ;;  %2438 = vmatpush.bf16.msra.mxu3 %v4203_v44  ;;  %v4287_v9 = vor.u32 %v4634_v16, %v4286_v22  ;;  %v7660_v58 = vmax.f32 %v5216_v39, 0.0  ;;  %v4190_v39 = vld [vmem:[%s7447_s3 + $0x100] sm:$0xf]  ;;  %v7668_v44 = vld [vmem:[#allocation4_spill] sm:$0xff] }
 0x1d2   :  { %v1852_v48 = vsel %vm1801_vm8, %v6332_v32, %v1851_v30  ;;  %v6439_v4 = vunpack.c.l.b16 %v1644_v53  ;;  %v4291_v27 = vor.u32 %v4633_v43, %v4288_v49  ;;  %v4279_v17 = vor.u32 %v4632_v38, %v4278_v12 }
 0x1d3   :  { %v4283_v5 = vor.u32 %v6391_v8, %v4280_v25  ;;  %v6442_v1 = vunpack.c.l.b16 %v1645_v51  ;;  %2667 = vmatpush.bf16.msra.mxu0 %v4287_v9  ;;  %v4199_v22 = vor.u32 %v4616_v11, %v4198_v59  ;;  %v4195_v16 = vor.u32 %v4613_v57, %v4192_v29  ;;  %v7665_v59 = vld [vmem:[#allocation22_spill] sm:$0xff]  ;;  %v7669_v57 = vld [vmem:[#allocation27_spill] sm:$0xff]  ;;  %v7671_v29 = vld [vmem:[#allocation5_spill] sm:$0xff] }
 0x1d4   :  { %v4271_v40 = vor.u32 %v4630_v6, %v4270_v63  ;;  %v1846_v26 = vsel %vm1803_vm9, %v6439_v4, %v1845_v41  ;;  %v4275_v36 = vor.u32 %v6431_v7, %v6436_v24  ;;  %v2218_v45 = vpack.c.bf16 %v7660_v58, %v7660_v58  ;;  %v7672_v6 = vld [vmem:[#allocation9_spill] sm:$0xff]  ;;  %v7673_v51 = vld [vmem:[#allocation10_spill] sm:$0xff]  ;;  %v7674_v7 = vld [vmem:[#allocation7_spill] sm:$0xff] }
 0x1d5   :  { %v7661_v43 = vmax.f32 %v5398_v19, 0.0  ;;  %v1853_v12 = vsel %vm1803_vm9, %v6442_v1, %v1852_v48  ;;  %2696 = vmatpush.bf16.msra.mxu2 %v4291_v27  ;;  %2409 = vmatpush.bf16.msra.mxu1 %v4199_v22  ;;  %v7662_v38 = vmax.f32 %v5826_v52, 0.0  ;;  %v6461_v25 = vpack.c.bf16 %v1484_v2, %v1484_v2  ;;  %v4614_v19 = vld [vmem:[%s7447_s3 + $0x104] sm:$0xf0]  ;;  %v7667_v52 = vld [vmem:[#allocation2_spill] sm:$0xff]  ;;  %v7676_v22 = vld [vmem:[#allocation16_spill] sm:$0xff] }
 0x1d6   :  { %v1024_v20 = vrot.slane %v7665_v59, 2  ;;  %v1857_v21 = vpack.c.b16 %v1853_v12, %v1846_v26  ;;  %2439 = vmatpush.bf16.msra.mxu3 %v4195_v16  ;;  %v6470_v37 = vunpack.c.l.b16 %v2218_v45  ;;  %v2518_v11 = vsel %vm1791_vm3, %v7668_v44, %v7667_v52  ;;  %v7675_v2 = vld [vmem:[#allocation11_spill] sm:$0xff]  ;;  %v7677_v26 = vld [vmem:[#allocation13_spill] sm:$0xff] }
 0x1d7   :  { %v2219_v49 = vpack.c.bf16 %v7661_v43, %v7661_v43  ;;  %v6459_v8 = vpack.c.bf16 %v7662_v38, %v7662_v38  ;;  %7664 = vst [vmem:[#allocation54_spill] sm:$0xff] %v6461_v25  ;;  %v1108_v53 = vrot.slane %v7669_v57, 2  ;;  %2668 = vmatpush.bf16.msra.mxu0 %v4279_v17  ;;  %v2519_v63 = vsel %vm1793_vm4, %v7671_v29, %v2518_v11  ;;  %v7678_v45 = vld [vmem:[#allocation3_spill] sm:$0xff]  ;;  %v7680_v38 = vld [vmem:[#allocation17_spill] sm:$0xff]  ;;  %v4659_v11 = vld [vmem:[%s7447_s3 + $0x274] sm:$0xf] }
 0x1d8   :  { %7666 = vst [vmem:[#allocation22_spill] sm:$0xff] %v6470_v37  ;;  %v2525_v48 = vsel %vm1791_vm3, %v7673_v51, %v7672_v6  ;;  %1965 = vmatmul.bf16.gmra.mxu1 %v1857_v21  ;;  %1994 = vmatmul.bf16.gmra.mxu3 %v1857_v21  ;;  %v7540_v9 = vunpack.c.l.b16 %v6461_v25  ;;  %v2520_v24 = vsel %vm1795_vm5, %v7674_v7, %v2519_v63  ;;  %v7681_v52 = vld [vmem:[#allocation15_spill] sm:$0xff]  ;;  %v4408_v63 = vld [vmem:[%s7447_s3 + $0x278] sm:$0xf0] }
 0x1d9   :  { %7663 = vst [vmem:[#allocation53_spill] sm:$0xff] %v6459_v8  ;;  %v6476_v41 = vunpack.c.l.b16 %v2219_v49  ;;  %v7539_v30 = vunpack.c.l.b16 %v6459_v8  ;;  %v2526_v27 = vsel %vm1793_vm4, %v7675_v2, %v2525_v48  ;;  %v4191_v17 = vor.u32 %v4614_v19, %v4190_v39  ;;  %2697 = vmatpush.bf16.msra.mxu2 %v4283_v5  ;;  %v7679_v49 = vld [vmem:[#allocation8_spill] sm:$0xff]  ;;  %v7682_v48 = vld [vmem:[#allocation18_spill] sm:$0xff] }
 0x1da   :  { %v2521_v16 = vsel %vm1797_vm6, %v7676_v22, %v2520_v24  ;;  %v2527_v58 = vsel %vm1795_vm5, %v7677_v26, %v2526_v27  ;;  %v2260_v43 = vsel %vm1793_vm4, %v7668_v44, %v7678_v45  ;;  %v2266_v12 = vsel %vm1791_vm3, %v7672_v6, %v7679_v49 }
 0x1db   :  { %7670 = vst [vmem:[#allocation2_spill] sm:$0xff] %v6476_v41  ;;  %v2522_v21 = vsel %vm1799_vm7, %v7680_v38, %v2521_v16  ;;  %v2528_v5 = vsel %vm1797_vm6, %v7681_v52, %v2527_v58  ;;  %2410 = vmatpush.bf16.msra.mxu1 %v4191_v17  ;;  %v2261_v39 = vsel %vm1795_vm5, %v7671_v29, %v2260_v43  ;;  %v4406_v16 = vld [vmem:[%s7447_s3 + $0x270] sm:$0xf] }
 0x1dc   :  { %v2267_v19 = vsel %vm1793_vm4, %v7673_v51, %v2266_v12  ;;  %2669 = vmatpush.bf16.msra.mxu0 %v4271_v40  ;;  %v2523_v6 = vsel %vm1801_vm8, %v6470_v37, %v2522_v21  ;;  %v2529_v24 = vsel %vm1799_vm7, %v7682_v48, %v2528_v5  ;;  %v2262_v27 = vsel %vm1797_vm6, %v7674_v7, %v2261_v39  ;;  %v4660_v40 = vld [vmem:[%s7447_s3 + $0x274] sm:$0xf0]  ;;  %v4657_v12 = vld [vmem:[%s7447_s3 + $0x264] sm:$0xf]  ;;  %v4400_v21 = vld [vmem:[%s7447_s3 + $0x268] sm:$0xf0] }
 0x1dd   :  { %v2268_v17 = vsel %vm1795_vm5, %v7675_v2, %v2267_v19  ;;  %v2524_v58 = vsel %vm1803_vm9, %v7539_v30, %v2523_v6  ;;  %v2530_v45 = vsel %vm1801_vm8, %v6476_v41, %v2529_v24  ;;  %v2263_v43 = vsel %vm1799_vm7, %v7676_v22, %v2262_v27  ;;  %2698 = vmatpush.bf16.msra.mxu2 %v4275_v36  ;;  %v7699_v2 = vld [vmem:[#allocation37_spill] sm:$0xff] }
 0x1de   :  { %v2269_v49 = vsel %vm1797_vm6, %v7677_v26, %v2268_v17  ;;  %v2531_v5 = vsel %vm1803_vm9, %v7540_v9, %v2530_v45  ;;  %v2264_v39 = vsel %vm1801_vm8, %v7680_v38, %v2263_v43  ;;  %v4411_v6 = vor.u32 %v4659_v11, %v4408_v63  ;;  %v7683_v43 = vld [vmem:[#allocation19_spill] sm:$0xff]  ;;  %v7694_v11 = vld [vmem:[#allocation34_spill] sm:$0xff] }
 0x1df   :  { %v2270_v19 = vsel %vm1799_vm7, %v7681_v52, %v2269_v49  ;;  %v2574_v24 = vpack.c.b16 %v2531_v5, %v2524_v58  ;;  %v2265_v27 = vsel %vm1803_vm9, %v6470_v37, %v2264_v39  ;;  %v4407_v30 = vor.u32 %v4660_v40, %v4406_v16  ;;  %v7685_v5 = vld [vmem:[#allocation24_spill] sm:$0xff]  ;;  %v7698_v52 = vld [vmem:[#allocation35_spill] sm:$0xff] }
 0x1e0   :  { %v2271_v17 = vsel %vm1801_vm8, %v7682_v48, %v2270_v19  ;;  %2950 = vmatpush.bf16.msrb.mxu3 %v4411_v6  ;;  %v4403_v45 = vor.u32 %v4657_v12, %v4400_v21  ;;  %v1025_v9 = vmax.f32 %v7665_v59, %v1024_v20  ;;  %v7684_v18 = vrot.slane %v7683_v43, 4  ;;  %v7687_v21 = vld [vmem:[#allocation14_spill] sm:$0xff]  ;;  %v7688_v59 = vld [vmem:[#allocation21_spill] sm:$0xff] }
 0x1e1   :  { %v2272_v36 = vsel %vm1803_vm9, %v6476_v41, %v2271_v17  ;;  %2670 = vmatmul.bf16.vlgmr.msra.gmra.mxu0 %v2574_v24  ;;  %2699 = vmatmul.bf16.vlgmr.msra.gmra.mxu2 %v2574_v24  ;;  %v1109_v58 = vmax.f32 %v7669_v57, %v1108_v53  ;;  %v7686_v16 = vrot.slane %v7685_v5, 4  ;;  %v2532_v20 = vsel %vm1791_vm3, %v7688_v59, %v7687_v21  ;;  %v7689_v19 = vld [vmem:[#allocation33_spill] sm:$0xff]  ;;  %v7692_v53 = vld [vmem:[#allocation26_spill] sm:$0xff] }
 0x1e2   :  { %v1030_v49 = vmax.f32 %v7683_v43, %v7684_v18  ;;  %v2315_v63 = vpack.c.b16 %v2272_v36, %v2265_v27  ;;  %2921 = vmatpush.bf16.msrb.mxu1 %v4407_v30  ;;  %v1026_v39 = vrot.slane %v1025_v9, 1  ;;  %v7690_v18 = vld [vmem:[#allocation23_spill] sm:$0xff]  ;;  %v7691_v27 = vld [vmem:[#allocation29_spill] sm:$0xff]  ;;  %v4398_v41 = vld [vmem:[%s7447_s3 + $0x260] sm:$0xf]  ;;  %v7695_v48 = vrot.slane %v6130_v33, 4 }
 0x1e3   :  { %v1114_v40 = vmax.f32 %v7685_v5, %v7686_v16  ;;  %v2539_v6 = vsel %vm1791_vm3, %v7690_v18, %v7689_v19  ;;  %v1110_v17 = vrot.slane %v1109_v58, 1  ;;  %v2533_v57 = vsel %vm1793_vm4, %v7691_v27, %v2532_v20  ;;  %v7693_v5 = vld [vmem:[#allocation30_spill] sm:$0xff]  ;;  %v4658_v20 = vld [vmem:[%s7447_s3 + $0x264] sm:$0xf0] }
 0x1e4   :  { %v1031_v12 = vrot.slane %v1030_v49, 2  ;;  %v2540_v36 = vsel %vm1793_vm4, %v7692_v53, %v2539_v6  ;;  %2951 = vmatpush.bf16.msrb.mxu3 %v4403_v45  ;;  %v1027_v30 = vmax.f32 %v1025_v9, %v1026_v39  ;;  %v2534_v16 = vsel %vm1795_vm5, %v7693_v5, %v2533_v57  ;;  %v7696_v39 = vld [vmem:[#allocation31_spill] sm:$0xff] }
 0x1e5   :  { %v1115_v24 = vrot.slane %v1114_v40, 2  ;;  %v2541_v25 = vsel %vm1795_vm5, %v7694_v11, %v2540_v36  ;;  %v6587_v45 = vsel %vm789_vm2, %v7695_v48, -inf  ;;  %v1111_v9 = vmax.f32 %v1109_v58, %v1110_v17  ;;  %v7697_v36 = vld [vmem:[#allocation36_spill] sm:$0xff] }
 0x1e6   :  { %v1032_v43 = vmax.f32 %v1030_v49, %v1031_v12  ;;  %v2535_v12 = vsel %vm1797_vm6, %v7696_v39, %v2534_v16  ;;  %v1495_v57 = vmax.f32 %v1027_v30, 0.0  ;;  %v2542_v37 = vsel %vm1797_vm6, %v7698_v52, %v2541_v25 }
 0x1e7   :  { %v1116_v49 = vmax.f32 %v1114_v40, %v1115_v24  ;;  %v2536_v8 = vsel %vm1799_vm7, %v7697_v36, %v2535_v12  ;;  %v1507_v38 = vmax.f32 %v1111_v9, 0.0  ;;  %v2543_v33 = vsel %vm1799_vm7, %v7699_v2, %v2542_v37  ;;  %v7700_v40 = vld [vmem:[#allocation28_spill] sm:$0xff] }
 0x1e8   :  { %v1033_v6 = vrot.slane %v1032_v43, 1  ;;  %v4399_v48 = vor.u32 %v4658_v20, %v4398_v41  ;;  %v2220_v58 = vpack.c.bf16 %v1495_v57, %v1495_v57  ;;  %v2273_v17 = vsel %vm1791_vm3, %v7687_v21, %v7700_v40  ;;  %v7701_v24 = vld [vmem:[#allocation32_spill] sm:$0xff]  ;;  %2411 = vmatmul.bf16.vlgmr.msra.gmra.mxu1 %v2315_v63  ;;  %2440 = vmatmul.bf16.vlgmr.msra.gmra.mxu3 %v2315_v63  ;;  %v4392_v63 = vld [vmem:[%s7447_s3 + $0x258] sm:$0xf0] }
 0x1e9   :  { %v1117_v26 = vrot.slane %v1116_v49, 1  ;;  %v2280_v30 = vsel %vm1791_vm3, %v7689_v19, %v7701_v24  ;;  %v2221_v25 = vpack.c.bf16 %v1507_v38, %v1507_v38  ;;  %v2274_v9 = vsel %vm1793_vm4, %v7688_v59, %v2273_v17  ;;  %v7702_v12 = vld [vmem:[#allocation40_spill] sm:$0xff] }
 0x1ea   :  { %v1034_v51 = vmax.f32 %v1032_v43, %v1033_v6  ;;  %v1192_v37 = vrot.slane %v7702_v12, 2  ;;  %v6606_v43 = vunpack.c.l.b16 %v2220_v58  ;;  %2922 = vmatpush.bf16.msrb.mxu1 %v4399_v48  ;;  %v2275_v21 = vsel %vm1795_vm5, %v7691_v27, %v2274_v9 }
 0x1eb   :  { %v1118_v16 = vmax.f32 %v1116_v49, %v1117_v26  ;;  %v2281_v20 = vsel %vm1793_vm4, %v7690_v18, %v2280_v30  ;;  %v6612_v6 = vunpack.c.l.b16 %v2221_v25  ;;  %v2276_v26 = vsel %vm1797_vm6, %v7693_v5, %v2275_v21  ;;  %v4656_v25 = vld [vmem:[%s7447_s3 + $0x254] sm:$0xf0] }
 0x1ec   :  { %v1496_v41 = vmax.f32 %v1034_v51, 0.0  ;;  %7703 = vst [vmem:[#allocation4_spill] sm:$0xff] %v6606_v43  ;;  %v2282_v38 = vsel %vm1795_vm5, %v7692_v53, %v2281_v20  ;;  %v4655_v51 = vld [vmem:[%s7447_s3 + $0x254] sm:$0xf]  ;;  %v2277_v57 = vsel %vm1799_vm7, %v7696_v39, %v2276_v26  ;;  %v1276_v58 = vrot.slane %v5930_v10, 2 }
 0x1ed   :  { %v1508_v19 = vmax.f32 %v1118_v16, 0.0  ;;  %7704 = vst [vmem:[#allocation27_spill] sm:$0xff] %v6612_v6  ;;  %v2283_v48 = vsel %vm1797_vm6, %v7694_v11, %v2282_v38  ;;  %v2537_v17 = vsel %vm1801_vm8, %v6606_v43, %v2536_v8  ;;  %v2278_v24 = vsel %vm1801_vm8, %v7697_v36, %v2277_v57  ;;  %v4390_v16 = vld [vmem:[%s7447_s3 + $0x250] sm:$0xf]  ;;  %v4653_v20 = vld [vmem:[%s7447_s3 + $0x244] sm:$0xf] }
 0x1ee   :  { %v6624_v49 = vpack.c.bf16 %v1496_v41, %v1496_v41  ;;  %v2284_v30 = vsel %vm1799_vm7, %v7698_v52, %v2283_v48  ;;  %v2544_v41 = vsel %vm1801_vm8, %v6612_v6, %v2543_v33  ;;  %v4395_v21 = vor.u32 %v4655_v51, %v4392_v63 }
 0x1ef   :  { %v6631_v40 = vpack.c.bf16 %v1508_v19, %v1508_v19  ;;  %v2285_v8 = vsel %vm1801_vm8, %v7699_v2, %v2284_v30  ;;  %v4384_v19 = vld [vmem:[%s7447_s3 + $0x248] sm:$0xf0]  ;;  %v7707_v26 = vrot.slane %v6243_v3, 4  ;;  %v2279_v33 = vsel %vm1803_vm9, %v6606_v43, %v2278_v24  ;;  %v7708_v24 = vld [vmem:[#allocation38_spill] sm:$0xff] }
 0x1f0   :  { %7705 = vst [vmem:[#allocation5_spill] sm:$0xff] %v6624_v49  ;;  %v7557_v9 = vunpack.c.l.b16 %v6624_v49  ;;  %v2286_v51 = vsel %vm1803_vm9, %v6612_v6, %v2285_v8  ;;  %2952 = vmatpush.bf16.msrb.mxu3 %v4395_v21  ;;  %v4391_v2 = vor.u32 %v4656_v25, %v4390_v16  ;;  %v1193_v52 = vmax.f32 %v7702_v12, %v1192_v37  ;;  %v7715_v49 = vld [vmem:[#allocation49_spill] sm:$0xff] }
 0x1f1   :  { %7706 = vst [vmem:[#allocation9_spill] sm:$0xff] %v6631_v40  ;;  %v6659_v38 = vmax.f32 %v6243_v3, %v7707_v26  ;;  %v7556_v57 = vunpack.c.l.b16 %v6631_v40  ;;  %v2316_v30 = vpack.c.b16 %v2286_v51, %v2279_v33  ;;  %v4387_v26 = vor.u32 %v4653_v20, %v4384_v19  ;;  %v4654_v20 = vld [vmem:[%s7447_s3 + $0x244] sm:$0xf0] }
 0x1f2   :  { %v2538_v48 = vsel %vm1803_vm9, %v7557_v9, %v2537_v17  ;;  %v7709_v43 = vrot.slane %v7708_v24, 4  ;;  %2923 = vmatpush.bf16.msrb.mxu1 %v4391_v2  ;;  %v1277_v63 = vmax.f32 %v5930_v10, %v1276_v58  ;;  %v7710_v17 = vrot.slane %v5883_v31, 4  ;;  %v4382_v58 = vld [vmem:[%s7447_s3 + $0x240] sm:$0xf] }
 0x1f3   :  { %v2545_v3 = vsel %vm1803_vm9, %v7556_v57, %v2544_v41  ;;  %v2546_v16 = vsel %vm1791_vm3, %v5783_v54, %v5677_v55  ;;  %v1194_v25 = vrot.slane %v1193_v52, 1  ;;  %v2553_v37 = vsel %vm1791_vm3, %v5875_v50, %v5974_v23 }
 0x1f4   :  { %v1198_v8 = vmax.f32 %v7708_v24, %v7709_v43  ;;  %v2575_v6 = vpack.c.b16 %v2545_v3, %v2538_v48  ;;  %v1282_v21 = vmax.f32 %v5883_v31, %v7710_v17  ;;  %v2547_v12 = vsel %vm1793_vm4, %v5965_v35, %v2546_v16  ;;  %2953 = vmatpush.bf16.msrb.mxu3 %v4387_v26  ;;  %v7712_v48 = vld [vmem:[#allocation46_spill] sm:$0xff]  ;;  %v7713_v16 = vld [vmem:[#allocation48_spill] sm:$0xff] }
 0x1f5   :  { %v1278_v10 = vrot.slane %v1277_v63, 1  ;;  %v2548_v31 = vsel %vm1795_vm5, %v5967_v56, %v2547_v12  ;;  %v2554_v43 = vsel %vm1793_vm4, %v5923_v28, %v2553_v37  ;;  %v1195_v19 = vmax.f32 %v1193_v52, %v1194_v25  ;;  %v7714_v37 = vld [vmem:[#allocation47_spill] sm:$0xff] }
 0x1f6   :  { %v1199_v41 = vrot.slane %v1198_v8, 2  ;;  %2675 = vmatmul.bf16.gmra.mxu0 %v2575_v6  ;;  %2704 = vmatmul.bf16.gmra.mxu2 %v2575_v6  ;;  %v1283_v2 = vrot.slane %v1282_v21, 2  ;;  %v7711_v6 = vld [vmem:[#allocation44_spill] sm:$0xff]  ;;  %v2555_v3 = vsel %vm1795_vm5, %v7712_v48, %v2554_v43  ;;  %v4383_v26 = vor.u32 %v4654_v20, %v4382_v58 }
 0x1f7   :  { %v2549_v51 = vsel %vm1797_vm6, %v7711_v6, %v2548_v31  ;;  %v1279_v24 = vmax.f32 %v1277_v63, %v1278_v10  ;;  %v2556_v57 = vsel %vm1797_vm6, %v7714_v37, %v2555_v3  ;;  %v1519_v40 = vmax.f32 %v1195_v19, 0.0  ;;  %v7717_v63 = vld [vmem:[#allocation45_spill] sm:$0xff]  ;;  %v7718_v19 = vld [vmem:[#allocation52_spill] sm:$0xff] }
 0x1f8   :  { %v1200_v33 = vmax.f32 %v1198_v8, %v1199_v41  ;;  %v1284_v17 = vmax.f32 %v1282_v21, %v1283_v2  ;;  %v2550_v12 = vsel %vm1799_vm7, %v7713_v16, %v2549_v51  ;;  %v2557_v52 = vsel %vm1799_vm7, %v7715_v49, %v2556_v57  ;;  %v7716_v41 = vld [vmem:[#allocation43_spill] sm:$0xff]  ;;  %2416 = vmatmul.bf16.gmra.mxu1 %v2316_v30 }
 0x1f9   :  { %v1531_v25 = vmax.f32 %v1279_v24, 0.0  ;;  %v2287_v31 = vsel %vm1791_vm3, %v5677_v55, %v7716_v41  ;;  %v2294_v21 = vsel %vm1791_vm3, %v5974_v23, %v7717_v63  ;;  %2445 = vmatmul.bf16.gmra.mxu3 %v2316_v30  ;;  %v2222_v2 = vpack.c.bf16 %v1519_v40, %v1519_v40  ;;  %2924 = vmatpush.bf16.msrb.mxu1 %v4383_v26  ;;  %v4651_v30 = vld [vmem:[%s7447_s3 + $0x234] sm:$0xf]  ;;  %v4652_v41 = vld [vmem:[%s7447_s3 + $0x234] sm:$0xf0] }
 0x1fa   :  { %v1201_v9 = vrot.slane %v1200_v33, 1  ;;  %v1285_v8 = vrot.slane %v1284_v17, 1  ;;  %v2288_v43 = vsel %vm1793_vm4, %v5783_v54, %v2287_v31  ;;  %v1360_v57 = vrot.slane %v7718_v19, 2 }
 0x1fb   :  { %v2223_v20 = vpack.c.bf16 %v1531_v25, %v1531_v25  ;;  %v2289_v51 = vsel %vm1795_vm5, %v5965_v35, %v2288_v43  ;;  %v2295_v55 = vsel %vm1793_vm4, %v5875_v50, %v2294_v21  ;;  %v6722_v23 = vunpack.c.l.b16 %v2222_v2  ;;  %v4374_v25 = vld [vmem:[%s7447_s3 + $0x230] sm:$0xf]  ;;  %v4649_v2 = vld [vmem:[%s7447_s3 + $0x224] sm:$0xf]  ;;  %v4368_v43 = vld [vmem:[%s7447_s3 + $0x228] sm:$0xf0] }
 0x1fc   :  { %v1202_v10 = vmax.f32 %v1200_v33, %v1201_v9  ;;  %v1286_v58 = vmax.f32 %v1284_v17, %v1285_v8  ;;  %v2290_v40 = vsel %vm1797_vm6, %v5967_v56, %v2289_v51  ;;  %v2296_v9 = vsel %vm1795_vm5, %v5923_v28, %v2295_v55  ;;  %v4376_v33 = vld [vmem:[%s7447_s3 + $0x238] sm:$0xf0] }
 0x1fd   :  { %v6734_v17 = vunpack.c.l.b16 %v2223_v20  ;;  %v2291_v26 = vsel %vm1799_vm7, %v7711_v6, %v2290_v40  ;;  %v2297_v8 = vsel %vm1797_vm6, %v7712_v48, %v2296_v9  ;;  %v2551_v63 = vsel %vm1801_vm8, %v6722_v23, %v2550_v12 }
 0x1fe   :  { %v1520_v3 = vmax.f32 %v1202_v10, 0.0  ;;  %v1532_v24 = vmax.f32 %v1286_v58, 0.0  ;;  %v2292_v21 = vsel %vm1801_vm8, %v7713_v16, %v2291_v26  ;;  %v2298_v10 = vsel %vm1799_vm7, %v7714_v37, %v2297_v8 }
 0x1ff   :  { %v2558_v20 = vsel %vm1801_vm8, %v6734_v17, %v2557_v52  ;;  %v2293_v12 = vsel %vm1803_vm9, %v6722_v23, %v2292_v21  ;;  %v2299_v51 = vsel %vm1801_vm8, %v7715_v49, %v2298_v10  ;;  %v4379_v40 = vor.u32 %v4651_v30, %v4376_v33  ;;  %v7719_v21 = vld [vmem:[#allocation50_spill] sm:$0xff] }
 0x200   :  { %v6746_v31 = vpack.c.bf16 %v1520_v3, %v1520_v3  ;;  %v6760_v58 = vpack.c.bf16 %v1532_v24, %v1532_v24  ;;  %v2300_v3 = vsel %vm1803_vm9, %v6734_v17, %v2299_v51  ;;  %v4375_v9 = vor.u32 %v4652_v41, %v4374_v25 }
 0x201   :  { %v2317_v24 = vpack.c.b16 %v2300_v3, %v2293_v12  ;;  %v4371_v8 = vor.u32 %v4649_v2, %v4368_v43  ;;  %v1361_v37 = vmax.f32 %v7718_v19, %v1360_v57  ;;  %2954 = vmatpush.bf16.msrb.mxu3 %v4379_v40  ;;  %v7720_v10 = vrot.slane %v7719_v21, 4  ;;  %v4366_v19 = vld [vmem:[%s7447_s3 + $0x220] sm:$0xf]  ;;  %v4650_v57 = vld [vmem:[%s7447_s3 + $0x224] sm:$0xf0] }
 0x202   :  { %v2514_v55 = vunpack.c.l.b16 %v6746_v31  ;;  %v7562_v26 = vunpack.c.l.b16 %v6760_v58  ;;  %2925 = vmatpush.bf16.msrb.mxu1 %v4375_v9  ;;  %v1444_v51 = vrot.slane %v6659_v38, 2  ;;  %v7721_v30 = vrot.slane %v6587_v45, 4  ;;  %v6993_v31 = vpop.f32.mrf.mxu3 }
 0x203   :  { %v1366_v49 = vmax.f32 %v7719_v21, %v7720_v10  ;;  %v1362_v41 = vrot.slane %v1361_v37, 1  ;;  %v4367_v21 = vor.u32 %v4650_v57, %v4366_v19 }
 0x204   :  { %v2552_v52 = vsel %vm1803_vm9, %v2514_v55, %v2551_v63  ;;  %v1450_v33 = vmax.f32 %v6587_v45, %v7721_v30  ;;  %v2559_v25 = vsel %vm1803_vm9, %v7562_v26, %v2558_v20  ;;  %v2560_v63 = vsel %vm1791_vm3, %v6152_v14, %v6133_v34 }
 0x205   :  { %v2567_v45 = vsel %vm1791_vm3, %v6250_v62, %v6212_v42  ;;  %v2576_v2 = vpack.c.b16 %v2559_v25, %v2552_v52  ;;  %v1367_v43 = vrot.slane %v1366_v49, 2  ;;  %v1445_v12 = vmax.f32 %v6659_v38, %v1444_v51  ;;  %2955 = vmatpush.bf16.msrb.mxu3 %v4371_v8  ;;  %v4647_v8 = vld [vmem:[%s7447_s3 + $0x214] sm:$0xf] }
 0x206   :  { %v1451_v3 = vrot.slane %v1450_v33, 2  ;;  %v1363_v40 = vmax.f32 %v1361_v37, %v1362_v41  ;;  %v2561_v9 = vsel %vm1793_vm4, %v6279_v47, %v2560_v63  ;;  %v2568_v20 = vsel %vm1793_vm4, %v6252_v13, %v2567_v45  ;;  %2926 = vmatpush.bf16.msrb.mxu1 %v4367_v21  ;;  %v4360_v41 = vld [vmem:[%s7447_s3 + $0x218] sm:$0xf0]  ;;  %v4352_v21 = vld [vmem:[%s7447_s3 + $0x208] sm:$0xf0] }
 0x207   :  { %2680 = vmatmul.bf16.gmra.mxu0 %v2576_v2  ;;  %2709 = vmatmul.bf16.gmra.mxu2 %v2576_v2  ;;  %v1368_v10 = vmax.f32 %v1366_v49, %v1367_v43  ;;  %v1446_v30 = vrot.slane %v1445_v12, 1  ;;  %v2562_v52 = vsel %vm1795_vm5, %v6299_v46, %v2561_v9  ;;  %v2569_v37 = vsel %vm1795_vm5, %v6301_v0, %v2568_v20  ;;  %v4648_v9 = vld [vmem:[%s7447_s3 + $0x214] sm:$0xf0] }
 0x208   :  { %v1452_v26 = vmax.f32 %v1450_v33, %v1451_v3  ;;  %v1543_v25 = vmax.f32 %v1363_v40, 0.0  ;;  %v2563_v38 = vsel %vm1797_vm6, %v6326_v61, %v2562_v52  ;;  %v2301_v51 = vsel %vm1791_vm3, %v6133_v34, %v6266_v60  ;;  %2421 = vmatmul.bf16.gmra.mxu1 %v2317_v24  ;;  %v4358_v40 = vld [vmem:[%s7447_s3 + $0x210] sm:$0xf] }
 0x209   :  { %v1369_v19 = vrot.slane %v1368_v10, 1  ;;  %v1447_v49 = vmax.f32 %v1445_v12, %v1446_v30  ;;  %v2564_v33 = vsel %vm1799_vm7, %v6439_v4, %v2563_v38  ;;  %v2570_v45 = vsel %vm1797_vm6, %v6332_v32, %v2569_v37  ;;  %2450 = vmatmul.bf16.gmra.mxu3 %v2317_v24  ;;  %v4645_v24 = vld [vmem:[%s7447_s3 + $0x204] sm:$0xf]  ;;  %v4350_v38 = vld [vmem:[%s7447_s3 + $0x200] sm:$0xf] }
 0x20a   :  { %v1453_v57 = vrot.slane %v1452_v26, 1  ;;  %v2224_v63 = vpack.c.bf16 %v1543_v25, %v1543_v25  ;;  %v2302_v34 = vsel %vm1793_vm4, %v6152_v14, %v2301_v51  ;;  %v2308_v60 = vsel %vm1791_vm3, %v6212_v42, %v6282_v15  ;;  %v4646_v37 = vld [vmem:[%s7447_s3 + $0x204] sm:$0xf0] }
 0x20b   :  { %v1370_v2 = vmax.f32 %v1368_v10, %v1369_v19  ;;  %v1555_v12 = vmax.f32 %v1447_v49, 0.0  ;;  %v2571_v3 = vsel %vm1799_vm7, %v6442_v1, %v2570_v45  ;;  %v2303_v42 = vsel %vm1795_vm5, %v6279_v47, %v2302_v34 }
 0x20c   :  { %v1454_v43 = vmax.f32 %v1452_v26, %v1453_v57  ;;  %v6835_v20 = vunpack.c.l.b16 %v2224_v63  ;;  %v2309_v15 = vsel %vm1793_vm4, %v6250_v62, %v2308_v60  ;;  %v4363_v26 = vor.u32 %v4647_v8, %v4360_v41 }
 0x20d   :  { %v1544_v10 = vmax.f32 %v1370_v2, 0.0  ;;  %v2225_v52 = vpack.c.bf16 %v1555_v12, %v1555_v12  ;;  %v2304_v25 = vsel %vm1797_vm6, %v6299_v46, %v2303_v42  ;;  %v2310_v49 = vsel %vm1795_vm5, %v6252_v13, %v2309_v15  ;;  %v7722_v15 = vld [vmem:[#allocation6_spill] sm:$0xff] }
 0x20e   :  { %v1556_v30 = vmax.f32 %v1454_v43, 0.0  ;;  %v2565_v51 = vsel %vm1801_vm8, %v6835_v20, %v2564_v33  ;;  %v2305_v19 = vsel %vm1799_vm7, %v6326_v61, %v2304_v25  ;;  %2956 = vmatpush.bf16.msrb.mxu3 %v4363_v26  ;;  %v4359_v57 = vor.u32 %v4648_v9, %v4358_v40 }
 0x20f   :  { %v6861_v8 = vunpack.c.l.b16 %v2225_v52  ;;  %v6863_v41 = vpack.c.bf16 %v1544_v10, %v1544_v10  ;;  %v2306_v45 = vsel %vm1801_vm8, %v6439_v4, %v2305_v19  ;;  %v2311_v34 = vsel %vm1797_vm6, %v6301_v0, %v2310_v49 }
 0x210   :  { %v6865_v63 = vpack.c.bf16 %v1556_v30, %v1556_v30  ;;  %v2307_v33 = vsel %vm1803_vm9, %v6835_v20, %v2306_v45  ;;  %2927 = vmatpush.bf16.msrb.mxu1 %v4359_v57  ;;  %v4355_v60 = vor.u32 %v4645_v24, %v4352_v21  ;;  %v4351_v2 = vor.u32 %v4646_v37, %v4350_v38  ;;  %v7724_v24 = vld [vmem:[#allocation12_spill] sm:$0xff] }
 0x211   :  { %v2516_v43 = vunpack.c.l.b16 %v6863_v41  ;;  %v2572_v40 = vsel %vm1801_vm8, %v6861_v8, %v2571_v3  ;;  %v2312_v9 = vsel %vm1799_vm7, %v6332_v32, %v2311_v34  ;;  %v7723_v26 = vrot.slane %v7722_v15, 1  ;;  %v7727_v34 = vld [vmem:[#allocation39_spill] sm:$0xff] }
 0x212   :  { %v2517_v12 = vunpack.c.l.b16 %v6865_v63  ;;  %v2313_v42 = vsel %vm1801_vm8, %v6442_v1, %v2312_v9  ;;  %2957 = vmatpush.bf16.msrb.mxu3 %v4355_v60  ;;  %v7725_v21 = vrot.slane %v7724_v24, 1  ;;  %v2777_v52 = vsel %vm1791_vm3, %v7671_v29, %v7668_v44  ;;  %v7726_v44 = vld [vmem:[#allocation25_spill] sm:$0xff]  ;;  %v7728_v9 = vld [vmem:[#allocation10_spill] sm:$0xff] }
 0x213   :  { %v873_v10 = vmax.f32 %v7722_v15, %v7723_v26  ;;  %v2566_v3 = vsel %vm1803_vm9, %v2516_v43, %v2565_v51  ;;  %v2314_v38 = vsel %vm1803_vm9, %v6861_v8, %v2313_v42  ;;  %v2778_v37 = vsel %vm1793_vm4, %v7674_v7, %v2777_v52 }
 0x214   :  { %v957_v30 = vmax.f32 %v7724_v24, %v7725_v21  ;;  %v2573_v25 = vsel %vm1803_vm9, %v2517_v12, %v2572_v40  ;;  %v2318_v49 = vpack.c.b16 %v2314_v38, %v2307_v33  ;;  %2928 = vmatpush.bf16.msrb.mxu1 %v4351_v2  ;;  %v1120_v29 = vrot.slane %v7726_v44, 4  ;;  %v7729_v40 = vld [vmem:[#allocation11_spill] sm:$0xff]  ;;  %v7730_v24 = vld [vmem:[#allocation17_spill] sm:$0xff] }
 0x215   :  { %v2577_v19 = vpack.c.b16 %v2573_v25, %v2566_v3  ;;  %v1473_v57 = vmax.f32 %v873_v10, 0.0  ;;  %v1204_v60 = vrot.slane %v7727_v34, 4  ;;  %v2779_v51 = vsel %vm1795_vm5, %v7676_v22, %v2778_v37  ;;  %v7731_v33 = vld [vmem:[#allocation13_spill] sm:$0xff]  ;;  %v7734_v22 = vld [vmem:[#allocation15_spill] sm:$0xff]  ;;  %v7735_v25 = vld [vmem:[#allocation20_spill] sm:$0xff] }
 0x216   :  { %v1485_v45 = vmax.f32 %v957_v30, 0.0  ;;  %v2784_v15 = vsel %vm1791_vm3, %v7729_v40, %v7728_v9  ;;  %v2780_v7 = vsel %vm1797_vm6, %v7730_v24, %v2779_v51  ;;  %v7732_v10 = vld [vmem:[#allocation41_spill] sm:$0xff]  ;;  %v7733_v30 = vld [vmem:[#allocation22_spill] sm:$0xff]  ;;  %v7736_v38 = vrot.slane %v7735_v25, 4 }
 0x217   :  { %v2736_v42 = vpack.c.bf16 %v1473_v57, %v1473_v57  ;;  %v2785_v2 = vsel %vm1793_vm4, %v7731_v33, %v2784_v15  ;;  %v1288_v21 = vrot.slane %v7732_v10, 4  ;;  %2685 = vmatmul.bf16.gmra.mxu0 %v2577_v19  ;;  %2714 = vmatmul.bf16.gmra.mxu2 %v2577_v19  ;;  %v2781_v52 = vsel %vm1799_vm7, %v7733_v30, %v2780_v7  ;;  %v7737_v51 = vld [vmem:[#allocation53_spill] sm:$0xff]  ;;  %v7739_v15 = vld [vmem:[#allocation18_spill] sm:$0xff] }
 0x218   :  { %v2737_v26 = vpack.c.bf16 %v1485_v45, %v1485_v45  ;;  %v2786_v3 = vsel %vm1795_vm5, %v7734_v22, %v2785_v2  ;;  %v1037_v37 = vmax.f32 %v7735_v25, %v7736_v38  ;;  %v7738_v9 = vunpack.c.l.b16 %v7737_v51  ;;  %v7740_v19 = vld [vmem:[#allocation2_spill] sm:$0xff]  ;;  %2426 = vmatmul.bf16.gmra.mxu1 %v2318_v49 }
 0x219   :  { %v2769_v57 = vunpack.c.l.b16 %v2736_v42  ;;  %v2787_v24 = vsel %vm1797_vm6, %v7739_v15, %v2786_v3  ;;  %v1121_v30 = vmax.f32 %v7726_v44, %v1120_v29  ;;  %v2791_v2 = vsel %vm1791_vm3, %v7691_v27, %v7688_v59  ;;  %2455 = vmatmul.bf16.gmra.mxu3 %v2318_v49 }
 0x21a   :  { %v2770_v45 = vunpack.c.l.b16 %v2737_v26  ;;  %v2782_v40 = vsel %vm1801_vm8, %v7738_v9, %v2781_v52  ;;  %v2788_v33 = vsel %vm1799_vm7, %v7740_v19, %v2787_v24  ;;  %v1038_v7 = vrot.slane %v1037_v37, 2  ;;  %v7741_v26 = vld [vmem:[#allocation54_spill] sm:$0xff]  ;;  %v7747_v24 = vld [vmem:[#allocation37_spill] sm:$0xff] }
 0x21b   :  { %v2783_v42 = vsel %vm1803_vm9, %v2769_v57, %v2782_v40  ;;  %v7742_v22 = vunpack.c.l.b16 %v7741_v26  ;;  %v2792_v52 = vsel %vm1793_vm4, %v7693_v5, %v2791_v2  ;;  %v2798_v3 = vsel %vm1791_vm3, %v7692_v53, %v7690_v18  ;;  %v7743_v53 = vld [vmem:[#allocation4_spill] sm:$0xff]  ;;  %v7745_v40 = vld [vmem:[#allocation5_spill] sm:$0xff] }
 0x21c   :  { %v1039_v29 = vmax.f32 %v1037_v37, %v1038_v7  ;;  %v1122_v38 = vrot.slane %v1121_v30, 2  ;;  %v2793_v59 = vsel %vm1795_vm5, %v7696_v39, %v2792_v52  ;;  %v2799_v5 = vsel %vm1793_vm4, %v7694_v11, %v2798_v3  ;;  %v7749_v2 = vld [vmem:[#allocation9_spill] sm:$0xff] }
 0x21d   :  { %v2789_v25 = vsel %vm1801_vm8, %v7742_v22, %v2788_v33  ;;  %v2794_v57 = vsel %vm1797_vm6, %v7697_v36, %v2793_v59  ;;  %v1205_v51 = vmax.f32 %v7727_v34, %v1204_v60  ;;  %v7746_v15 = vunpack.c.l.b16 %v7745_v40  ;;  %v7748_v60 = vld [vmem:[#allocation27_spill] sm:$0xff] }
 0x21e   :  { %v2790_v44 = vsel %vm1803_vm9, %v2770_v45, %v2789_v25  ;;  %v1040_v9 = vrot.slane %v1039_v29, 1  ;;  %v1123_v18 = vmax.f32 %v1121_v30, %v1122_v38  ;;  %v2795_v49 = vsel %vm1799_vm7, %v7743_v53, %v2794_v57  ;;  %v7744_v45 = vld [vmem:[#allocation35_spill] sm:$0xff] }
 0x21f   :  { %v2833_v27 = vpack.c.b16 %v2790_v44, %v2783_v42  ;;  %v2800_v37 = vsel %vm1795_vm5, %v7744_v45, %v2799_v5  ;;  %v2796_v39 = vsel %vm1801_vm8, %v7746_v15, %v2795_v49  ;;  %v1206_v19 = vrot.slane %v1205_v51, 2 }
 0x220   :  { %v2801_v36 = vsel %vm1797_vm6, %v7747_v24, %v2800_v37  ;;  %v1289_v11 = vmax.f32 %v7732_v10, %v1288_v21  ;;  %v1041_v33 = vmax.f32 %v1039_v29, %v1040_v9  ;;  %v1124_v34 = vrot.slane %v1123_v18, 1  ;;  %v6972_v29 = vpop.f32.mrf.mxu1 }
 0x221   :  { %v2802_v7 = vsel %vm1799_vm7, %v7748_v60, %v2801_v36  ;;  %v2805_v30 = vsel %vm1791_vm3, %v5965_v35, %v5783_v54  ;;  %v7750_v42 = vunpack.c.l.b16 %v7749_v2  ;;  %v1207_v22 = vmax.f32 %v1205_v51, %v1206_v19  ;;  %v7755_v2 = vld [vmem:[#allocation51_spill] sm:$0xff] }
 0x222   :  { %v1290_v25 = vrot.slane %v1289_v11, 2  ;;  %v2806_v52 = vsel %vm1793_vm4, %v5967_v56, %v2805_v30  ;;  %v1125_v3 = vmax.f32 %v1123_v18, %v1124_v34  ;;  %v1497_v10 = vmax.f32 %v1041_v33, 0.0  ;;  %v7752_v18 = vld [vmem:[#allocation49_spill] sm:$0xff] }
 0x223   :  { %v2803_v26 = vsel %vm1801_vm8, %v7750_v42, %v2802_v7  ;;  %v2807_v21 = vsel %vm1795_vm5, %v7711_v6, %v2806_v52  ;;  %v2812_v44 = vsel %vm1791_vm3, %v5923_v28, %v5875_v50  ;;  %v1208_v54 = vrot.slane %v1207_v22, 1  ;;  %v7751_v6 = vld [vmem:[#allocation47_spill] sm:$0xff]  ;;  %v7754_v7 = vld [vmem:[#allocation42_spill] sm:$0xff]  ;;  %v7004_v52 = vpop.f32.mrf.mxu3 }
 0x224   :  { %v1291_v35 = vmax.f32 %v1289_v11, %v1290_v25  ;;  %v2808_v38 = vsel %vm1797_vm6, %v7713_v16, %v2807_v21  ;;  %v2813_v59 = vsel %vm1793_vm4, %v7712_v48, %v2812_v44  ;;  %v1509_v56 = vmax.f32 %v1125_v3, 0.0 }
 0x225   :  { %v2738_v57 = vpack.c.bf16 %v1497_v10, %v1497_v10  ;;  %v2809_v5 = vsel %vm1799_vm7, %v6722_v23, %v2808_v38  ;;  %v2814_v51 = vsel %vm1795_vm5, %v7751_v6, %v2813_v59  ;;  %v1209_v9 = vmax.f32 %v1207_v22, %v1208_v54 }
 0x226   :  { %v1292_v50 = vrot.slane %v1291_v35, 1  ;;  %v2810_v28 = vsel %vm1801_vm8, %v2514_v55, %v2809_v5  ;;  %v2815_v16 = vsel %vm1797_vm6, %v7752_v18, %v2814_v51  ;;  %v2739_v53 = vpack.c.bf16 %v1509_v56, %v1509_v56 }
 0x227   :  { %v2771_v49 = vunpack.c.l.b16 %v2738_v57  ;;  %v2816_v48 = vsel %vm1799_vm7, %v6734_v17, %v2815_v16  ;;  %v1521_v37 = vmax.f32 %v1209_v9, 0.0  ;;  %v7753_v23 = vunpack.c.l.b16 %v6760_v58 }
 0x228   :  { %v1293_v45 = vmax.f32 %v1291_v35, %v1292_v50  ;;  %v2772_v15 = vunpack.c.l.b16 %v2739_v53  ;;  %2929 = vmatmul.bf16.vlgmr.msrb.gmra.mxu1 %v2833_v27  ;;  %v6996_v17 = vpop.f32.mrf.mxu1  ;;  %v707_v30 = vrot.slane %v7754_v7, 6  ;;  %v2819_v54 = vsel %vm1791_vm3, %v6279_v47, %v6152_v14 }
 0x229   :  { %v2817_v40 = vsel %vm1801_vm8, %v7753_v23, %v2816_v48  ;;  %v2797_v24 = vsel %vm1803_vm9, %v2771_v49, %v2796_v39  ;;  %v2740_v36 = vpack.c.bf16 %v1521_v37, %v1521_v37  ;;  %2958 = vmatmul.bf16.vlgmr.msrb.gmra.mxu3 %v2833_v27  ;;  %v716_v39 = vrot.slane %v7755_v2, 6  ;;  %v2169_v23 = vpop.f32.mrf.mxu0 }
 0x22a   :  { %v1533_v55 = vmax.f32 %v1293_v45, 0.0  ;;  %v2804_v19 = vsel %vm1803_vm9, %v2772_v15, %v2803_v26  ;;  %v1371_v25 = vsel %vm789_vm2, %v707_v30, -inf  ;;  %v2826_v35 = vsel %vm1791_vm3, %v6252_v13, %v6250_v62 }
 0x22b   :  { %v2834_v11 = vpack.c.b16 %v2804_v19, %v2797_v24  ;;  %v2773_v34 = vunpack.c.l.b16 %v2740_v36  ;;  %v1455_v26 = vsel %vm789_vm2, %v716_v39, -inf  ;;  %v1372_v27 = vrot.slane %v1371_v25, 4  ;;  %v7014_v38 = vpop.f32.mrf.mxu3 }
 0x22c   :  { %v2741_v33 = vpack.c.bf16 %v1533_v55, %v1533_v55  ;;  %v1456_v10 = vrot.slane %v1455_v26, 4  ;;  %v2820_v59 = vsel %vm1793_vm4, %v6299_v46, %v2819_v54  ;;  %v2827_v56 = vsel %vm1793_vm4, %v6301_v0, %v2826_v35 }
 0x22d   :  { %v2811_v58 = vsel %vm1803_vm9, %v2773_v34, %v2810_v28  ;;  %v1373_v21 = vmax.f32 %v1371_v25, %v1372_v27  ;;  %v2821_v6 = vsel %vm1795_vm5, %v6326_v61, %v2820_v59  ;;  %v2828_v14 = vsel %vm1795_vm5, %v6332_v32, %v2827_v56 }
 0x22e   :  { %v2774_v60 = vunpack.c.l.b16 %v2741_v33  ;;  %v1457_v44 = vmax.f32 %v1455_v26, %v1456_v10  ;;  %v2822_v62 = vsel %vm1797_vm6, %v6439_v4, %v2821_v6  ;;  %v2829_v13 = vsel %vm1797_vm6, %v6442_v1, %v2828_v14 }
 0x22f   :  { %v1374_v57 = vrot.slane %v1373_v21, 2  ;;  %v2823_v0 = vsel %vm1799_vm7, %v6835_v20, %v2822_v62  ;;  %v2830_v51 = vsel %vm1799_vm7, %v6861_v8, %v2829_v13 }
 0x230   :  { %v2818_v42 = vsel %vm1803_vm9, %v2774_v60, %v2817_v40  ;;  %v7006_v3 = vpop.f32.mrf.mxu1  ;;  %v1458_v5 = vrot.slane %v1457_v44, 2  ;;  %v2824_v61 = vsel %vm1801_vm8, %v2516_v43, %v2823_v0  ;;  %v2831_v32 = vsel %vm1801_vm8, %v2517_v12, %v2830_v51  ;;  %v2198_v40 = vpop.f32.mrf.mxu2 }
 0x231   :  { %v2835_v22 = vpack.c.b16 %v2818_v42, %v2811_v58  ;;  %v1375_v47 = vmax.f32 %v1373_v21, %v1374_v57  ;;  %v2171_v55 = vpop.f32.mrf.mxu0 }
 0x232   :  { %v1459_v46 = vmax.f32 %v1457_v44, %v1458_v5 }
 0x233   :  { %v1376_v4 = vrot.slane %v1375_v47, 1  ;;  %v7040_v20 = vpop.f32.mrf.mxu3 }
 0x234   :  { %v1460_v1 = vrot.slane %v1459_v46, 1 }
 0x235   :  { %v1377_v50 = vmax.f32 %v1375_v47, %v1376_v4 }
 0x236   :  { %v1461_v28 = vmax.f32 %v1459_v46, %v1460_v1  ;;  %v2199_v1 = vadd.f32 %v2198_v40, %v6993_v31 }
 0x237   :  { %v1545_v18 = vmax.f32 %v1377_v50, 0.0 }
 0x238   :  { %2934 = vmatmul.bf16.gmra.mxu1 %v2834_v11  ;;  %v7032_v9 = vpop.f32.mrf.mxu1  ;;  %v1557_v16 = vmax.f32 %v1461_v28, 0.0  ;;  %v2200_v36 = vpop.f32.mrf.mxu2 }
 0x239   :  { %2963 = vmatmul.bf16.gmra.mxu3 %v2834_v11  ;;  %v2742_v53 = vpack.c.bf16 %v1545_v18, %v1545_v18  ;;  %v2174_v33 = vpop.f32.mrf.mxu0  ;;  %v2201_v31 = vadd.f32 %v2200_v36, %v7004_v52 }
 0x23a   :  { %v2743_v8 = vpack.c.bf16 %v1557_v16, %v1557_v16 }
 0x23b   :  { %v2775_v48 = vunpack.c.l.b16 %v2742_v53  ;;  %v7046_v12 = vpop.f32.mrf.mxu3  ;;  %v2995_v53 = vld [vmem:[%s7449_s4] sm:$0x3]  ;;  %s4731_s4 = smov 48  }
 0x23c   :  { %v2776_v41 = vunpack.c.l.b16 %v2743_v8 }
 0x23d   :  { %v2825_v43 = vsel %vm1803_vm9, %v2775_v48, %v2824_v61  ;;  %v2170_v61 = vadd.f32 %v2169_v23, %v6972_v29  ;;  %v2172_v48 = vadd.f32 %v2171_v55, %v6996_v17 }
 0x23e   :  { %v2832_v63 = vsel %vm1803_vm9, %v2776_v41, %v2831_v32 }
 0x23f   :  { %v2836_v45 = vpack.c.b16 %v2832_v63, %v2825_v43  ;;  %v7108_v43 = vperm.slane %v2995_v53, 0  ;;  %v7110_v63 = vperm.slane %v2995_v53, 1 }
 0x240   :  { %v7042_v49 = vpop.f32.mrf.mxu1  ;;  %v7058_v34 = vpop.f32.mrf.mxu2 }
 0x241   :  { %v7062_v7 = vpop.f32.mrf.mxu0 }
 0x243   :  { %v7050_v15 = vpop.f32.mrf.mxu3 }
 0x248   :  { %2939 = vmatmul.bf16.gmra.mxu1 %v2835_v22  ;;  %v7048_v37 = vpop.f32.mrf.mxu1  ;;  %v7064_v2 = vpop.f32.mrf.mxu2 }
 0x249   :  { %2968 = vmatmul.bf16.gmra.mxu3 %v2835_v22  ;;  %v7066_v42 = vpop.f32.mrf.mxu0 }
 0x250   :  { %v7068_v25 = vpop.f32.mrf.mxu2 }
 0x251   :  { %v7070_v10 = vpop.f32.mrf.mxu0 }
 0x255   :  { %v7052_v24 = vpop.f32.mrf.mxu1 }
 0x258   :  { %2944 = vmatmul.bf16.gmra.mxu1 %v2836_v45  ;;  %v7074_v44 = vpop.f32.mrf.mxu2 }
 0x259   :  { %2973 = vmatmul.bf16.gmra.mxu3 %v2836_v45  ;;  %v7078_v35 = vpop.f32.mrf.mxu0 }
 0x25b   :  { %v7054_v19 = vpop.f32.mrf.mxu3 }
 0x25d   :  { %v7056_v11 = vpop.f32.mrf.mxu1 }
 0x260   :  { %v7082_v56 = vpop.f32.mrf.mxu2 }
 0x261   :  { %v7088_v6 = vpop.f32.mrf.mxu0 }
 0x263   :  { %v7060_v60 = vpop.f32.mrf.mxu3 }
 0x265   :  { %v2412_v58 = vpop.f32.mrf.mxu1 }
 0x266   :  { %v2461_v50 = vadd.f32 %v2412_v58, %v2170_v61 }
 0x268   :  { %v7090_v14 = vpop.f32.mrf.mxu2 }
 0x269   :  { %v2671_v47 = vpop.f32.mrf.mxu0 }
 0x26a   :  { %v2720_v8 = vadd.f32 %v2671_v47, %v2461_v50 }
 0x26b   :  { %v2441_v30 = vpop.f32.mrf.mxu3 }
 0x26c   :  { %v2462_v16 = vadd.f32 %v2441_v30, %v2199_v1 }
 0x26d   :  { %v2414_v39 = vpop.f32.mrf.mxu1 }
 0x26e   :  { %v2463_v23 = vadd.f32 %v2414_v39, %v2172_v48  ;;  %v2204_v39 = vadd.f32 %v7058_v34, %v7014_v38 }
 0x270   :  { %v2700_v46 = vpop.f32.mrf.mxu2 }
 0x271   :  { %v2673_v32 = vpop.f32.mrf.mxu0  ;;  %v2721_v29 = vadd.f32 %v2700_v46, %v2462_v16  ;;  %v2175_v46 = vadd.f32 %v2174_v33, %v7006_v3 }
 0x272   :  { %v2722_v55 = vadd.f32 %v2673_v32, %v2463_v23 }
 0x273   :  { %v2443_v22 = vpop.f32.mrf.mxu3 }
 0x274   :  { %v2464_v61 = vadd.f32 %v2443_v22, %v2201_v31 }
 0x275   :  { %v2417_v26 = vpop.f32.mrf.mxu1 }
 0x276   :  { %v2465_v22 = vadd.f32 %v2417_v26, %v2175_v46  ;;  %v2206_v26 = vadd.f32 %v7064_v2, %v7040_v20 }
 0x278   :  { %v2702_v28 = vpop.f32.mrf.mxu2 }
 0x279   :  { %v2676_v58 = vpop.f32.mrf.mxu0  ;;  %v2723_v52 = vadd.f32 %v2702_v28, %v2464_v61  ;;  %v2177_v28 = vadd.f32 %v7062_v7, %v7032_v9 }
 0x27a   :  { %v2724_v3 = vadd.f32 %v2676_v58, %v2465_v22 }
 0x27c   :  { %v2446_v27 = vpop.f32.mrf.mxu3 }
 0x27d   :  { %v7072_v21 = vpop.f32.mrf.mxu1 }
 0x280   :  { %v2705_v17 = vpop.f32.mrf.mxu2 }
 0x284   :  { %v7076_v54 = vpop.f32.mrf.mxu3 }
 0x285   :  { %v7080_v59 = vpop.f32.mrf.mxu1 }
 0x28c   :  { %v7084_v57 = vpop.f32.mrf.mxu3 }
 0x28d   :  { %v7086_v5 = vpop.f32.mrf.mxu1 }
 0x294   :  { %v7092_v62 = vpop.f32.mrf.mxu3 }
 0x295   :  { %v7094_v13 = vpop.f32.mrf.mxu1 }
 0x29c   :  { %v7096_v0 = vpop.f32.mrf.mxu3 }
 0x29d   :  { %v7098_v51 = vpop.f32.mrf.mxu1 }
 0x2a4   :  { %v7101_v4 = vpop.f32.mrf.mxu3 }
 0x2a5   :  { %v2930_v18 = vpop.f32.mrf.mxu1 }
 0x2a6   :  { %v2979_v41 = vadd.f32 %v2930_v18, %v2720_v8  ;;  %v2466_v8 = vadd.f32 %v2446_v27, %v2204_v39  ;;  %v2467_v27 = vadd.f32 %v7072_v21, %v2177_v28  ;;  %v2182_v39 = vadd.f32 %v7070_v10, %v7048_v37 }
 0x2a8   :  { %v7114_v1 = vadd.f32 %v7108_v43, %v2979_v41  ;;  %v2678_v41 = vpop.f32.mrf.mxu0  ;;  %v2725_v38 = vadd.f32 %v2705_v17, %v2466_v8 }
 0x2a9   :  { %v2726_v9 = vadd.f32 %v2678_v41, %v2467_v27 }
 0x2ac   :  { %v2959_v45 = vpop.f32.mrf.mxu3 }
 0x2ad   :  { %v2980_v40 = vadd.f32 %v2959_v45, %v2721_v29  ;;  %v2932_v30 = vpop.f32.mrf.mxu1  ;;  %v2707_v29 = vpop.f32.mrf.mxu2 }
 0x2ae   :  { %v2981_v18 = vadd.f32 %v2932_v30, %v2722_v55 }
 0x2af   :  { %v3002_v47 = vadd.f32 %v7110_v63, %v2980_v40  ;;  %v2468_v40 = vadd.f32 %v7076_v54, %v2206_v26  ;;  %v2209_v54 = vadd.f32 %v7068_v25, %v7046_v12 }
 0x2b0   :  { %v7123_v48 = vadd.f32 %v7108_v43, %v2981_v18  ;;  %v2681_v61 = vpop.f32.mrf.mxu0 }
 0x2b1   :  { %v4685_v50 = vpack.i.bf16 %v3002_v47, %v7114_v1  ;;  %v2180_v47 = vadd.f32 %v7066_v42, %v7042_v49  ;;  %v2727_v20 = vadd.f32 %v2707_v29, %v2468_v40  ;;  %v2470_v18 = vadd.f32 %v7084_v57, %v2209_v54 }
 0x2b2   :  { %v2211_v57 = vadd.f32 %v7074_v44, %v7050_v15  ;;  %v2185_v29 = vadd.f32 %v7078_v35, %v7052_v24  ;;  %v2187_v40 = vadd.f32 %v7088_v6, %v7056_v11 }
 0x2b3   :  { %4686 = vrot.lane.b32.xlu0 %v4685_v50, %s4731_s4  ;;  %v2469_v55 = vadd.f32 %v7080_v59, %v2180_v47 }
 0x2b4   :  { %v2961_v36 = vpop.f32.mrf.mxu3  ;;  %v2472_v41 = vadd.f32 %v7092_v62, %v2211_v57  ;;  %v2473_v62 = vadd.f32 %v7094_v13, %v2185_v29 }
 0x2b5   :  { %v2982_v16 = vadd.f32 %v2961_v36, %v2723_v52  ;;  %v2935_v53 = vpop.f32.mrf.mxu1  ;;  %v2710_v2 = vpop.f32.mrf.mxu2  ;;  %v2728_v42 = vadd.f32 %v2681_v61, %v2469_v55 }
 0x2b6   :  { %v2983_v45 = vadd.f32 %v2935_v53, %v2724_v3  ;;  %v2729_v12 = vadd.f32 %v2710_v2, %v2470_v18 }
 0x2b7   :  { %v3004_v32 = vadd.f32 %v7110_v63, %v2982_v16  ;;  %v2471_v16 = vadd.f32 %v7086_v5, %v2182_v39  ;;  %v2214_v5 = vadd.f32 %v7082_v56, %v7054_v19 }
 0x2b8   :  { %v7135_v58 = vadd.f32 %v7108_v43, %v2983_v45  ;;  %v2683_v25 = vpop.f32.mrf.mxu0 }
 0x2b9   :  { %v4690_v33 = vpack.i.bf16 %v3004_v32, %v7123_v48  ;;  %v2730_v10 = vadd.f32 %v2683_v25, %v2471_v16  ;;  %v2474_v26 = vadd.f32 %v7096_v0, %v2214_v5  ;;  %v2216_v0 = vadd.f32 %v7090_v14, %v7060_v60 }
 0x2bb   :  { %4691 = vrot.lane.b32.xlu0 %v4690_v33, %s4731_s4 }
 0x2bc   :  { %v2964_v34 = vpop.f32.mrf.mxu3 }
 0x2bd   :  { %v2984_v31 = vadd.f32 %v2964_v34, %v2725_v38  ;;  %v2937_v23 = vpop.f32.mrf.mxu1  ;;  %v2712_v8 = vpop.f32.mrf.mxu2 }
 0x2be   :  { %v2985_v17 = vadd.f32 %v2937_v23, %v2726_v9  ;;  %v2731_v15 = vadd.f32 %v2712_v8, %v2472_v41 }
 0x2bf   :  { %v3006_v30 = vadd.f32 %v7110_v63, %v2984_v31 }
 0x2c0   :  { %v7147_v52 = vadd.f32 %v7108_v43, %v2985_v17  ;;  %v2686_v38 = vpop.f32.mrf.mxu0 }
 0x2c1   :  { %v4695_v7 = vpack.i.bf16 %v3006_v30, %v7135_v58  ;;  %v2732_v31 = vadd.f32 %v2686_v38, %v2473_v62  ;;  %v2475_v30 = vadd.f32 %v7098_v51, %v2187_v40 }
 0x2c3   :  { %4696 = vrot.lane.b32.xlu1 %v4695_v7, %s4731_s4  ;;  %v2476_v7 = vadd.f32 %v7101_v4, %v2216_v0 }
 0x2c4   :  { %v2966_v21 = vpop.f32.mrf.mxu3 }
 0x2c5   :  { %v2986_v50 = vadd.f32 %v2966_v21, %v2727_v20  ;;  %v2940_v46 = vpop.f32.mrf.mxu1  ;;  %v2715_v35 = vpop.f32.mrf.mxu2 }
 0x2c6   :  { %v2987_v22 = vadd.f32 %v2940_v46, %v2728_v42  ;;  %v2733_v56 = vadd.f32 %v2715_v35, %v2474_v26 }
 0x2c7   :  { %v3008_v49 = vadd.f32 %v7110_v63, %v2986_v50 }
 0x2c8   :  { %v7159_v3 = vadd.f32 %v7108_v43, %v2987_v22  ;;  %v2688_v17 = vpop.f32.mrf.mxu0 }
 0x2c9   :  { %v4700_v36 = vpack.i.bf16 %v3008_v49, %v7147_v52  ;;  %v2734_v6 = vadd.f32 %v2688_v17, %v2475_v30 }
 0x2cb   :  { %4701 = vrot.lane.b32.xlu1 %v4700_v36, %s4731_s4 }
 0x2cc   :  { %v2969_v59 = vpop.f32.mrf.mxu3 }
 0x2cd   :  { %v2988_v53 = vadd.f32 %v2969_v59, %v2729_v12  ;;  %v2942_v32 = vpop.f32.mrf.mxu1  ;;  %v2717_v2 = vpop.f32.mrf.mxu2 }
 0x2ce   :  { %v2989_v28 = vadd.f32 %v2942_v32, %v2730_v10  ;;  %v2735_v60 = vadd.f32 %v2717_v2, %v2476_v7 }
 0x2cf   :  { %v3010_v37 = vadd.f32 %v7110_v63, %v2988_v53 }
 0x2d0   :  { %v7171_v27 = vadd.f32 %v7108_v43, %v2989_v28 }
 0x2d1   :  { %v4705_v33 = vpack.i.bf16 %v3010_v37, %v7159_v3 }
 0x2d3   :  { %4706 = vrot.lane.b32.xlu2 %v4705_v33, %s4731_s4 }
 0x2d4   :  { %v2971_v44 = vpop.f32.mrf.mxu3 }
 0x2d5   :  { %v2990_v45 = vadd.f32 %v2971_v44, %v2731_v15  ;;  %v2945_v34 = vpop.f32.mrf.mxu1 }
 0x2d6   :  { %v2991_v19 = vadd.f32 %v2945_v34, %v2732_v31 }
 0x2d7   :  { %v3012_v24 = vadd.f32 %v7110_v63, %v2990_v45 }
 0x2d8   :  { %v7183_v61 = vadd.f32 %v7108_v43, %v2991_v19 }
 0x2d9   :  { %v4710_v23 = vpack.i.bf16 %v3012_v24, %v7171_v27 }
 0x2db   :  { %4711 = vrot.lane.b32.xlu2 %v4710_v23, %s4731_s4 }
 0x2dc   :  { %v2974_v13 = vpop.f32.mrf.mxu3 }
 0x2dd   :  { %v2992_v9 = vadd.f32 %v2974_v13, %v2733_v56  ;;  %v2947_v11 = vpop.f32.mrf.mxu1 }
 0x2de   :  { %v2993_v21 = vadd.f32 %v2947_v11, %v2734_v6 }
 0x2df   :  { %v3014_v47 = vadd.f32 %v7110_v63, %v2992_v9 }
 0x2e0   :  { %v7189_v54 = vadd.f32 %v7108_v43, %v2993_v21 }
 0x2e1   :  { %v4715_v20 = vpack.i.bf16 %v3014_v47, %v7183_v61 }
 0x2e3   :  { %4716 = vrot.lane.b32.xlu0 %v4715_v20, %s4731_s4 }
 0x2e4   :  { %v2976_v14 = vpop.f32.mrf.mxu3 }
 0x2e5   :  { %v2994_v51 = vadd.f32 %v2976_v14, %v2735_v60 }
 0x2e7   :  { %v3016_v4 = vadd.f32 %v7110_v63, %v2994_v51 }
 0x2e9   :  { %v4720_v55 = vpack.i.bf16 %v3016_v4, %v7189_v54 }
 0x2eb   :  { %4721 = vrot.lane.b32.xlu1 %v4720_v55, %s4731_s4 }
 0x325   :  { %v4687_v50 = vpop.permute.xlu0 %4686 }
 0x326   :  { %v4689_v46 = vunpack.i.h.bf16 %v4687_v50  ;;  %v4688_v18 = vunpack.i.l.bf16 %v4687_v50 }
 0x328   :  { %v3066_v49 = vsel %vm3065_vm10, %v4688_v18, %v4689_v46 }
 0x329   :  { %v3082_v42 = vmax.f32 %v7114_v1, %v3066_v49 }
 0x32b   :  { %v3098_v39 = vrot.slane %v3082_v42, 2  ;;  %v3099_v22 = vrot.slane %v3082_v42, 4  ;;  %v3147_v63 = vsel %vm3146_vm11, %v3082_v42, -inf  ;;  %v3100_v25 = vrot.slane %v3082_v42, 6 }
 0x32c   :  { %v3148_v57 = vrot.slane %v3147_v63, 4 }
 0x32d   :  { %v4692_v36 = vpop.permute.xlu0 %4691  ;;  %v3154_v16 = vsel %vm3146_vm11, %v3098_v39, -inf  ;;  %v3161_v53 = vsel %vm3146_vm11, %v3099_v22, -inf  ;;  %v4707_v32 = vpop.permute.xlu2 %4706  ;;  %v3168_v37 = vsel %vm3146_vm11, %v3100_v25, -inf }
 0x32e   :  { %v4694_v43 = vunpack.i.h.bf16 %v4692_v36  ;;  %v4693_v12 = vunpack.i.l.bf16 %v4692_v36  ;;  %v3155_v1 = vrot.slane %v3154_v16, 4  ;;  %v3162_v41 = vrot.slane %v3161_v53, 4 }
 0x32f   :  { %v3149_v10 = vmax.f32 %v3147_v63, %v3148_v57  ;;  %v4709_v33 = vunpack.i.h.bf16 %v4707_v32  ;;  %v4708_v29 = vunpack.i.l.bf16 %v4707_v32  ;;  %v3169_v28 = vrot.slane %v3168_v37, 4 }
 0x330   :  { %v3067_v59 = vsel %vm3065_vm10, %v4693_v12, %v4694_v43  ;;  %v3156_v44 = vmax.f32 %v3154_v16, %v3155_v1  ;;  %v3163_v5 = vmax.f32 %v3161_v53, %v3162_v41  ;;  %v4665_v16 = vld [vmem:[%s7450_s5 + $0x20] sm:$0xff]  ;;  %v4670_v53 = vld [vmem:[%s7450_s5 + $0x48] sm:$0xff] }
 0x331   :  { %v3083_v8 = vmax.f32 %v7123_v48, %v3067_v59  ;;  %v3150_v38 = vrot.slane %v3149_v10, 2  ;;  %v3070_v34 = vsel %vm3065_vm10, %v4708_v29, %v4709_v33  ;;  %v3170_v26 = vmax.f32 %v3168_v37, %v3169_v28  ;;  %3571 = vmatpush.bf16.msrb.mxu2 %v4665_v16  ;;  %3501 = vmatpush.bf16.msrb.mxu0 %v4670_v53 }
 0x332   :  { %v3157_v31 = vrot.slane %v3156_v44, 2  ;;  %v3164_v23 = vrot.slane %v3163_v5, 2  ;;  %v3086_v56 = vmax.f32 %v7159_v3, %v3070_v34 }
 0x333   :  { %v3101_v15 = vrot.slane %v3083_v8, 2  ;;  %v3102_v62 = vrot.slane %v3083_v8, 4  ;;  %v3175_v45 = vsel %vm3146_vm11, %v3083_v8, -inf  ;;  %v3103_v48 = vrot.slane %v3083_v8, 6 }
 0x334   :  { %v3176_v24 = vrot.slane %v3175_v45, 4  ;;  %v3151_v19 = vmax.f32 %v3149_v10, %v3150_v38  ;;  %v3171_v0 = vrot.slane %v3170_v26, 2  ;;  %v3158_v47 = vmax.f32 %v3156_v44, %v3157_v31 }
 0x335   :  { %v3182_v35 = vsel %vm3146_vm11, %v3101_v15, -inf  ;;  %v3189_v40 = vsel %vm3146_vm11, %v3102_v62, -inf  ;;  %v3196_v7 = vsel %vm3146_vm11, %v3103_v48, -inf  ;;  %v3165_v17 = vmax.f32 %v3163_v5, %v3164_v23  ;;  %v4697_v42 = vpop.permute.xlu1 %4696  ;;  %v4712_v28 = vpop.permute.xlu2 %4711 }
 0x336   :  { %v3183_v13 = vrot.slane %v3182_v35, 4  ;;  %v3177_v30 = vmax.f32 %v3175_v45, %v3176_v24  ;;  %v3190_v9 = vrot.slane %v3189_v40, 4  ;;  %v3152_v11 = vrot.slane %v3151_v19, 1 }
 0x337   :  { %v3110_v6 = vrot.slane %v3086_v56, 2  ;;  %v3197_v2 = vrot.slane %v3196_v7, 4  ;;  %v3172_v21 = vmax.f32 %v3170_v26, %v3171_v0  ;;  %v3159_v51 = vrot.slane %v3158_v47, 1 }
 0x338   :  { %v3184_v20 = vmax.f32 %v3182_v35, %v3183_v13  ;;  %v3178_v60 = vrot.slane %v3177_v30, 2  ;;  %v3191_v14 = vmax.f32 %v3189_v40, %v3190_v9  ;;  %v3166_v4 = vrot.slane %v3165_v17, 1 }
 0x339   :  { %v3153_v55 = vmax.f32 %v3151_v19, %v3152_v11  ;;  %v3266_v3 = vsel %vm3146_vm11, %v3110_v6, -inf  ;;  %v3198_v46 = vmax.f32 %v3196_v7, %v3197_v2  ;;  %v3111_v18 = vrot.slane %v3086_v56, 4 }
 0x33a   :  { %v3185_v50 = vrot.slane %v3184_v20, 2  ;;  %v3112_v49 = vrot.slane %v3086_v56, 6  ;;  %v3173_v36 = vrot.slane %v3172_v21, 1  ;;  %v3179_v39 = vmax.f32 %v3177_v30, %v3178_v60 }
 0x33b   :  { %v3192_v22 = vrot.slane %v3191_v14, 2  ;;  %v3160_v43 = vmax.f32 %v3158_v47, %v3159_v51  ;;  %v3167_v12 = vmax.f32 %v3165_v17, %v3166_v4  ;;  %v3267_v63 = vrot.slane %v3266_v3, 4 }
 0x33c   :  { %v3371_v25 = vmax.f32 %v3153_v55, 0.0  ;;  %v3259_v59 = vsel %vm3146_vm11, %v3086_v56, -inf  ;;  %v4699_v57 = vunpack.i.h.bf16 %v4697_v42  ;;  %v3186_v8 = vmax.f32 %v3184_v20, %v3185_v50 }
 0x33d   :  { %v3199_v32 = vrot.slane %v3198_v46, 2  ;;  %v3273_v1 = vsel %vm3146_vm11, %v3111_v18, -inf  ;;  %v3280_v41 = vsel %vm3146_vm11, %v3112_v49, -inf  ;;  %v3174_v37 = vmax.f32 %v3172_v21, %v3173_v36 }
 0x33e   :  { %v3180_v10 = vrot.slane %v3179_v39, 1  ;;  %v3193_v33 = vmax.f32 %v3191_v14, %v3192_v22  ;;  %v4698_v29 = vunpack.i.l.bf16 %v4697_v42  ;;  %v3372_v15 = vmax.f32 %v3160_v43, 0.0 }
 0x33f   :  { %v3373_v44 = vmax.f32 %v3167_v12, 0.0  ;;  %v3260_v5 = vrot.slane %v3259_v59, 4  ;;  %v3268_v62 = vmax.f32 %v3266_v3, %v3267_v63  ;;  %v7218_v45 = vpack.c.bf16 %v3371_v25, %v3371_v25 }
 0x340   :  { %v3274_v38 = vrot.slane %v3273_v1, 4  ;;  %v3281_v34 = vrot.slane %v3280_v41, 4  ;;  %v3068_v26 = vsel %vm3065_vm10, %v4698_v29, %v4699_v57  ;;  %v3187_v48 = vrot.slane %v3186_v8, 1 }
 0x341   :  { %v3200_v24 = vmax.f32 %v3198_v46, %v3199_v32  ;;  %v4714_v35 = vunpack.i.h.bf16 %v4712_v28  ;;  %v4713_v31 = vunpack.i.l.bf16 %v4712_v28  ;;  %v3181_v23 = vmax.f32 %v3179_v39, %v3180_v10 }
 0x342   :  { %v3194_v40 = vrot.slane %v3193_v33, 1  ;;  %v3084_v19 = vmax.f32 %v7135_v58, %v3068_v26  ;;  %v3374_v56 = vmax.f32 %v3174_v37, 0.0  ;;  %v3261_v13 = vmax.f32 %v3259_v59, %v3260_v5  ;;  %v4664_v5 = vld [vmem:[%s7450_s5 + $0x18] sm:$0xff] }
 0x343   :  { %v3269_v0 = vrot.slane %v3268_v62, 2  ;;  %v7222_v30 = vpack.c.bf16 %v3372_v15, %v3372_v15  ;;  %v3519_v9 = vunpack.c.l.b16 %v7218_v45  ;;  %v3275_v7 = vmax.f32 %v3273_v1, %v3274_v38  ;;  %3572 = vmatpush.bf16.msrb.mxu2 %v4664_v5 }
 0x344   :  { %v3282_v47 = vmax.f32 %v3280_v41, %v3281_v34  ;;  %v7225_v17 = vpack.c.bf16 %v3373_v44, %v3373_v44  ;;  %v3188_v11 = vmax.f32 %v3186_v8, %v3187_v48  ;;  %v3201_v6 = vrot.slane %v3200_v24, 1  ;;  %v4702_v44 = vpop.permute.xlu1 %4701 }
 0x345   :  { %v3071_v20 = vsel %vm3065_vm10, %v4713_v31, %v4714_v35  ;;  %v3195_v2 = vmax.f32 %v3193_v33, %v3194_v40  ;;  %v3375_v21 = vmax.f32 %v3181_v23, 0.0  ;;  %v3104_v60 = vrot.slane %v3084_v19, 2  ;;  %v4663_v40 = vld [vmem:[%s7450_s5 + $0x10] sm:$0xff] }
 0x346   :  { %v3203_v58 = vsel %vm3146_vm11, %v3084_v19, -inf  ;;  %v3262_v14 = vrot.slane %v3261_v13, 2  ;;  %v3270_v51 = vmax.f32 %v3268_v62, %v3269_v0  ;;  %v3105_v4 = vrot.slane %v3084_v19, 4  ;;  %v4669_v62 = vld [vmem:[%s7450_s5 + $0x40] sm:$0xff] }
 0x347   :  { %v3106_v55 = vrot.slane %v3084_v19, 6  ;;  %v7229_v3 = vpack.c.bf16 %v3374_v56, %v3374_v56  ;;  %v3276_v50 = vrot.slane %v3275_v7, 2  ;;  %v3283_v46 = vrot.slane %v3282_v47, 2  ;;  %3502 = vmatpush.bf16.msrb.mxu0 %v4669_v62  ;;  %3573 = vmatpush.bf16.msrb.mxu2 %v4663_v40 }
 0x348   :  { %v3087_v18 = vmax.f32 %v7171_v27, %v3071_v20  ;;  %v3448_v49 = vunpack.c.l.b16 %v7222_v30  ;;  %v3608_v42 = vunpack.c.l.b16 %v7225_v17  ;;  %v3202_v36 = vmax.f32 %v3200_v24, %v3201_v6 }
 0x349   :  { %v3204_v39 = vrot.slane %v3203_v58, 4  ;;  %v3376_v22 = vmax.f32 %v3188_v11, 0.0  ;;  %v3377_v43 = vmax.f32 %v3195_v2, 0.0  ;;  %v3404_v12 = vpack.c.bf16 %v3375_v21, %v3375_v21 }
 0x34a   :  { %v3210_v63 = vsel %vm3146_vm11, %v3104_v60, -inf  ;;  %v3263_v25 = vmax.f32 %v3261_v13, %v3262_v14  ;;  %v3271_v59 = vrot.slane %v3270_v51, 1  ;;  %v3217_v57 = vsel %vm3146_vm11, %v3105_v4, -inf }
 0x34b   :  { %v3224_v16 = vsel %vm3146_vm11, %v3106_v55, -inf  ;;  %v3277_v53 = vmax.f32 %v3275_v7, %v3276_v50  ;;  %v3284_v8 = vmax.f32 %v3282_v47, %v3283_v46  ;;  %v3113_v27 = vrot.slane %v3087_v18, 2 }
 0x34c   :  { %v3114_v32 = vrot.slane %v3087_v18, 4  ;;  %v3698_v1 = vunpack.c.l.b16 %v7229_v3  ;;  %v3378_v41 = vmax.f32 %v3202_v36, 0.0  ;;  %v3205_v37 = vmax.f32 %v3203_v58, %v3204_v39 }
 0x34d   :  { %v3211_v10 = vrot.slane %v3210_v63, 4  ;;  %v3422_v33 = vpack.c.bf16 %v3376_v22, %v3376_v22  ;;  %v3520_v29 = vunpack.c.l.b16 %v3404_v12  ;;  %v3218_v28 = vrot.slane %v3217_v57, 4 }
 0x34e   :  { %v3225_v15 = vrot.slane %v3224_v16, 4  ;;  %v7244_v38 = vpack.c.bf16 %v3377_v43, %v3377_v43  ;;  %v3264_v34 = vrot.slane %v3263_v25, 1  ;;  %v3272_v26 = vmax.f32 %v3270_v51, %v3271_v59 }
 0x34f   :  { %v3287_v48 = vsel %vm3146_vm11, %v3087_v18, -inf  ;;  %v3278_v24 = vrot.slane %v3277_v53, 1  ;;  %v3285_v35 = vrot.slane %v3284_v8, 1  ;;  %v3294_v31 = vsel %vm3146_vm11, %v3113_v27, -inf }
 0x350   :  { %v3301_v23 = vsel %vm3146_vm11, %v3114_v32, -inf  ;;  %v3206_v19 = vrot.slane %v3205_v37, 2  ;;  %v3212_v56 = vmax.f32 %v3210_v63, %v3211_v10  ;;  %v3115_v13 = vrot.slane %v3087_v18, 6 }
 0x351   :  { %v4704_v0 = vunpack.i.h.bf16 %v4702_v44  ;;  %v3219_v7 = vmax.f32 %v3217_v57, %v3218_v28  ;;  %v3226_v47 = vmax.f32 %v3224_v16, %v3225_v15  ;;  %v3288_v11 = vrot.slane %v3287_v48, 4 }
 0x352   :  { %v4703_v6 = vunpack.i.l.bf16 %v4702_v44  ;;  %v3449_v20 = vunpack.c.l.b16 %v3422_v33  ;;  %v7252_v2 = vpack.c.bf16 %v3378_v41, %v3378_v41  ;;  %v3295_v21 = vrot.slane %v3294_v31, 4 }
 0x353   :  { %v3302_v60 = vrot.slane %v3301_v23, 4  ;;  %v7257_v58 = vsel %vm1791_vm3, %v3520_v29, %v3519_v9  ;;  %v3265_v14 = vmax.f32 %v3263_v25, %v3264_v34  ;;  %v7259_v51 = vmax.f32 %v3277_v53, %v3278_v24  ;;  %v4668_v25 = vld [vmem:[%s7450_s5 + $0x38] sm:$0xff] }
 0x354   :  { %v7261_v4 = vmax.f32 %v3284_v8, %v3285_v35  ;;  %v3388_v55 = vmax.f32 %v3272_v26, 0.0  ;;  %v3207_v50 = vmax.f32 %v3205_v37, %v3206_v19  ;;  %v3213_v46 = vrot.slane %v3212_v56, 2  ;;  %3503 = vmatpush.bf16.msrb.mxu0 %v4668_v25 }
 0x355   :  { %v3308_v18 = vsel %vm3146_vm11, %v3115_v13, -inf  ;;  %v3220_v36 = vrot.slane %v3219_v7, 2  ;;  %v3227_v39 = vrot.slane %v3226_v47, 2  ;;  %v3289_v22 = vmax.f32 %v3287_v48, %v3288_v11  ;;  %v4717_v37 = vpop.permute.xlu0 %4716 }
 0x356   :  { %v3069_v43 = vsel %vm3065_vm10, %v4703_v6, %v4704_v0  ;;  %v3609_v45 = vunpack.c.l.b16 %v7244_v38  ;;  %v3699_v9 = vunpack.c.l.b16 %v7252_v2  ;;  %v3296_v12 = vmax.f32 %v3294_v31, %v3295_v21 }
 0x357   :  { %v3303_v63 = vmax.f32 %v3301_v23, %v3302_v60  ;;  %v7273_v59 = vsel %vm1791_vm3, %v3449_v20, %v3448_v49  ;;  %v3387_v57 = vmax.f32 %v3265_v14, 0.0  ;;  %v3389_v16 = vmax.f32 %v7259_v51, 0.0 }
 0x358   :  { %v3309_v53 = vrot.slane %v3308_v18, 4  ;;  %v3390_v8 = vmax.f32 %v7261_v4, 0.0  ;;  %v3208_v27 = vrot.slane %v3207_v50, 1  ;;  %v3214_v32 = vmax.f32 %v3212_v56, %v3213_v46 }
 0x359   :  { %v3085_v41 = vmax.f32 %v7147_v52, %v3069_v43  ;;  %v7278_v10 = vpack.c.bf16 %v3388_v55, %v3388_v55  ;;  %v3221_v33 = vmax.f32 %v3219_v7, %v3220_v36  ;;  %v3228_v29 = vmax.f32 %v3226_v47, %v3227_v39 }
 0x35a   :  { %v3290_v30 = vrot.slane %v3289_v22, 2  ;;  %v3297_v28 = vrot.slane %v3296_v12, 2  ;;  %v3304_v49 = vrot.slane %v3303_v63, 2  ;;  %v3310_v5 = vmax.f32 %v3308_v18, %v3309_v53 }
 0x35b   :  { %v3107_v15 = vrot.slane %v3085_v41, 2  ;;  %v3231_v44 = vsel %vm3146_vm11, %v3085_v41, -inf  ;;  %v4719_v34 = vunpack.i.h.bf16 %v4717_v37  ;;  %v4718_v26 = vunpack.i.l.bf16 %v4717_v37 }
 0x35c   :  { %v3232_v62 = vrot.slane %v3231_v44, 4  ;;  %v7281_v48 = vpack.c.bf16 %v3387_v57, %v3387_v57  ;;  %v3209_v24 = vmax.f32 %v3207_v50, %v3208_v27  ;;  %v3215_v52 = vrot.slane %v3214_v32, 1  ;;  %v4667_v27 = vld [vmem:[%s7450_s5 + $0x30] sm:$0xff] }
 0x35d   :  { %v3238_v35 = vsel %vm3146_vm11, %v3107_v15, -inf  ;;  %v3222_v31 = vrot.slane %v3221_v33, 1  ;;  %v3229_v23 = vrot.slane %v3228_v29, 1  ;;  %v3452_v56 = vunpack.c.l.b16 %v7278_v10  ;;  %3504 = vmatpush.bf16.msrb.mxu0 %v4667_v27 }
 0x35e   :  { %v3233_v40 = vmax.f32 %v3231_v44, %v3232_v62  ;;  %v3239_v19 = vrot.slane %v3238_v35, 4  ;;  %v3291_v13 = vmax.f32 %v3289_v22, %v3290_v30  ;;  %v3298_v0 = vmax.f32 %v3296_v12, %v3297_v28  ;;  %v4661_v44 = vld [vmem:[%s7450_s5] sm:$0xff] }
 0x35f   :  { %v3072_v7 = vsel %vm3065_vm10, %v4718_v26, %v4719_v34  ;;  %v3305_v47 = vmax.f32 %v3303_v63, %v3304_v49  ;;  %v3311_v11 = vrot.slane %v3310_v5, 2  ;;  %v3109_v6 = vrot.slane %v3085_v41, 6 }
 0x360   :  { %v3240_v20 = vmax.f32 %v3238_v35, %v3239_v19  ;;  %v3523_v21 = vunpack.c.l.b16 %v7281_v48  ;;  %v3108_v60 = vrot.slane %v3085_v41, 4  ;;  %v3234_v14 = vrot.slane %v3233_v40, 2  ;;  %v4675_v35 = vld [vmem:[%s7450_s5 + $0x70] sm:$0xff] }
 0x361   :  { %v7288_v55 = vmax.f32 %v7183_v61, %v3072_v7  ;;  %v3216_v50 = vmax.f32 %v3214_v32, %v3215_v52  ;;  %v3223_v46 = vmax.f32 %v3221_v33, %v3222_v31  ;;  %v3230_v18 = vmax.f32 %v3228_v29, %v3229_v23  ;;  %v4662_v61 = vld [vmem:[%s7450_s5 + $0x8] sm:$0xff]  ;;  %v4722_v29 = vpop.permute.xlu1 %4721  ;;  %v4680_v52 = vld [vmem:[%s7450_s5 + $0x98] sm:$0xff] }
 0x362   :  { %v3379_v36 = vmax.f32 %v3209_v24, 0.0  ;;  %v3292_v39 = vrot.slane %v3291_v13, 1  ;;  %v3241_v22 = vrot.slane %v3240_v20, 2  ;;  %v3299_v63 = vrot.slane %v3298_v0, 1  ;;  %3574 = vmatpush.bf16.msrb.mxu2 %v4662_v61 }
 0x363   :  { %v3116_v43 = vrot.slane %v7288_v55, 2  ;;  %v3315_v12 = vsel %vm3146_vm11, %v7288_v55, -inf  ;;  %v3306_v25 = vrot.slane %v3305_v47, 1  ;;  %v3312_v57 = vmax.f32 %v3310_v5, %v3311_v11  ;;  %v4666_v5 = vld [vmem:[%s7450_s5 + $0x28] sm:$0xff] }
 0x364   :  { %v3252_v53 = vsel %vm3146_vm11, %v3109_v6, -inf  ;;  %v3235_v32 = vmax.f32 %v3233_v40, %v3234_v14  ;;  %v3245_v41 = vsel %vm3146_vm11, %v3108_v60, -inf  ;;  %v3316_v37 = vrot.slane %v3315_v12, 4  ;;  %3505 = vmatpush.bf16.msrb.mxu0 %v4666_v5 }
 0x365   :  { %v3322_v33 = vsel %vm3146_vm11, %v3116_v43, -inf  ;;  %v3380_v30 = vmax.f32 %v3216_v50, 0.0  ;;  %v3381_v28 = vmax.f32 %v3223_v46, 0.0  ;;  %v3382_v49 = vmax.f32 %v3230_v18, 0.0 }
 0x366   :  { %v3405_v15 = vpack.c.bf16 %v3379_v36, %v3379_v36  ;;  %v3242_v62 = vmax.f32 %v3240_v20, %v3241_v22  ;;  %v3253_v34 = vrot.slane %v3252_v53, 4  ;;  %v3317_v26 = vmax.f32 %v3315_v12, %v3316_v37  ;;  %3575 = vmatpush.bf16.msrb.mxu2 %v4661_v44  ;;  %v4679_v22 = vld [vmem:[%s7450_s5 + $0x90] sm:$0xff] }
 0x367   :  { %v3323_v24 = vrot.slane %v3322_v33, 4  ;;  %v3293_v31 = vmax.f32 %v3291_v13, %v3292_v39  ;;  %v3246_v23 = vrot.slane %v3245_v41, 4  ;;  %v3118_v40 = vrot.slane %v7288_v55, 6 }
 0x368   :  { %v4724_v19 = vunpack.i.h.bf16 %v4722_v29  ;;  %v3236_v7 = vrot.slane %v3235_v32, 1  ;;  %v3318_v11 = vrot.slane %v3317_v26, 2  ;;  %v4723_v20 = vunpack.i.l.bf16 %v4722_v29  ;;  %3660 = vmatpush.bf16.msra.mxu0 %v4675_v35 }
 0x369   :  { %v3324_v6 = vmax.f32 %v3322_v33, %v3323_v24  ;;  %v7315_v60 = vmax.f32 %v3298_v0, %v3299_v63  ;;  %v7317_v14 = vmax.f32 %v3305_v47, %v3306_v25  ;;  %v3313_v50 = vrot.slane %v3312_v57, 1  ;;  %v4674_v0 = vld [vmem:[%s7450_s5 + $0x68] sm:$0xff] }
 0x36a   :  { %v3117_v46 = vrot.slane %v7288_v55, 4  ;;  %v7320_v18 = vpack.c.bf16 %v3380_v30, %v3380_v30  ;;  %v3243_v13 = vrot.slane %v3242_v62, 1  ;;  %v3254_v36 = vmax.f32 %v3252_v53, %v3253_v34  ;;  %3750 = vmatpush.bf16.msra.mxu2 %v4680_v52 }
 0x36b   :  { %v3325_v39 = vrot.slane %v3324_v6, 2  ;;  %v3521_v47 = vunpack.c.l.b16 %v3405_v15  ;;  %v7328_v43 = vpack.c.bf16 %v3381_v28, %v3381_v28  ;;  %v3391_v55 = vmax.f32 %v3293_v31, 0.0 }
 0x36c   :  { %v3336_v12 = vsel %vm3146_vm11, %v3118_v40, -inf  ;;  %v3237_v63 = vmax.f32 %v3235_v32, %v3236_v7  ;;  %v3247_v25 = vmax.f32 %v3245_v41, %v3246_v23  ;;  %v3319_v53 = vmax.f32 %v3317_v26, %v3318_v11  ;;  %3661 = vmatpush.bf16.msra.mxu0 %v4674_v0  ;;  %v4678_v32 = vld [vmem:[%s7450_s5 + $0x88] sm:$0xff]  ;;  %v4673_v41 = vld [vmem:[%s7450_s5 + $0x60] sm:$0xff] }
 0x36d   :  { %v3073_v61 = vsel %vm3065_vm10, %v4723_v20, %v4724_v19  ;;  %v7332_v27 = vpack.c.bf16 %v3382_v49, %v3382_v49  ;;  %v7334_v37 = vmax.f32 %v3312_v57, %v3313_v50  ;;  %v3392_v33 = vmax.f32 %v7315_v60, 0.0 }
 0x36e   :  { %v3329_v29 = vsel %vm3146_vm11, %v3117_v46, -inf  ;;  %v3244_v30 = vmax.f32 %v3242_v62, %v3243_v13  ;;  %v3255_v15 = vrot.slane %v3254_v36, 2  ;;  %v3326_v28 = vmax.f32 %v3324_v6, %v3325_v39  ;;  %3751 = vmatpush.bf16.msra.mxu2 %v4679_v22 }
 0x36f   :  { %v3337_v44 = vrot.slane %v3336_v12, 4  ;;  %v3450_v57 = vunpack.c.l.b16 %v7320_v18  ;;  %v7347_v49 = vsel %vm1793_vm4, %v3521_v47, %v7257_v58  ;;  %v7349_v5 = vpack.c.bf16 %v3391_v55, %v3391_v55  ;;  %v4677_v58 = vld [vmem:[%s7450_s5 + $0x80] sm:$0xff] }
 0x370   :  { %v3089_v62 = vmax.f32 %v7189_v54, %v3073_v61  ;;  %v3248_v34 = vrot.slane %v3247_v25, 2  ;;  %v3383_v26 = vmax.f32 %v3237_v63, 0.0  ;;  %v3320_v24 = vrot.slane %v3319_v53, 1  ;;  %3662 = vmatpush.bf16.msra.mxu0 %v4673_v41  ;;  %v4672_v54 = vld [vmem:[%s7450_s5 + $0x58] sm:$0xff] }
 0x371   :  { %v3330_v52 = vrot.slane %v3329_v29, 4  ;;  %v3256_v19 = vmax.f32 %v3254_v36, %v3255_v15  ;;  %v3384_v7 = vmax.f32 %v3244_v30, 0.0  ;;  %v3327_v11 = vrot.slane %v3326_v28, 1 }
 0x372   :  { %v3119_v35 = vrot.slane %v3089_v62, 2  ;;  %v3120_v31 = vrot.slane %v3089_v62, 4  ;;  %v3121_v23 = vrot.slane %v3089_v62, 6  ;;  %v3343_v40 = vsel %vm3146_vm11, %v3089_v62, -inf  ;;  %3752 = vmatpush.bf16.msra.mxu2 %v4678_v32 }
 0x373   :  { %v3338_v6 = vmax.f32 %v3336_v12, %v3337_v44  ;;  %v3344_v20 = vrot.slane %v3343_v40, 4  ;;  %v3249_v13 = vmax.f32 %v3247_v25, %v3248_v34  ;;  %v3406_v36 = vpack.c.bf16 %v3383_v26, %v3383_v26  ;;  %v4676_v44 = vld [vmem:[%s7450_s5 + $0x78] sm:$0xff]  ;;  %v4671_v25 = vld [vmem:[%s7450_s5 + $0x50] sm:$0xff] }
 0x374   :  { %v3350_v60 = vsel %vm3146_vm11, %v3119_v35, -inf  ;;  %v3357_v50 = vsel %vm3146_vm11, %v3120_v31, -inf  ;;  %v3364_v46 = vsel %vm3146_vm11, %v3121_v23, -inf  ;;  %v3321_v39 = vmax.f32 %v3319_v53, %v3320_v24  ;;  %3663 = vmatpush.bf16.msra.mxu0 %v4672_v54 }
 0x375   :  { %v3331_v22 = vmax.f32 %v3329_v29, %v3330_v52  ;;  %v3345_v0 = vmax.f32 %v3343_v40, %v3344_v20  ;;  %v3351_v47 = vrot.slane %v3350_v60, 4  ;;  %v3358_v55 = vrot.slane %v3357_v50, 4 }
 0x376   :  { %v3365_v12 = vrot.slane %v3364_v46, 4  ;;  %v3257_v63 = vrot.slane %v3256_v19, 1  ;;  %v3424_v61 = vpack.c.bf16 %v3384_v7, %v3384_v7  ;;  %v3328_v30 = vmax.f32 %v3326_v28, %v3327_v11  ;;  %3753 = vmatpush.bf16.msra.mxu2 %v4677_v58 }
 0x377   :  { %v3339_v15 = vrot.slane %v3338_v6, 2  ;;  %v3346_v53 = vrot.slane %v3345_v0, 2  ;;  %v3352_v29 = vmax.f32 %v3350_v60, %v3351_v47  ;;  %v3359_v32 = vmax.f32 %v3357_v50, %v3358_v55 }
 0x378   :  { %v3366_v41 = vmax.f32 %v3364_v46, %v3365_v12  ;;  %v3250_v62 = vrot.slane %v3249_v13, 1  ;;  %v3522_v34 = vunpack.c.l.b16 %v3406_v36  ;;  %v3332_v26 = vrot.slane %v3331_v22, 2  ;;  %3664 = vmatpush.bf16.msra.mxu0 %v4671_v25 }
 0x379   :  { %v3395_v24 = vmax.f32 %v3321_v39, 0.0  ;;  %v3347_v28 = vmax.f32 %v3345_v0, %v3346_v53  ;;  %v3353_v52 = vrot.slane %v3352_v29, 2  ;;  %v3360_v35 = vrot.slane %v3359_v32, 2 }
 0x37a   :  { %v3367_v31 = vrot.slane %v3366_v41, 2  ;;  %v3426_v23 = vpack.c.bf16 %v3392_v33, %v3392_v33  ;;  %v3258_v40 = vmax.f32 %v3256_v19, %v3257_v63  ;;  %v3340_v7 = vmax.f32 %v3338_v6, %v3339_v15  ;;  %3754 = vmatpush.bf16.msra.mxu2 %v4676_v44 }
 0x37b   :  { %v3396_v11 = vmax.f32 %v3328_v30, 0.0  ;;  %v3451_v58 = vunpack.c.l.b16 %v3424_v61  ;;  %v3348_v54 = vrot.slane %v3347_v28, 1  ;;  %v3354_v20 = vmax.f32 %v3352_v29, %v3353_v52 }
 0x37c   :  { %v3368_v60 = vmax.f32 %v3366_v41, %v3367_v31  ;;  %v3457_v50 = vsel %vm1793_vm4, %v3450_v57, %v7273_v59  ;;  %v3251_v46 = vmax.f32 %v3249_v13, %v3250_v62  ;;  %v3333_v36 = vmax.f32 %v3331_v22, %v3332_v26 }
 0x37d   :  { %v3409_v39 = vpack.c.bf16 %v3395_v24, %v3395_v24  ;;  %v3529_v33 = vsel %vm1795_vm5, %v3522_v34, %v7347_v49  ;;  %v3349_v19 = vmax.f32 %v3347_v28, %v3348_v54  ;;  %v3355_v6 = vrot.slane %v3354_v20, 1 }
 0x37e   :  { %v3361_v0 = vmax.f32 %v3359_v32, %v3360_v35  ;;  %v3453_v47 = vunpack.c.l.b16 %v3426_v23  ;;  %v3386_v55 = vmax.f32 %v3258_v40, 0.0  ;;  %v3341_v12 = vrot.slane %v3340_v7, 1 }
 0x37f   :  { %v3427_v63 = vpack.c.bf16 %v3396_v11, %v3396_v11  ;;  %v3356_v61 = vmax.f32 %v3354_v20, %v3355_v6  ;;  %v3369_v30 = vrot.slane %v3368_v60, 1  ;;  %v3399_v15 = vmax.f32 %v3349_v19, 0.0 }
 0x380   :  { %v3458_v18 = vsel %vm1795_vm5, %v3451_v58, %v3457_v50  ;;  %v3385_v44 = vmax.f32 %v3251_v46, 0.0  ;;  %v3334_v59 = vrot.slane %v3333_v36, 1  ;;  %v3525_v57 = vunpack.c.l.b16 %v3409_v39 }
 0x381   :  { %v3530_v13 = vsel %vm1797_vm6, %v3523_v21, %v3529_v33  ;;  %v3524_v49 = vunpack.c.l.b16 %v7349_v5  ;;  %v3362_v22 = vrot.slane %v3361_v0, 1  ;;  %v3400_v25 = vmax.f32 %v3356_v61, 0.0 }
 0x382   :  { %v3410_v53 = vpack.c.bf16 %v3399_v15, %v3399_v15  ;;  %v3674_v29 = vpack.c.bf16 %v3386_v55, %v3386_v55  ;;  %v3342_v32 = vmax.f32 %v3340_v7, %v3341_v12  ;;  %v3454_v41 = vunpack.c.l.b16 %v3427_v63 }
 0x383   :  { %v3459_v62 = vsel %vm1797_vm6, %v3452_v56, %v3458_v18  ;;  %v3370_v34 = vmax.f32 %v3368_v60, %v3369_v30  ;;  %v3428_v26 = vpack.c.bf16 %v3400_v25, %v3400_v25  ;;  %v3531_v28 = vsel %vm1799_vm7, %v3524_v49, %v3530_v13 }
 0x384   :  { %v3526_v24 = vunpack.c.l.b16 %v3410_v53  ;;  %v3584_v48 = vpack.c.bf16 %v3385_v44, %v3385_v44  ;;  %v3335_v52 = vmax.f32 %v3333_v36, %v3334_v59  ;;  %v3532_v21 = vsel %vm1801_vm8, %v3525_v57, %v3531_v28 }
 0x385   :  { %v3363_v5 = vmax.f32 %v3361_v0, %v3362_v22  ;;  %v3455_v31 = vunpack.c.l.b16 %v3428_v26  ;;  %v3460_v23 = vsel %vm1799_vm7, %v3453_v47, %v3459_v62  ;;  %v3700_v10 = vunpack.c.l.b16 %v7332_v27  ;;  %v3774_v22 = vld [vmem:[%s7453_s7 + $0x18] sm:$0x1]  ;;  %v4681_v62 = vld [vmem:[%s7453_s7] sm:$0xff] }
 0x386   :  { %v3533_v35 = vsel %vm1803_vm9, %v3526_v24, %v3532_v21  ;;  %v3398_v40 = vmax.f32 %v3342_v32, 0.0  ;;  %v3461_v7 = vsel %vm1801_vm8, %v3454_v41, %v3460_v23  ;;  %v3394_v11 = vmax.f32 %v7334_v37, 0.0  ;;  %v4683_v32 = vld [vmem:[%s7453_s7 + $0x10] sm:$0xff]  ;;  %v4682_v41 = vld [vmem:[%s7453_s7 + $0x8] sm:$0xff] }
 0x387   :  { %v3534_v56 = vpack.c.b16 %v3533_v35, %v3533_v35  ;;  %v3701_v58 = vunpack.c.l.b16 %v3674_v29  ;;  %v3402_v54 = vmax.f32 %v3370_v34, 0.0  ;;  %v3462_v20 = vsel %vm1803_vm9, %v3455_v31, %v3461_v7 }
 0x388   :  { %v3675_v60 = vpack.c.bf16 %v3390_v8, %v3390_v8  ;;  %v3610_v50 = vunpack.c.l.b16 %v7328_v43  ;;  %v3397_v46 = vmax.f32 %v3335_v52, 0.0  ;;  %v3463_v27 = vpack.c.b16 %v3462_v20, %v3462_v20 }
 0x389   :  { %4463 = vmatmul.msk.bf16.vlgmr.msrb.gmra.mxu2 %vm3494_vm12, %v3534_v56  ;;  %v3706_v37 = vsel %vm1791_vm3, %v3699_v9, %v3698_v1  ;;  %v3393_v36 = vmax.f32 %v7317_v14, 0.0  ;;  %v3611_v39 = vunpack.c.l.b16 %v3584_v48  ;;  %v3401_v33 = vmax.f32 %v3363_v5, 0.0  ;;  %v4725_v5 = vld [vmem:[%s7451_s6] ss:$0 sm:$0xff] }
 0x38a   :  { %v3585_v4 = vpack.c.bf16 %v3389_v16, %v3389_v16  ;;  %v3707_v8 = vsel %vm1793_vm4, %v3700_v10, %v3706_v37  ;;  %v3677_v43 = vpack.c.bf16 %v3398_v40, %v3398_v40  ;;  %4442 = vmatmul.msk.bf16.vlgmr.msrb.gmra.mxu0 %vm3494_vm12, %v3463_v27  ;;  %v3616_v3 = vsel %vm1791_vm3, %v3609_v45, %v3608_v42 }
 0x38b   :  { %v3676_v1 = vpack.c.bf16 %v3394_v11, %v3394_v11  ;;  %v3678_v2 = vpack.c.bf16 %v3402_v54, %v3402_v54  ;;  %v3708_v9 = vsel %vm1795_vm5, %v3701_v58, %v3707_v8  ;;  %v3702_v14 = vunpack.c.l.b16 %v3675_v60  ;;  %v4726_v11 = vld [vmem:[%s7452_s8] ss:$0 sm:$0xff] }
 0x38c   :  { %v3617_v51 = vsel %vm1793_vm4, %v3610_v50, %v3616_v3  ;;  %v3587_v19 = vpack.c.bf16 %v3397_v46, %v3397_v46  ;;  %v3586_v16 = vpack.c.bf16 %v3393_v36, %v3393_v36  ;;  %v3588_v6 = vpack.c.bf16 %v3401_v33, %v3401_v33 }
 0x38d   :  { %v3618_v0 = vsel %vm1795_vm5, %v3611_v39, %v3617_v51  ;;  %v3612_v47 = vunpack.c.l.b16 %v3585_v4  ;;  %v3704_v55 = vunpack.c.l.b16 %v3677_v43  ;;  %v3709_v17 = vsel %vm1797_vm6, %v3702_v14, %v3708_v9 }
 0x38e   :  { %v3703_v12 = vunpack.c.l.b16 %v3676_v1  ;;  %v3705_v38 = vunpack.c.l.b16 %v3678_v2  ;;  %v3614_v63 = vunpack.c.l.b16 %v3587_v19  ;;  %v3613_v45 = vunpack.c.l.b16 %v3586_v16 }
 0x38f   :  { %v3619_v42 = vsel %vm1797_vm6, %v3612_v47, %v3618_v0  ;;  %v3615_v30 = vunpack.c.l.b16 %v3588_v6  ;;  %v3792_v25 = vunpack.c.l.b16 %v3774_v22 }
 0x390   :  { %v3710_v61 = vsel %vm1799_vm7, %v3703_v12, %v3709_v17  ;;  %v3620_v44 = vsel %vm1799_vm7, %v3613_v45, %v3619_v42 }
 0x391   :  { %v3711_v15 = vsel %vm1801_vm8, %v3704_v55, %v3710_v61  ;;  %v3621_v59 = vsel %vm1801_vm8, %v3614_v63, %v3620_v44  ;;  %v3796_v53 = vpack.c.b16 %v3792_v25, %v3792_v25 }
 0x392   :  { %v3712_v18 = vsel %vm1803_vm9, %v3705_v38, %v3711_v15  ;;  %v3622_v57 = vsel %vm1803_vm9, %v3615_v30, %v3621_v59 }
 0x393   :  { %v3713_v13 = vpack.c.b16 %v3712_v18, %v3712_v18  ;;  %v3623_v49 = vpack.c.b16 %v3622_v57, %v3622_v57  ;;  %v3806_v29 = vsel %vm3804_vm13, %v3796_v53, 0 }
 0x394   :  { %3812 = vmatpush.bf16.msrb.mxu0 %v3806_v29 }
 0x398   :  { %3813 = vmatpush.bf16.msrb.mxu0 %v4683_v32 }
 0x399   :  { %4525 = vmatmul.msk.bf16.vlgmr.msra.gmra.mxu2 %vm3494_vm12, %v3713_v13 }
 0x39a   :  { %4494 = vmatmul.msk.bf16.vlgmr.msra.gmra.mxu0 %vm3494_vm12, %v3623_v49 }
 0x39c   :  { %3814 = vmatpush.bf16.msrb.mxu0 %v4682_v41 }
 0x3a0   :  { %3815 = vmatpush.bf16.msrb.mxu0 %v4681_v62 }
 0x407   :  { %v3507_v34 = vpop.f32.mrf.mxu0 }
 0x40c   :  { %v3577_v26 = vpop.f32.mrf.mxu2 }
 0x40d   :  { %v3578_v52 = vadd.f32 %v3577_v26, %v3507_v34 }
 0x40f   :  { %v3509_v24 = vpop.f32.mrf.mxu0 }
 0x414   :  { %v3579_v28 = vpop.f32.mrf.mxu2 }
 0x417   :  { %v3666_v48 = vpop.f32.mrf.mxu0 }
 0x418   :  { %v3670_v21 = vadd.f32 %v3666_v48, %v3578_v52 }
 0x41c   :  { %v3756_v35 = vpop.f32.mrf.mxu2 }
 0x41d   :  { %v3760_v31 = vadd.f32 %v3756_v35, %v3670_v21 }
 0x41f   :  { %v3765_v23 = vadd.f32 %v4725_v5, %v3760_v31  ;;  %v3668_v10 = vpop.f32.mrf.mxu0 }
 0x421   :  { %v3766_v40 = vmax.f32 %v3765_v23, 0.0 }
 0x423   :  { %v3767_v56 = vpack.c.bf16 %v3766_v40, %v3766_v40 }
 0x424   :  { %v3758_v7 = vpop.f32.mrf.mxu2 }
 0x425   :  { %4538 = vmatmul.msk.bf16.vlgmr.msrb.gmra.mxu0 %vm3800_vm14, %v3767_v56 }
 0x4a2   :  { %v3817_v58 = vpop.f32.mrf.mxu0 }
 0x4a3   :  { %v3818_v54 = vadd.f32 %v4726_v11, %v3817_v58 }
 0x4a5   :  { %3821 = vmax.xlane.f32.xlu2 %v3818_v54 }
 0x4aa   :  { %v3819_v20 = vpop.f32.mrf.mxu0 }
 0x518   :  { %v3822_v60 = vpop.xlane.xlu2 %3821 }
 0x519   :  { %v3823_v50 = vsub.f32 %v3818_v54, %v3822_v60 }
 0x51b   :  { %v3824_v46 = vmul.f32 1.442695, %v3823_v50 }
 0x51d   :  { %4727 = vpow2.f32 %v3824_v46 }
 0x523   :  { %v4728_v27 = vpop.eup %4727 }
 0x524   :  { %3826 = vadd.xlane.f32.xlu0 %v4728_v27 }
 0x597   :  { %v3827_v37 = vpop.xlane.xlu0 %3826 }
 0x598   :  { %4729 = vlog2.f32 %v3827_v37 }
 0x59e   :  { %v4730_v36 = vpop.eup %4729 }
 0x59f   :  { %v3829_v39 = vmul.f32 0.6931472, %v4730_v36 }
 0x5a1   :  { %v3830_v33 = vsub.f32 %v3823_v50, %v3829_v39 }
 0x5a3   :  { %3831 = vst [vmem:[%s7454_s9] sm:$0xff] %v3830_v33 }

</bundles_post_ra>
